<compile_context>
chip_gen: v6e
topology: v6e:2x2x1
jax: 0.10.0
libtpu: 0.0.40
codegen_flags: <defaults>
</compile_context>

<pallas_src>
import math

import jax
import jax.numpy as jnp
from jax.experimental import pallas as pl
from jax.experimental.pallas import tpu as pltpu


# ============================================================================
# One-time host-side layout helpers (run at parameter-init time, NOT per call).
# ============================================================================
def bilinear_matrix(n):
    """(2n, n) interp matrix of nn.Upsample(scale=2, bilinear, align_corners=False)."""
    out = 2 * n
    i = jnp.arange(out, dtype=jnp.float32)
    src = jnp.maximum((i + 0.5) / 2.0 - 0.5, 0.0)
    i0 = jnp.floor(src).astype(jnp.int32)
    i1 = jnp.minimum(i0 + 1, n - 1)
    w1 = src - i0.astype(jnp.float32)
    w0 = 1.0 - w1
    m = jnp.zeros((out, n), jnp.float32)
    m = m.at[jnp.arange(out), i0].add(w0)
    m = m.at[jnp.arange(out), i1].add(w1)
    return m


def banded_conv_weights(w, width):
    """3x3 stride-1 pad-1 conv (3,3,Cin,Cout) -> K-stacked (3*width*Cin, width*Cout)
    bf16 matrix.  Row block dy acts on input row y+dy-1; dx taps + W padding in band."""
    cin, cout = w.shape[2], w.shape[3]
    mats = []
    for dy in range(3):
        m = jnp.zeros((width * cin, width * cout), jnp.float32)
        for dx in range(3):
            sel = jnp.eye(width, k=1 - dx, dtype=jnp.float32)   # sel[b,w]=1 iff b==w+dx-1
            m = m + jnp.einsum('bw,io->biwo', sel, w[dy, dx]).reshape(width * cin,
                                                                      width * cout)
        mats.append(m)
    return jnp.concatenate(mats, axis=0).astype(jnp.bfloat16)


def banded_conv_weights_s2(w, width_in, width_out):
    """Stride-2 variant -> (3*width_in*Cin, width_out*Cout) bf16 (column stride folded)."""
    cin, cout = w.shape[2], w.shape[3]
    b_idx = jnp.arange(width_in)[:, None]
    o_idx = jnp.arange(width_out)[None, :]
    mats = []
    for dy in range(3):
        m = jnp.zeros((width_in * cin, width_out * cout), jnp.float32)
        for dx in range(3):
            sel = (b_idx == 2 * o_idx + dx - 1).astype(jnp.float32)
            m = m + jnp.einsum('bw,io->biwo', sel, w[dy, dx]).reshape(width_in * cin,
                                                                      width_out * cout)
        mats.append(m)
    return jnp.concatenate(mats, axis=0).astype(jnp.bfloat16)


def bias_row(b, width):
    """(Cout,) -> (1, width*Cout) lane-expanded row (lane index = w*Cout + c)."""
    return jnp.tile(b, width).reshape(1, width * b.shape[0]).astype(jnp.float32)


def channel_avg_matrix(c, width, count):
    """(L, L) matrix P with P[l, l'] = 1/count iff channel(l)==channel(l').
    (1,L) @ P == per-channel mean broadcast back to every lane of that channel."""
    em = jnp.tile(jnp.eye(c, dtype=jnp.float32), (1, width))       # (C, W*C)
    return (em.T @ em) / float(count)


def row_shift_matrices(n, h):
    """(2*N*H, N*H) bf16: rows [0:NH) pick the previous image row (zero at the top
    border), rows [NH:2NH) the next image row (zero at the bottom border)."""
    nh = n * h
    r = jnp.arange(nh)
    rr = r % h
    cols = jnp.arange(nh)[None, :]
    up = ((cols == (r - 1)[:, None]) & (rr >= 1)[:, None]).astype(jnp.float32)
    dn = ((cols == (r + 1)[:, None]) & (rr <= h - 2)[:, None]).astype(jnp.float32)
    return jnp.concatenate([up, dn], axis=0).astype(jnp.bfloat16)


def downsample_row_select(n, h):
    """(3*N*Ho, N*H) bf16: block dy selects input row 2*yo+dy-1 (zero outside image)."""
    ho = h // 2
    out_r = jnp.arange(n * ho)
    img, yo = out_r // ho, out_r % ho
    cols = jnp.arange(n * h)[None, :]
    mats = []
    for dy in range(3):
        yi = 2 * yo + dy - 1
        valid = (yi >= 0) & (yi < h)
        tgt = img * h + jnp.clip(yi, 0, h - 1)
        mats.append(((cols == tgt[:, None]) & valid[:, None]).astype(jnp.float32))
    return jnp.concatenate(mats, axis=0).astype(jnp.bfloat16)


def upsample_row_matrix(n, h_in):
    """(N*2H, N*H) bf16 block-diagonal bilinear row-interpolation matrix."""
    return jnp.kron(jnp.eye(n, dtype=jnp.float32), bilinear_matrix(h_in)).astype(jnp.bfloat16)


def upsample_col_matrix(width_in, c):
    """(width_in*C, 2*width_in*C) bf16 lane (column) bilinear interpolation matrix."""
    b = bilinear_matrix(width_in)                                   # (2w, w)
    eye = jnp.eye(c, dtype=jnp.float32)
    m = jnp.einsum('uv,cd->vcud', b, eye).reshape(width_in * c, 2 * width_in * c)
    return m.astype(jnp.bfloat16)


def make_constants(n, h0, w0, channels):
    """Structural (non-learned) matrices, built once."""
    n_lvl = len(channels) - 1
    heights = [h0 >> i for i in range(len(channels))]
    widths = [w0 >> i for i in range(len(channels))]
    return {
        'P': [channel_avg_matrix(channels[i], widths[i], n * heights[i] * widths[i])
              for i in range(len(channels))],
        'S': [row_shift_matrices(n, heights[i]) for i in range(len(channels))],
        'R': [downsample_row_select(n, heights[i]) for i in range(n_lvl)],
        'MH': [upsample_row_matrix(n, heights[i + 1]) for i in range(n_lvl)],
        'MW': [upsample_col_matrix(widths[i + 1], channels[i + 1]) for i in range(n_lvl)],
    }


# ============================================================================
# The single fused Pallas kernel.
# ============================================================================
def _zero_map(nd):
    def im(i):
        return (0,) * nd
    return im


def _make_unet_kernel(treedef, n, h0, channels):
    n_lvl = len(channels) - 1
    heights = [h0 >> i for i in range(len(channels))]

    def kernel(*refs):
        out_ref = refs[-1]
        kin = jax.tree_util.tree_unflatten(treedef, list(refs[:-1]))

        def silu(v):
            return v * jax.nn.sigmoid(v)

        def conv3(v, s_stk, w_stk, add, nh):
            """3x3 stride-1 pad-1 conv on a lane-dense (N*H, W*C) f32 map."""
            xb = v.astype(jnp.bfloat16)
            # +/-1-row taps via a precomputed shift matrix (zeros encode H padding).
            sx = jnp.dot(s_stk, xb, preferred_element_type=jnp.float32).astype(jnp.bfloat16)
            up, dn = sx[0:nh], sx[nh:2 * nh]
            l_in = v.shape[-1]
            if l_in % 128 == 0:
                # K-stacked: one MXU matmul per conv (K = 3*W*Cin).
                slab = jnp.concatenate([up, xb, dn], axis=-1)
                y = jnp.dot(slab, w_stk, preferred_element_type=jnp.float32)
            else:
                # init conv (W*Cin = 16 lanes): keep three K=16 matmuls, no lane concat.
                y = (jnp.dot(up, w_stk[0:l_in], preferred_element_type=jnp.float32)
                     + jnp.dot(xb, w_stk[l_in:2 * l_in], preferred_element_type=jnp.float32)
                     + jnp.dot(dn, w_stk[2 * l_in:3 * l_in], preferred_element_type=jnp.float32))
            return y + add

        def batchnorm(v, g_row, b_row, p_mat):
            """Training-mode BatchNorm2d with in-kernel batch statistics."""
            s1 = jnp.sum(v, axis=0, keepdims=True)
            s2 = jnp.sum(v * v, axis=0, keepdims=True)
            mean = jnp.dot(s1, p_mat, preferred_element_type=jnp.float32)      # (1, L)
            var = jnp.maximum(jnp.dot(s2, p_mat, preferred_element_type=jnp.float32)
                              - mean * mean, 0.0)
            scale = g_row * jax.lax.rsqrt(var + 1e-5)
            return v * scale + (b_row - mean * scale)

        def resblock(v, rb, s_stk, p_mat, nh):
            # block1: SiLU -> BN -> conv, then + (bias1 + time/label adapters)
            h1 = conv3(batchnorm(silu(v), rb['g1'][...], rb['be1'][...], p_mat),
                       s_stk, rb['w1'][...], rb['add'][...], nh)
            # block2: SiLU -> BN -> conv, then + bias2, then residual add
            h2 = conv3(batchnorm(silu(h1), rb['g2'][...], rb['be2'][...], p_mat),
                       s_stk, rb['w2'][...], rb['b2'][...], nh)
            return h2 + v

        P = [p[...] for p in kin['P']]     # per-level channel-average matrices (f32)
        S = [s[...] for s in kin['S']]     # per-level row-shift matrices (bf16)

        # ---- init: Conv(1->c0) -> BatchNorm(batch stats) -> SiLU ------------------
        v = conv3(kin['x'][...], S[0], kin['init']['w'][...], kin['init']['b'][...],
                  n * heights[0])
        v = silu(batchnorm(v, kin['init']['g'][...], kin['init']['be'][...], P[0]))

        # ---- encoders --------------------------------------------------------------
        skips = []
        for li in range(n_lvl):
            enc = kin['enc'][li]
            nh = n * heights[li]
            for rb in enc['res']:
                v = resblock(v, rb, S[li], P[li], nh)
            # stride-2 downsample conv: row selection matmul + K-stacked banded matmul.
            nho = n * heights[li + 1]
            xb = v.astype(jnp.bfloat16)
            sel = jnp.dot(enc['down']['R'][...], xb,
                          preferred_element_type=jnp.float32).astype(jnp.bfloat16)
            slab = jnp.concatenate([sel[0:nho], sel[nho:2 * nho], sel[2 * nho:3 * nho]],
                                   axis=-1)
            v = jnp.dot(slab, enc['down']['w'][...],
                        preferred_element_type=jnp.float32) + enc['down']['b'][...]
            skips.append(v)

        # ---- midcoder --------------------------------------------------------------
        for rb in kin['mid']:
            v = resblock(v, rb, S[n_lvl], P[n_lvl], n * heights[n_lvl])

        # ---- decoders --------------------------------------------------------------
        for k in range(n_lvl):
            li = n_lvl - 1 - k
            dec = kin['dec'][k]
            v = v + skips.pop()                         # skip-add at the coarse level
            # bilinear 2x upsample = two small bf16 matmuls (rows, then lanes).
            vb = v.astype(jnp.bfloat16)
            tmp = jnp.dot(vb, dec['up']['MW'][...],
                          preferred_element_type=jnp.float32).astype(jnp.bfloat16)
            up = jnp.dot(dec['up']['MH'][...], tmp, preferred_element_type=jnp.float32)
            v = conv3(up, S[li], dec['up']['w'][...], dec['up']['b'][...], n * heights[li])
            for rb in dec['res']:
                v = resblock(v, rb, S[li], P[li], n * heights[li])

        # ---- final conv (c0 -> 1) --------------------------------------------------
        out_ref[...] = conv3(v, S[0], kin['final']['w'][...], kin['final']['b'][...],
                             n * heights[0])

    return kernel


# ============================================================================
# Forward pass wrapper: tiny embedding/adapter math in plain JAX, everything
# heavy in the single fused pallas_call.
# ============================================================================
def fourier_encode(t, weights):
    t2 = t.reshape(-1, 1)
    freqs = t2 * weights * (2.0 * math.pi)
    return jnp.concatenate([jnp.sin(freqs), jnp.cos(freqs)], axis=-1) * math.sqrt(2.0)


def adapter_apply(p1, p2, e):
    # TODO(synk): these (bs, 8)-sized Linear/SiLU/Linear adapters stay in plain JAX.
    h = jax.nn.silu(jnp.dot(e, p1['w']) + p1['b'])
    return jnp.dot(h, p2['w']) + p2['b']


def mnist_unet_forward(params, consts, x_nchw, t, y, *, channels):
    n, _, h0, w0 = x_nchw.shape
    n_lvl = len(channels) - 1
    heights = [h0 >> i for i in range(len(channels))]
    widths = [w0 >> i for i in range(len(channels))]

    t_embed = fourier_encode(t, params['fourier_w'])
    y_embed = jnp.take(params['y_table'], y, axis=0)

    def res_inputs(rp, lvl):
        w = widths[lvl]
        # bias1 + time adapter + label adapter, pre-broadcast to (N*H, W*C) so the
        # kernel adds it with a single VPU add (no broadcast matmuls in-kernel).
        add = (rp['b1'][None, :]
               + adapter_apply(rp['t1'], rp['t2'], t_embed)
               + adapter_apply(rp['y1'], rp['y2'], y_embed))                 # (N, C)
        add = jnp.repeat(jnp.tile(add, (1, w)), heights[lvl], axis=0)        # (N*H, W*C)
        return {'w1': rp['w1'], 'w2': rp['w2'],
                'g1': rp['g1'], 'be1': rp['be1'],
                'g2': rp['g2'], 'be2': rp['be2'],
                'add': add.astype(jnp.float32), 'b2': rp['b2']}

    kin = {
        'x': x_nchw.reshape(n * h0, w0).astype(jnp.float32),
        'P': consts['P'],
        'S': consts['S'],
        'init': params['init'],
        'enc': [{'res': [res_inputs(rp, li) for rp in ep['res']],
                 'down': {'R': consts['R'][li],
                          'w': ep['down']['w'], 'b': ep['down']['b']}}
                for li, ep in enumerate(params['encoders'])],
        'mid': [res_inputs(rp, n_lvl) for rp in params['mid']],
        'dec': [{'up': {'MH': consts['MH'][n_lvl - 1 - k],
                        'MW': consts['MW'][n_lvl - 1 - k],
                        'w': dp['up']['w'], 'b': dp['up']['b']},
                 'res': [res_inputs(rp, n_lvl - 1 - k) for rp in dp['res']]}
                for k, dp in enumerate(params['decoders'])],
        'final': params['final'],
    }

    leaves, treedef = jax.tree_util.tree_flatten(kin)
    kernel = _make_unet_kernel(treedef, n, h0, tuple(channels))

    out = pl.pallas_call(
        kernel,
        out_shape=jax.ShapeDtypeStruct((n * h0, w0), jnp.float32),
        grid_spec=pltpu.PrefetchScalarGridSpec(
            num_scalar_prefetch=0,
            grid=(1,),
            in_specs=[pl.BlockSpec(tuple(a.shape), _zero_map(a.ndim)) for a in leaves],
            out_specs=pl.BlockSpec((n * h0, w0), _zero_map(2)),
            scratch_shapes=[]),
        compiler_params=pltpu.CompilerParams(
            dimension_semantics=("arbitrary",),
            # ~3 MiB actually used; 32 MiB is safe on v5e/v6e (128 MiB) and v7x (64 MiB).
            vmem_limit_bytes=32 * 1024 * 1024),
    )(*leaves)
    return out.reshape(n, 1, h0, w0)


# ============================================================================
# Deterministic synthetic parameters (shapes follow the PyTorch module; conv
# weights stored in the TPU-friendly K-stacked block-banded bf16 layout,
# BN/bias terms as pre-broadcast (1, W*C) rows).
# ============================================================================
def init_params(key, channels, num_res, t_dim, y_dim, H, W):
    keys = iter(jax.random.split(key, 512))
    nk = lambda: next(keys)
    widths = [W >> i for i in range(len(channels))]

    def conv_w(cin, cout):
        return jax.random.normal(nk(), (3, 3, cin, cout), jnp.float32) / math.sqrt(9 * cin)

    def conv_b(cout):
        return jax.random.normal(nk(), (cout,), jnp.float32) * 0.01

    def lin_p(din, dout):
        return {'w': jax.random.normal(nk(), (din, dout), jnp.float32) / math.sqrt(din),
                'b': jax.random.normal(nk(), (dout,), jnp.float32) * 0.01}

    def res_p(c, width):
        return {'w1': banded_conv_weights(conv_w(c, c), width),
                'b1': conv_b(c),
                'g1': bias_row(jnp.ones((c,), jnp.float32), width),
                'be1': bias_row(jnp.zeros((c,), jnp.float32), width),
                'w2': banded_conv_weights(conv_w(c, c), width),
                'b2': bias_row(conv_b(c), width),
                'g2': bias_row(jnp.ones((c,), jnp.float32), width),
                'be2': bias_row(jnp.zeros((c,), jnp.float32), width),
                't1': lin_p(t_dim, t_dim), 't2': lin_p(t_dim, c),
                'y1': lin_p(y_dim, y_dim), 'y2': lin_p(y_dim, c)}

    c0 = channels[0]
    params = {
        'fourier_w': jax.random.normal(nk(), (1, t_dim // 2), jnp.float32),
        'y_table': jax.random.normal(nk(), (11, y_dim), jnp.float32),
        'init': {'w': banded_conv_weights(conv_w(1, c0), W),
                 'b': bias_row(conv_b(c0), W),
                 'g': bias_row(jnp.ones((c0,), jnp.float32), W),
                 'be': bias_row(jnp.zeros((c0,), jnp.float32), W)},
        'final': {'w': banded_conv_weights(conv_w(c0, 1), W),
                  'b': bias_row(conv_b(1), W)},
        'mid': [res_p(channels[-1], widths[-1]) for _ in range(num_res)],
        'encoders': [],
        'decoders': [],
    }
    for li, (ci, co) in enumerate(zip(channels[:-1], channels[1:])):
        params['encoders'].append({
            'res': [res_p(ci, widths[li]) for _ in range(num_res)],
            'down': {'w': banded_conv_weights_s2(conv_w(ci, co), widths[li], widths[li + 1]),
                     'b': bias_row(conv_b(co), widths[li + 1])},
        })
    decoders = []
    for li, (ci, co) in enumerate(zip(channels[:-1], channels[1:])):
        decoders.append({
            'up': {'w': banded_conv_weights(conv_w(co, ci), widths[li]),
                   'b': bias_row(conv_b(ci), widths[li])},
            'res': [res_p(ci, widths[li]) for _ in range(num_res)],
        })
    params['decoders'] = list(reversed(decoders))
    return params


if __name__ == "__main__":
    key = jax.random.PRNGKey(0)
    pkey, xkey, tkey, ykey = jax.random.split(key, 4)

    channels = [8, 16]          # one encoder / one decoder level
    num_residual_layers = 1
    t_embed_dim = 8
    y_embed_dim = 8
    bs, H, W = 2, 16, 16

    params = init_params(pkey, channels, num_residual_layers,
                         t_embed_dim, y_embed_dim, H, W)
    consts = make_constants(bs, H, W, channels)

    x = jax.random.normal(xkey, (bs, 1, H, W), jnp.float32)
    t = jax.random.uniform(tkey, (bs, 1, 1, 1), jnp.float32)
    y = jax.random.randint(ykey, (bs,), 0, 11)

    fwd = jax.jit(lambda p, c, xi, ti, yi:
                  mnist_unet_forward(p, c, xi, ti, yi, channels=channels))
    out = jax.block_until_ready(fwd(params, consts, x, t, y))

    assert out.shape == (bs, 1, H, W), out.shape
    assert bool(jnp.all(jnp.isfinite(out)))
    print("KERNEL_OK")
</pallas_src>

<mosaic_0001>
module attributes {stable_mosaic.version = 11 : i64} {
  func.func @kernel(%arg0: i32, %arg1: memref<128x128xf32, #tpu.memory_space<vmem>>, %arg2: memref<128x128xf32, #tpu.memory_space<vmem>>, %arg3: memref<64x32xbf16, #tpu.memory_space<vmem>>, %arg4: memref<32x16xbf16, #tpu.memory_space<vmem>>, %arg5: memref<32x128xf32, #tpu.memory_space<vmem>>, %arg6: memref<1x128xf32, #tpu.memory_space<vmem>>, %arg7: memref<1x128xf32, #tpu.memory_space<vmem>>, %arg8: memref<1x128xf32, #tpu.memory_space<vmem>>, %arg9: memref<1x128xf32, #tpu.memory_space<vmem>>, %arg10: memref<1x128xf32, #tpu.memory_space<vmem>>, %arg11: memref<384x128xbf16, #tpu.memory_space<vmem>>, %arg12: memref<384x128xbf16, #tpu.memory_space<vmem>>, %arg13: memref<32x16xbf16, #tpu.memory_space<vmem>>, %arg14: memref<128x256xbf16, #tpu.memory_space<vmem>>, %arg15: memref<1x128xf32, #tpu.memory_space<vmem>>, %arg16: memref<768x128xbf16, #tpu.memory_space<vmem>>, %arg17: memref<48x32xbf16, #tpu.memory_space<vmem>>, %arg18: memref<1x128xf32, #tpu.memory_space<vmem>>, %arg19: memref<384x128xbf16, #tpu.memory_space<vmem>>, %arg20: memref<32x128xf32, #tpu.memory_space<vmem>>, %arg21: memref<1x128xf32, #tpu.memory_space<vmem>>, %arg22: memref<1x128xf32, #tpu.memory_space<vmem>>, %arg23: memref<1x128xf32, #tpu.memory_space<vmem>>, %arg24: memref<1x128xf32, #tpu.memory_space<vmem>>, %arg25: memref<1x128xf32, #tpu.memory_space<vmem>>, %arg26: memref<384x128xbf16, #tpu.memory_space<vmem>>, %arg27: memref<384x128xbf16, #tpu.memory_space<vmem>>, %arg28: memref<1x16xf32, #tpu.memory_space<vmem>>, %arg29: memref<384x16xbf16, #tpu.memory_space<vmem>>, %arg30: memref<1x128xf32, #tpu.memory_space<vmem>>, %arg31: memref<1x128xf32, #tpu.memory_space<vmem>>, %arg32: memref<1x128xf32, #tpu.memory_space<vmem>>, %arg33: memref<48x128xbf16, #tpu.memory_space<vmem>>, %arg34: memref<16x128xf32, #tpu.memory_space<vmem>>, %arg35: memref<1x128xf32, #tpu.memory_space<vmem>>, %arg36: memref<1x128xf32, #tpu.memory_space<vmem>>, %arg37: memref<1x128xf32, #tpu.memory_space<vmem>>, %arg38: memref<1x128xf32, #tpu.memory_space<vmem>>, %arg39: memref<1x128xf32, #tpu.memory_space<vmem>>, %arg40: memref<384x128xbf16, #tpu.memory_space<vmem>>, %arg41: memref<384x128xbf16, #tpu.memory_space<vmem>>, %arg42: memref<32x16xf32, #tpu.memory_space<vmem>>, %arg43: memref<32x16xf32, #tpu.memory_space<vmem>>) attributes {dimension_semantics = [#tpu.dimension_semantics<arbitrary>], iteration_bounds = array<i64: 1>, scalar_prefetch = 0 : i64, scratch_operands = 0 : i64, tpu.core_type = #tpu.core_type<tc>, window_params = [{pipeline_mode = #tpu.pipeline_mode<synchronous>, transform_indices = @transform_0, window_bounds = array<i64: 128, 128>}, {pipeline_mode = #tpu.pipeline_mode<synchronous>, transform_indices = @transform_1, window_bounds = array<i64: 128, 128>}, {pipeline_mode = #tpu.pipeline_mode<synchronous>, transform_indices = @transform_2, window_bounds = array<i64: 64, 32>}, {pipeline_mode = #tpu.pipeline_mode<synchronous>, transform_indices = @transform_3, window_bounds = array<i64: 32, 16>}, {pipeline_mode = #tpu.pipeline_mode<synchronous>, transform_indices = @transform_4, window_bounds = array<i64: 32, 128>}, {pipeline_mode = #tpu.pipeline_mode<synchronous>, transform_indices = @transform_5, window_bounds = array<i64: 1, 128>}, {pipeline_mode = #tpu.pipeline_mode<synchronous>, transform_indices = @transform_6, window_bounds = array<i64: 1, 128>}, {pipeline_mode = #tpu.pipeline_mode<synchronous>, transform_indices = @transform_7, window_bounds = array<i64: 1, 128>}, {pipeline_mode = #tpu.pipeline_mode<synchronous>, transform_indices = @transform_8, window_bounds = array<i64: 1, 128>}, {pipeline_mode = #tpu.pipeline_mode<synchronous>, transform_indices = @transform_9, window_bounds = array<i64: 1, 128>}, {pipeline_mode = #tpu.pipeline_mode<synchronous>, transform_indices = @transform_10, window_bounds = array<i64: 384, 128>}, {pipeline_mode = #tpu.pipeline_mode<synchronous>, transform_indices = @transform_11, window_bounds = array<i64: 384, 128>}, {pipeline_mode = #tpu.pipeline_mode<synchronous>, transform_indices = @transform_12, window_bounds = array<i64: 32, 16>}, {pipeline_mode = #tpu.pipeline_mode<synchronous>, transform_indices = @transform_13, window_bounds = array<i64: 128, 256>}, {pipeline_mode = #tpu.pipeline_mode<synchronous>, transform_indices = @transform_14, window_bounds = array<i64: 1, 128>}, {pipeline_mode = #tpu.pipeline_mode<synchronous>, transform_indices = @transform_15, window_bounds = array<i64: 768, 128>}, {pipeline_mode = #tpu.pipeline_mode<synchronous>, transform_indices = @transform_16, window_bounds = array<i64: 48, 32>}, {pipeline_mode = #tpu.pipeline_mode<synchronous>, transform_indices = @transform_17, window_bounds = array<i64: 1, 128>}, {pipeline_mode = #tpu.pipeline_mode<synchronous>, transform_indices = @transform_18, window_bounds = array<i64: 384, 128>}, {pipeline_mode = #tpu.pipeline_mode<synchronous>, transform_indices = @transform_19, window_bounds = array<i64: 32, 128>}, {pipeline_mode = #tpu.pipeline_mode<synchronous>, transform_indices = @transform_20, window_bounds = array<i64: 1, 128>}, {pipeline_mode = #tpu.pipeline_mode<synchronous>, transform_indices = @transform_21, window_bounds = array<i64: 1, 128>}, {pipeline_mode = #tpu.pipeline_mode<synchronous>, transform_indices = @transform_22, window_bounds = array<i64: 1, 128>}, {pipeline_mode = #tpu.pipeline_mode<synchronous>, transform_indices = @transform_23, window_bounds = array<i64: 1, 128>}, {pipeline_mode = #tpu.pipeline_mode<synchronous>, transform_indices = @transform_24, window_bounds = array<i64: 1, 128>}, {pipeline_mode = #tpu.pipeline_mode<synchronous>, transform_indices = @transform_25, window_bounds = array<i64: 384, 128>}, {pipeline_mode = #tpu.pipeline_mode<synchronous>, transform_indices = @transform_26, window_bounds = array<i64: 384, 128>}, {pipeline_mode = #tpu.pipeline_mode<synchronous>, transform_indices = @transform_27, window_bounds = array<i64: 1, 16>}, {pipeline_mode = #tpu.pipeline_mode<synchronous>, transform_indices = @transform_28, window_bounds = array<i64: 384, 16>}, {pipeline_mode = #tpu.pipeline_mode<synchronous>, transform_indices = @transform_29, window_bounds = array<i64: 1, 128>}, {pipeline_mode = #tpu.pipeline_mode<synchronous>, transform_indices = @transform_30, window_bounds = array<i64: 1, 128>}, {pipeline_mode = #tpu.pipeline_mode<synchronous>, transform_indices = @transform_31, window_bounds = array<i64: 1, 128>}, {pipeline_mode = #tpu.pipeline_mode<synchronous>, transform_indices = @transform_32, window_bounds = array<i64: 48, 128>}, {pipeline_mode = #tpu.pipeline_mode<synchronous>, transform_indices = @transform_33, window_bounds = array<i64: 16, 128>}, {pipeline_mode = #tpu.pipeline_mode<synchronous>, transform_indices = @transform_34, window_bounds = array<i64: 1, 128>}, {pipeline_mode = #tpu.pipeline_mode<synchronous>, transform_indices = @transform_35, window_bounds = array<i64: 1, 128>}, {pipeline_mode = #tpu.pipeline_mode<synchronous>, transform_indices = @transform_36, window_bounds = array<i64: 1, 128>}, {pipeline_mode = #tpu.pipeline_mode<synchronous>, transform_indices = @transform_37, window_bounds = array<i64: 1, 128>}, {pipeline_mode = #tpu.pipeline_mode<synchronous>, transform_indices = @transform_38, window_bounds = array<i64: 1, 128>}, {pipeline_mode = #tpu.pipeline_mode<synchronous>, transform_indices = @transform_39, window_bounds = array<i64: 384, 128>}, {pipeline_mode = #tpu.pipeline_mode<synchronous>, transform_indices = @transform_40, window_bounds = array<i64: 384, 128>}, {pipeline_mode = #tpu.pipeline_mode<synchronous>, transform_indices = @transform_41, window_bounds = array<i64: 32, 16>}, {pipeline_mode = #tpu.pipeline_mode<synchronous>, transform_indices = @transform_42, window_bounds = array<i64: 32, 16>}]} {
    %c0 = arith.constant 0 : index
    %c0_0 = arith.constant 0 : index
    %0 = vector.load %arg1[%c0, %c0_0] : memref<128x128xf32, #tpu.memory_space<vmem>>, vector<128x128xf32>
    %c0_1 = arith.constant 0 : index
    %c0_2 = arith.constant 0 : index
    %1 = vector.load %arg2[%c0_1, %c0_2] : memref<128x128xf32, #tpu.memory_space<vmem>>, vector<128x128xf32>
    %c0_3 = arith.constant 0 : index
    %c0_4 = arith.constant 0 : index
    %2 = vector.load %arg3[%c0_3, %c0_4] : memref<64x32xbf16, #tpu.memory_space<vmem>>, vector<64x32xbf16>
    %c0_5 = arith.constant 0 : index
    %c0_6 = arith.constant 0 : index
    %3 = vector.load %arg4[%c0_5, %c0_6] : memref<32x16xbf16, #tpu.memory_space<vmem>>, vector<32x16xbf16>
    %c0_7 = arith.constant 0 : index
    %c0_8 = arith.constant 0 : index
    %4 = vector.load %arg42[%c0_7, %c0_8] : memref<32x16xf32, #tpu.memory_space<vmem>>, vector<32x16xf32>
    %c0_9 = arith.constant 0 : index
    %c0_10 = arith.constant 0 : index
    %5 = vector.load %arg33[%c0_9, %c0_10] : memref<48x128xbf16, #tpu.memory_space<vmem>>, vector<48x128xbf16>
    %c0_11 = arith.constant 0 : index
    %c0_12 = arith.constant 0 : index
    %6 = vector.load %arg30[%c0_11, %c0_12] : memref<1x128xf32, #tpu.memory_space<vmem>>, vector<1x128xf32>
    %7 = arith.truncf %4 : vector<32x16xf32> to vector<32x16xbf16>
    %cst = arith.constant dense<0.000000e+00> : vector<64x16xf32>
    %8 = tpu.matmul %2, %7, %cst {dimension_numbers = #tpu.dot_dimension_numbers<[1], [0], [0], [1], [0, 0, 1, 1], [], []>} : vector<64x32xbf16>, vector<32x16xbf16>, vector<64x16xf32> -> vector<64x16xf32>
    %9 = arith.truncf %8 : vector<64x16xf32> to vector<64x16xbf16>
    %10 = vector.extract_strided_slice %9 {offsets = [0, 0], sizes = [32, 16], strides = [1, 1]} : vector<64x16xbf16> to vector<32x16xbf16>
    %11 = vector.extract_strided_slice %9 {offsets = [32, 0], sizes = [32, 16], strides = [1, 1]} : vector<64x16xbf16> to vector<32x16xbf16>
    %12 = vector.extract_strided_slice %5 {offsets = [0, 0], sizes = [16, 128], strides = [1, 1]} : vector<48x128xbf16> to vector<16x128xbf16>
    %cst_13 = arith.constant dense<0.000000e+00> : vector<32x128xf32>
    %13 = tpu.matmul %10, %12, %cst_13 {dimension_numbers = #tpu.dot_dimension_numbers<[1], [0], [0], [1], [0, 0, 1, 1], [], []>} : vector<32x16xbf16>, vector<16x128xbf16>, vector<32x128xf32> -> vector<32x128xf32>
    %14 = vector.extract_strided_slice %5 {offsets = [16, 0], sizes = [16, 128], strides = [1, 1]} : vector<48x128xbf16> to vector<16x128xbf16>
    %cst_14 = arith.constant dense<0.000000e+00> : vector<32x128xf32>
    %15 = tpu.matmul %7, %14, %cst_14 {dimension_numbers = #tpu.dot_dimension_numbers<[1], [0], [0], [1], [0, 0, 1, 1], [], []>} : vector<32x16xbf16>, vector<16x128xbf16>, vector<32x128xf32> -> vector<32x128xf32>
    %16 = arith.addf %13, %15 : vector<32x128xf32>
    %17 = vector.extract_strided_slice %5 {offsets = [32, 0], sizes = [16, 128], strides = [1, 1]} : vector<48x128xbf16> to vector<16x128xbf16>
    %cst_15 = arith.constant dense<0.000000e+00> : vector<32x128xf32>
    %18 = tpu.matmul %11, %17, %cst_15 {dimension_numbers = #tpu.dot_dimension_numbers<[1], [0], [0], [1], [0, 0, 1, 1], [], []>} : vector<32x16xbf16>, vector<16x128xbf16>, vector<32x128xf32> -> vector<32x128xf32>
    %19 = arith.addf %16, %18 : vector<32x128xf32>
    %20 = vector.broadcast %6 : vector<1x128xf32> to vector<32x128xf32>
    %21 = arith.addf %19, %20 : vector<32x128xf32>
    %c0_16 = arith.constant 0 : index
    %c0_17 = arith.constant 0 : index
    %22 = vector.load %arg32[%c0_16, %c0_17] : memref<1x128xf32, #tpu.memory_space<vmem>>, vector<1x128xf32>
    %c0_18 = arith.constant 0 : index
    %c0_19 = arith.constant 0 : index
    %23 = vector.load %arg31[%c0_18, %c0_19] : memref<1x128xf32, #tpu.memory_space<vmem>>, vector<1x128xf32>
    %cst_20 = arith.constant dense<0.000000e+00> : vector<128xf32>
    %24 = vector.multi_reduction <add>, %21, %cst_20 [0] : vector<32x128xf32> to vector<128xf32>
    %25 = vector.shape_cast %24 : vector<128xf32> to vector<1x128xf32>
    %26 = arith.mulf %21, %21 : vector<32x128xf32>
    %cst_21 = arith.constant dense<0.000000e+00> : vector<128xf32>
    %27 = vector.multi_reduction <add>, %26, %cst_21 [0] : vector<32x128xf32> to vector<128xf32>
    %28 = vector.shape_cast %27 : vector<128xf32> to vector<1x128xf32>
    %cst_22 = arith.constant dense<0.000000e+00> : vector<1x128xf32>
    %29 = tpu.matmul %25, %0, %cst_22 {dimension_numbers = #tpu.dot_dimension_numbers<[1], [0], [0], [1], [0, 0, 1, 1], [], []>} : vector<1x128xf32>, vector<128x128xf32>, vector<1x128xf32> -> vector<1x128xf32>
    %cst_23 = arith.constant dense<0.000000e+00> : vector<1x128xf32>
    %30 = tpu.matmul %28, %0, %cst_23 {dimension_numbers = #tpu.dot_dimension_numbers<[1], [0], [0], [1], [0, 0, 1, 1], [], []>} : vector<1x128xf32>, vector<128x128xf32>, vector<1x128xf32> -> vector<1x128xf32>
    %31 = arith.mulf %29, %29 : vector<1x128xf32>
    %32 = arith.subf %30, %31 : vector<1x128xf32>
    %cst_24 = arith.constant 0.000000e+00 : f32
    %33 = vector.broadcast %cst_24 : f32 to vector<1x128xf32>
    %34 = arith.maximumf %32, %33 : vector<1x128xf32>
    %cst_25 = arith.constant 9.99999974E-6 : f32
    %35 = vector.broadcast %cst_25 : f32 to vector<1x128xf32>
    %36 = arith.addf %34, %35 : vector<1x128xf32>
    %37 = math.rsqrt %36 : vector<1x128xf32>
    %38 = arith.mulf %22, %37 : vector<1x128xf32>
    %39 = vector.broadcast %38 : vector<1x128xf32> to vector<32x128xf32>
    %40 = arith.mulf %21, %39 : vector<32x128xf32>
    %41 = arith.mulf %29, %38 : vector<1x128xf32>
    %42 = arith.subf %23, %41 : vector<1x128xf32>
    %43 = vector.broadcast %42 : vector<1x128xf32> to vector<32x128xf32>
    %44 = arith.addf %40, %43 : vector<32x128xf32>
    %45 = arith.negf %44 : vector<32x128xf32>
    %46 = math.exp %45 : vector<32x128xf32>
    %cst_26 = arith.constant 1.000000e+00 : f32
    %47 = vector.broadcast %cst_26 : f32 to vector<32x128xf32>
    %48 = arith.addf %47, %46 : vector<32x128xf32>
    %49 = arith.divf %47, %48 : vector<32x128xf32>
    %50 = arith.mulf %44, %49 : vector<32x128xf32>
    %51 = arith.negf %50 : vector<32x128xf32>
    %52 = math.exp %51 : vector<32x128xf32>
    %cst_27 = arith.constant 1.000000e+00 : f32
    %53 = vector.broadcast %cst_27 : f32 to vector<32x128xf32>
    %54 = arith.addf %53, %52 : vector<32x128xf32>
    %55 = arith.divf %53, %54 : vector<32x128xf32>
    %56 = arith.mulf %50, %55 : vector<32x128xf32>
    %c0_28 = arith.constant 0 : index
    %c0_29 = arith.constant 0 : index
    %57 = vector.load %arg24[%c0_28, %c0_29] : memref<1x128xf32, #tpu.memory_space<vmem>>, vector<1x128xf32>
    %c0_30 = arith.constant 0 : index
    %c0_31 = arith.constant 0 : index
    %58 = vector.load %arg22[%c0_30, %c0_31] : memref<1x128xf32, #tpu.memory_space<vmem>>, vector<1x128xf32>
    %cst_32 = arith.constant dense<0.000000e+00> : vector<128xf32>
    %59 = vector.multi_reduction <add>, %56, %cst_32 [0] : vector<32x128xf32> to vector<128xf32>
    %60 = vector.shape_cast %59 : vector<128xf32> to vector<1x128xf32>
    %61 = arith.mulf %56, %56 : vector<32x128xf32>
    %cst_33 = arith.constant dense<0.000000e+00> : vector<128xf32>
    %62 = vector.multi_reduction <add>, %61, %cst_33 [0] : vector<32x128xf32> to vector<128xf32>
    %63 = vector.shape_cast %62 : vector<128xf32> to vector<1x128xf32>
    %cst_34 = arith.constant dense<0.000000e+00> : vector<1x128xf32>
    %64 = tpu.matmul %60, %0, %cst_34 {dimension_numbers = #tpu.dot_dimension_numbers<[1], [0], [0], [1], [0, 0, 1, 1], [], []>} : vector<1x128xf32>, vector<128x128xf32>, vector<1x128xf32> -> vector<1x128xf32>
    %cst_35 = arith.constant dense<0.000000e+00> : vector<1x128xf32>
    %65 = tpu.matmul %63, %0, %cst_35 {dimension_numbers = #tpu.dot_dimension_numbers<[1], [0], [0], [1], [0, 0, 1, 1], [], []>} : vector<1x128xf32>, vector<128x128xf32>, vector<1x128xf32> -> vector<1x128xf32>
    %66 = arith.mulf %64, %64 : vector<1x128xf32>
    %67 = arith.subf %65, %66 : vector<1x128xf32>
    %cst_36 = arith.constant 0.000000e+00 : f32
    %68 = vector.broadcast %cst_36 : f32 to vector<1x128xf32>
    %69 = arith.maximumf %67, %68 : vector<1x128xf32>
    %cst_37 = arith.constant 9.99999974E-6 : f32
    %70 = vector.broadcast %cst_37 : f32 to vector<1x128xf32>
    %71 = arith.addf %69, %70 : vector<1x128xf32>
    %72 = math.rsqrt %71 : vector<1x128xf32>
    %73 = arith.mulf %57, %72 : vector<1x128xf32>
    %74 = vector.broadcast %73 : vector<1x128xf32> to vector<32x128xf32>
    %75 = arith.mulf %56, %74 : vector<32x128xf32>
    %76 = arith.mulf %64, %73 : vector<1x128xf32>
    %77 = arith.subf %58, %76 : vector<1x128xf32>
    %78 = vector.broadcast %77 : vector<1x128xf32> to vector<32x128xf32>
    %79 = arith.addf %75, %78 : vector<32x128xf32>
    %c0_38 = arith.constant 0 : index
    %c0_39 = arith.constant 0 : index
    %80 = vector.load %arg26[%c0_38, %c0_39] : memref<384x128xbf16, #tpu.memory_space<vmem>>, vector<384x128xbf16>
    %c0_40 = arith.constant 0 : index
    %c0_41 = arith.constant 0 : index
    %81 = vector.load %arg20[%c0_40, %c0_41] : memref<32x128xf32, #tpu.memory_space<vmem>>, vector<32x128xf32>
    %82 = arith.truncf %79 : vector<32x128xf32> to vector<32x128xbf16>
    %cst_42 = arith.constant dense<0.000000e+00> : vector<64x128xf32>
    %83 = tpu.matmul %2, %82, %cst_42 {dimension_numbers = #tpu.dot_dimension_numbers<[1], [0], [0], [1], [0, 0, 1, 1], [], []>} : vector<64x32xbf16>, vector<32x128xbf16>, vector<64x128xf32> -> vector<64x128xf32>
    %84 = arith.truncf %83 : vector<64x128xf32> to vector<64x128xbf16>
    %85 = vector.extract_strided_slice %84 {offsets = [0, 0], sizes = [32, 128], strides = [1, 1]} : vector<64x128xbf16> to vector<32x128xbf16>
    %86 = vector.extract_strided_slice %84 {offsets = [32, 0], sizes = [32, 128], strides = [1, 1]} : vector<64x128xbf16> to vector<32x128xbf16>
    %87 = tpu.concatenate %85, %82, %86 in 1 : vector<32x128xbf16>, vector<32x128xbf16>, vector<32x128xbf16> -> vector<32x384xbf16>
    %cst_43 = arith.constant dense<0.000000e+00> : vector<32x128xf32>
    %88 = tpu.matmul %87, %80, %cst_43 {dimension_numbers = #tpu.dot_dimension_numbers<[1], [0], [0], [1], [0, 0, 1, 1], [], []>} : vector<32x384xbf16>, vector<384x128xbf16>, vector<32x128xf32> -> vector<32x128xf32>
    %89 = arith.addf %88, %81 : vector<32x128xf32>
    %90 = arith.negf %89 : vector<32x128xf32>
    %91 = math.exp %90 : vector<32x128xf32>
    %cst_44 = arith.constant 1.000000e+00 : f32
    %92 = vector.broadcast %cst_44 : f32 to vector<32x128xf32>
    %93 = arith.addf %92, %91 : vector<32x128xf32>
    %94 = arith.divf %92, %93 : vector<32x128xf32>
    %95 = arith.mulf %89, %94 : vector<32x128xf32>
    %c0_45 = arith.constant 0 : index
    %c0_46 = arith.constant 0 : index
    %96 = vector.load %arg25[%c0_45, %c0_46] : memref<1x128xf32, #tpu.memory_space<vmem>>, vector<1x128xf32>
    %c0_47 = arith.constant 0 : index
    %c0_48 = arith.constant 0 : index
    %97 = vector.load %arg23[%c0_47, %c0_48] : memref<1x128xf32, #tpu.memory_space<vmem>>, vector<1x128xf32>
    %cst_49 = arith.constant dense<0.000000e+00> : vector<128xf32>
    %98 = vector.multi_reduction <add>, %95, %cst_49 [0] : vector<32x128xf32> to vector<128xf32>
    %99 = vector.shape_cast %98 : vector<128xf32> to vector<1x128xf32>
    %100 = arith.mulf %95, %95 : vector<32x128xf32>
    %cst_50 = arith.constant dense<0.000000e+00> : vector<128xf32>
    %101 = vector.multi_reduction <add>, %100, %cst_50 [0] : vector<32x128xf32> to vector<128xf32>
    %102 = vector.shape_cast %101 : vector<128xf32> to vector<1x128xf32>
    %cst_51 = arith.constant dense<0.000000e+00> : vector<1x128xf32>
    %103 = tpu.matmul %99, %0, %cst_51 {dimension_numbers = #tpu.dot_dimension_numbers<[1], [0], [0], [1], [0, 0, 1, 1], [], []>} : vector<1x128xf32>, vector<128x128xf32>, vector<1x128xf32> -> vector<1x128xf32>
    %cst_52 = arith.constant dense<0.000000e+00> : vector<1x128xf32>
    %104 = tpu.matmul %102, %0, %cst_52 {dimension_numbers = #tpu.dot_dimension_numbers<[1], [0], [0], [1], [0, 0, 1, 1], [], []>} : vector<1x128xf32>, vector<128x128xf32>, vector<1x128xf32> -> vector<1x128xf32>
    %105 = arith.mulf %103, %103 : vector<1x128xf32>
    %106 = arith.subf %104, %105 : vector<1x128xf32>
    %cst_53 = arith.constant 0.000000e+00 : f32
    %107 = vector.broadcast %cst_53 : f32 to vector<1x128xf32>
    %108 = arith.maximumf %106, %107 : vector<1x128xf32>
    %cst_54 = arith.constant 9.99999974E-6 : f32
    %109 = vector.broadcast %cst_54 : f32 to vector<1x128xf32>
    %110 = arith.addf %108, %109 : vector<1x128xf32>
    %111 = math.rsqrt %110 : vector<1x128xf32>
    %112 = arith.mulf %96, %111 : vector<1x128xf32>
    %113 = vector.broadcast %112 : vector<1x128xf32> to vector<32x128xf32>
    %114 = arith.mulf %95, %113 : vector<32x128xf32>
    %115 = arith.mulf %103, %112 : vector<1x128xf32>
    %116 = arith.subf %97, %115 : vector<1x128xf32>
    %117 = vector.broadcast %116 : vector<1x128xf32> to vector<32x128xf32>
    %118 = arith.addf %114, %117 : vector<32x128xf32>
    %c0_55 = arith.constant 0 : index
    %c0_56 = arith.constant 0 : index
    %119 = vector.load %arg27[%c0_55, %c0_56] : memref<384x128xbf16, #tpu.memory_space<vmem>>, vector<384x128xbf16>
    %c0_57 = arith.constant 0 : index
    %c0_58 = arith.constant 0 : index
    %120 = vector.load %arg21[%c0_57, %c0_58] : memref<1x128xf32, #tpu.memory_space<vmem>>, vector<1x128xf32>
    %121 = arith.truncf %118 : vector<32x128xf32> to vector<32x128xbf16>
    %cst_59 = arith.constant dense<0.000000e+00> : vector<64x128xf32>
    %122 = tpu.matmul %2, %121, %cst_59 {dimension_numbers = #tpu.dot_dimension_numbers<[1], [0], [0], [1], [0, 0, 1, 1], [], []>} : vector<64x32xbf16>, vector<32x128xbf16>, vector<64x128xf32> -> vector<64x128xf32>
    %123 = arith.truncf %122 : vector<64x128xf32> to vector<64x128xbf16>
    %124 = vector.extract_strided_slice %123 {offsets = [0, 0], sizes = [32, 128], strides = [1, 1]} : vector<64x128xbf16> to vector<32x128xbf16>
    %125 = vector.extract_strided_slice %123 {offsets = [32, 0], sizes = [32, 128], strides = [1, 1]} : vector<64x128xbf16> to vector<32x128xbf16>
    %126 = tpu.concatenate %124, %121, %125 in 1 : vector<32x128xbf16>, vector<32x128xbf16>, vector<32x128xbf16> -> vector<32x384xbf16>
    %cst_60 = arith.constant dense<0.000000e+00> : vector<32x128xf32>
    %127 = tpu.matmul %126, %119, %cst_60 {dimension_numbers = #tpu.dot_dimension_numbers<[1], [0], [0], [1], [0, 0, 1, 1], [], []>} : vector<32x384xbf16>, vector<384x128xbf16>, vector<32x128xf32> -> vector<32x128xf32>
    %128 = vector.broadcast %120 : vector<1x128xf32> to vector<32x128xf32>
    %129 = arith.addf %127, %128 : vector<32x128xf32>
    %130 = arith.addf %129, %50 : vector<32x128xf32>
    %131 = arith.truncf %130 : vector<32x128xf32> to vector<32x128xbf16>
    %c0_61 = arith.constant 0 : index
    %c0_62 = arith.constant 0 : index
    %132 = vector.load %arg17[%c0_61, %c0_62] : memref<48x32xbf16, #tpu.memory_space<vmem>>, vector<48x32xbf16>
    %cst_63 = arith.constant dense<0.000000e+00> : vector<48x128xf32>
    %133 = tpu.matmul %132, %131, %cst_63 {dimension_numbers = #tpu.dot_dimension_numbers<[1], [0], [0], [1], [0, 0, 1, 1], [], []>} : vector<48x32xbf16>, vector<32x128xbf16>, vector<48x128xf32> -> vector<48x128xf32>
    %134 = arith.truncf %133 : vector<48x128xf32> to vector<48x128xbf16>
    %135 = vector.extract_strided_slice %134 {offsets = [0, 0], sizes = [16, 128], strides = [1, 1]} : vector<48x128xbf16> to vector<16x128xbf16>
    %136 = vector.extract_strided_slice %134 {offsets = [16, 0], sizes = [16, 128], strides = [1, 1]} : vector<48x128xbf16> to vector<16x128xbf16>
    %137 = vector.extract_strided_slice %134 {offsets = [32, 0], sizes = [16, 128], strides = [1, 1]} : vector<48x128xbf16> to vector<16x128xbf16>
    %138 = tpu.concatenate %135, %136, %137 in 1 : vector<16x128xbf16>, vector<16x128xbf16>, vector<16x128xbf16> -> vector<16x384xbf16>
    %c0_64 = arith.constant 0 : index
    %c0_65 = arith.constant 0 : index
    %139 = vector.load %arg19[%c0_64, %c0_65] : memref<384x128xbf16, #tpu.memory_space<vmem>>, vector<384x128xbf16>
    %cst_66 = arith.constant dense<0.000000e+00> : vector<16x128xf32>
    %140 = tpu.matmul %138, %139, %cst_66 {dimension_numbers = #tpu.dot_dimension_numbers<[1], [0], [0], [1], [0, 0, 1, 1], [], []>} : vector<16x384xbf16>, vector<384x128xbf16>, vector<16x128xf32> -> vector<16x128xf32>
    %c0_67 = arith.constant 0 : index
    %c0_68 = arith.constant 0 : index
    %141 = vector.load %arg18[%c0_67, %c0_68] : memref<1x128xf32, #tpu.memory_space<vmem>>, vector<1x128xf32>
    %142 = vector.broadcast %141 : vector<1x128xf32> to vector<16x128xf32>
    %143 = arith.addf %140, %142 : vector<16x128xf32>
    %144 = arith.negf %143 : vector<16x128xf32>
    %145 = math.exp %144 : vector<16x128xf32>
    %cst_69 = arith.constant 1.000000e+00 : f32
    %146 = vector.broadcast %cst_69 : f32 to vector<16x128xf32>
    %147 = arith.addf %146, %145 : vector<16x128xf32>
    %148 = arith.divf %146, %147 : vector<16x128xf32>
    %149 = arith.mulf %143, %148 : vector<16x128xf32>
    %c0_70 = arith.constant 0 : index
    %c0_71 = arith.constant 0 : index
    %150 = vector.load %arg38[%c0_70, %c0_71] : memref<1x128xf32, #tpu.memory_space<vmem>>, vector<1x128xf32>
    %c0_72 = arith.constant 0 : index
    %c0_73 = arith.constant 0 : index
    %151 = vector.load %arg36[%c0_72, %c0_73] : memref<1x128xf32, #tpu.memory_space<vmem>>, vector<1x128xf32>
    %cst_74 = arith.constant dense<0.000000e+00> : vector<128xf32>
    %152 = vector.multi_reduction <add>, %149, %cst_74 [0] : vector<16x128xf32> to vector<128xf32>
    %153 = vector.shape_cast %152 : vector<128xf32> to vector<1x128xf32>
    %154 = arith.mulf %149, %149 : vector<16x128xf32>
    %cst_75 = arith.constant dense<0.000000e+00> : vector<128xf32>
    %155 = vector.multi_reduction <add>, %154, %cst_75 [0] : vector<16x128xf32> to vector<128xf32>
    %156 = vector.shape_cast %155 : vector<128xf32> to vector<1x128xf32>
    %cst_76 = arith.constant dense<0.000000e+00> : vector<1x128xf32>
    %157 = tpu.matmul %153, %1, %cst_76 {dimension_numbers = #tpu.dot_dimension_numbers<[1], [0], [0], [1], [0, 0, 1, 1], [], []>} : vector<1x128xf32>, vector<128x128xf32>, vector<1x128xf32> -> vector<1x128xf32>
    %cst_77 = arith.constant dense<0.000000e+00> : vector<1x128xf32>
    %158 = tpu.matmul %156, %1, %cst_77 {dimension_numbers = #tpu.dot_dimension_numbers<[1], [0], [0], [1], [0, 0, 1, 1], [], []>} : vector<1x128xf32>, vector<128x128xf32>, vector<1x128xf32> -> vector<1x128xf32>
    %159 = arith.mulf %157, %157 : vector<1x128xf32>
    %160 = arith.subf %158, %159 : vector<1x128xf32>
    %cst_78 = arith.constant 0.000000e+00 : f32
    %161 = vector.broadcast %cst_78 : f32 to vector<1x128xf32>
    %162 = arith.maximumf %160, %161 : vector<1x128xf32>
    %cst_79 = arith.constant 9.99999974E-6 : f32
    %163 = vector.broadcast %cst_79 : f32 to vector<1x128xf32>
    %164 = arith.addf %162, %163 : vector<1x128xf32>
    %165 = math.rsqrt %164 : vector<1x128xf32>
    %166 = arith.mulf %150, %165 : vector<1x128xf32>
    %167 = vector.broadcast %166 : vector<1x128xf32> to vector<16x128xf32>
    %168 = arith.mulf %149, %167 : vector<16x128xf32>
    %169 = arith.mulf %157, %166 : vector<1x128xf32>
    %170 = arith.subf %151, %169 : vector<1x128xf32>
    %171 = vector.broadcast %170 : vector<1x128xf32> to vector<16x128xf32>
    %172 = arith.addf %168, %171 : vector<16x128xf32>
    %c0_80 = arith.constant 0 : index
    %c0_81 = arith.constant 0 : index
    %173 = vector.load %arg40[%c0_80, %c0_81] : memref<384x128xbf16, #tpu.memory_space<vmem>>, vector<384x128xbf16>
    %c0_82 = arith.constant 0 : index
    %c0_83 = arith.constant 0 : index
    %174 = vector.load %arg34[%c0_82, %c0_83] : memref<16x128xf32, #tpu.memory_space<vmem>>, vector<16x128xf32>
    %175 = arith.truncf %172 : vector<16x128xf32> to vector<16x128xbf16>
    %cst_84 = arith.constant dense<0.000000e+00> : vector<32x128xf32>
    %176 = tpu.matmul %3, %175, %cst_84 {dimension_numbers = #tpu.dot_dimension_numbers<[1], [0], [0], [1], [0, 0, 1, 1], [], []>} : vector<32x16xbf16>, vector<16x128xbf16>, vector<32x128xf32> -> vector<32x128xf32>
    %177 = arith.truncf %176 : vector<32x128xf32> to vector<32x128xbf16>
    %178 = vector.extract_strided_slice %177 {offsets = [0, 0], sizes = [16, 128], strides = [1, 1]} : vector<32x128xbf16> to vector<16x128xbf16>
    %179 = vector.extract_strided_slice %177 {offsets = [16, 0], sizes = [16, 128], strides = [1, 1]} : vector<32x128xbf16> to vector<16x128xbf16>
    %180 = tpu.concatenate %178, %175, %179 in 1 : vector<16x128xbf16>, vector<16x128xbf16>, vector<16x128xbf16> -> vector<16x384xbf16>
    %cst_85 = arith.constant dense<0.000000e+00> : vector<16x128xf32>
    %181 = tpu.matmul %180, %173, %cst_85 {dimension_numbers = #tpu.dot_dimension_numbers<[1], [0], [0], [1], [0, 0, 1, 1], [], []>} : vector<16x384xbf16>, vector<384x128xbf16>, vector<16x128xf32> -> vector<16x128xf32>
    %182 = arith.addf %181, %174 : vector<16x128xf32>
    %183 = arith.negf %182 : vector<16x128xf32>
    %184 = math.exp %183 : vector<16x128xf32>
    %cst_86 = arith.constant 1.000000e+00 : f32
    %185 = vector.broadcast %cst_86 : f32 to vector<16x128xf32>
    %186 = arith.addf %185, %184 : vector<16x128xf32>
    %187 = arith.divf %185, %186 : vector<16x128xf32>
    %188 = arith.mulf %182, %187 : vector<16x128xf32>
    %c0_87 = arith.constant 0 : index
    %c0_88 = arith.constant 0 : index
    %189 = vector.load %arg39[%c0_87, %c0_88] : memref<1x128xf32, #tpu.memory_space<vmem>>, vector<1x128xf32>
    %c0_89 = arith.constant 0 : index
    %c0_90 = arith.constant 0 : index
    %190 = vector.load %arg37[%c0_89, %c0_90] : memref<1x128xf32, #tpu.memory_space<vmem>>, vector<1x128xf32>
    %cst_91 = arith.constant dense<0.000000e+00> : vector<128xf32>
    %191 = vector.multi_reduction <add>, %188, %cst_91 [0] : vector<16x128xf32> to vector<128xf32>
    %192 = vector.shape_cast %191 : vector<128xf32> to vector<1x128xf32>
    %193 = arith.mulf %188, %188 : vector<16x128xf32>
    %cst_92 = arith.constant dense<0.000000e+00> : vector<128xf32>
    %194 = vector.multi_reduction <add>, %193, %cst_92 [0] : vector<16x128xf32> to vector<128xf32>
    %195 = vector.shape_cast %194 : vector<128xf32> to vector<1x128xf32>
    %cst_93 = arith.constant dense<0.000000e+00> : vector<1x128xf32>
    %196 = tpu.matmul %192, %1, %cst_93 {dimension_numbers = #tpu.dot_dimension_numbers<[1], [0], [0], [1], [0, 0, 1, 1], [], []>} : vector<1x128xf32>, vector<128x128xf32>, vector<1x128xf32> -> vector<1x128xf32>
    %cst_94 = arith.constant dense<0.000000e+00> : vector<1x128xf32>
    %197 = tpu.matmul %195, %1, %cst_94 {dimension_numbers = #tpu.dot_dimension_numbers<[1], [0], [0], [1], [0, 0, 1, 1], [], []>} : vector<1x128xf32>, vector<128x128xf32>, vector<1x128xf32> -> vector<1x128xf32>
    %198 = arith.mulf %196, %196 : vector<1x128xf32>
    %199 = arith.subf %197, %198 : vector<1x128xf32>
    %cst_95 = arith.constant 0.000000e+00 : f32
    %200 = vector.broadcast %cst_95 : f32 to vector<1x128xf32>
    %201 = arith.maximumf %199, %200 : vector<1x128xf32>
    %cst_96 = arith.constant 9.99999974E-6 : f32
    %202 = vector.broadcast %cst_96 : f32 to vector<1x128xf32>
    %203 = arith.addf %201, %202 : vector<1x128xf32>
    %204 = math.rsqrt %203 : vector<1x128xf32>
    %205 = arith.mulf %189, %204 : vector<1x128xf32>
    %206 = vector.broadcast %205 : vector<1x128xf32> to vector<16x128xf32>
    %207 = arith.mulf %188, %206 : vector<16x128xf32>
    %208 = arith.mulf %196, %205 : vector<1x128xf32>
    %209 = arith.subf %190, %208 : vector<1x128xf32>
    %210 = vector.broadcast %209 : vector<1x128xf32> to vector<16x128xf32>
    %211 = arith.addf %207, %210 : vector<16x128xf32>
    %c0_97 = arith.constant 0 : index
    %c0_98 = arith.constant 0 : index
    %212 = vector.load %arg41[%c0_97, %c0_98] : memref<384x128xbf16, #tpu.memory_space<vmem>>, vector<384x128xbf16>
    %c0_99 = arith.constant 0 : index
    %c0_100 = arith.constant 0 : index
    %213 = vector.load %arg35[%c0_99, %c0_100] : memref<1x128xf32, #tpu.memory_space<vmem>>, vector<1x128xf32>
    %214 = arith.truncf %211 : vector<16x128xf32> to vector<16x128xbf16>
    %cst_101 = arith.constant dense<0.000000e+00> : vector<32x128xf32>
    %215 = tpu.matmul %3, %214, %cst_101 {dimension_numbers = #tpu.dot_dimension_numbers<[1], [0], [0], [1], [0, 0, 1, 1], [], []>} : vector<32x16xbf16>, vector<16x128xbf16>, vector<32x128xf32> -> vector<32x128xf32>
    %216 = arith.truncf %215 : vector<32x128xf32> to vector<32x128xbf16>
    %217 = vector.extract_strided_slice %216 {offsets = [0, 0], sizes = [16, 128], strides = [1, 1]} : vector<32x128xbf16> to vector<16x128xbf16>
    %218 = vector.extract_strided_slice %216 {offsets = [16, 0], sizes = [16, 128], strides = [1, 1]} : vector<32x128xbf16> to vector<16x128xbf16>
    %219 = tpu.concatenate %217, %214, %218 in 1 : vector<16x128xbf16>, vector<16x128xbf16>, vector<16x128xbf16> -> vector<16x384xbf16>
    %cst_102 = arith.constant dense<0.000000e+00> : vector<16x128xf32>
    %220 = tpu.matmul %219, %212, %cst_102 {dimension_numbers = #tpu.dot_dimension_numbers<[1], [0], [0], [1], [0, 0, 1, 1], [], []>} : vector<16x384xbf16>, vector<384x128xbf16>, vector<16x128xf32> -> vector<16x128xf32>
    %221 = vector.broadcast %213 : vector<1x128xf32> to vector<16x128xf32>
    %222 = arith.addf %220, %221 : vector<16x128xf32>
    %223 = arith.addf %222, %143 : vector<16x128xf32>
    %224 = arith.addf %223, %143 : vector<16x128xf32>
    %225 = arith.truncf %224 : vector<16x128xf32> to vector<16x128xbf16>
    %c0_103 = arith.constant 0 : index
    %c0_104 = arith.constant 0 : index
    %226 = vector.load %arg14[%c0_103, %c0_104] : memref<128x256xbf16, #tpu.memory_space<vmem>>, vector<128x256xbf16>
    %cst_105 = arith.constant dense<0.000000e+00> : vector<16x256xf32>
    %227 = tpu.matmul %225, %226, %cst_105 {dimension_numbers = #tpu.dot_dimension_numbers<[1], [0], [0], [1], [0, 0, 1, 1], [], []>} : vector<16x128xbf16>, vector<128x256xbf16>, vector<16x256xf32> -> vector<16x256xf32>
    %228 = arith.truncf %227 : vector<16x256xf32> to vector<16x256xbf16>
    %c0_106 = arith.constant 0 : index
    %c0_107 = arith.constant 0 : index
    %229 = vector.load %arg13[%c0_106, %c0_107] : memref<32x16xbf16, #tpu.memory_space<vmem>>, vector<32x16xbf16>
    %cst_108 = arith.constant dense<0.000000e+00> : vector<32x256xf32>
    %230 = tpu.matmul %229, %228, %cst_108 {dimension_numbers = #tpu.dot_dimension_numbers<[1], [0], [0], [1], [0, 0, 1, 1], [], []>} : vector<32x16xbf16>, vector<16x256xbf16>, vector<32x256xf32> -> vector<32x256xf32>
    %c0_109 = arith.constant 0 : index
    %c0_110 = arith.constant 0 : index
    %231 = vector.load %arg16[%c0_109, %c0_110] : memref<768x128xbf16, #tpu.memory_space<vmem>>, vector<768x128xbf16>
    %c0_111 = arith.constant 0 : index
    %c0_112 = arith.constant 0 : index
    %232 = vector.load %arg15[%c0_111, %c0_112] : memref<1x128xf32, #tpu.memory_space<vmem>>, vector<1x128xf32>
    %233 = arith.truncf %230 : vector<32x256xf32> to vector<32x256xbf16>
    %cst_113 = arith.constant dense<0.000000e+00> : vector<64x256xf32>
    %234 = tpu.matmul %2, %233, %cst_113 {dimension_numbers = #tpu.dot_dimension_numbers<[1], [0], [0], [1], [0, 0, 1, 1], [], []>} : vector<64x32xbf16>, vector<32x256xbf16>, vector<64x256xf32> -> vector<64x256xf32>
    %235 = arith.truncf %234 : vector<64x256xf32> to vector<64x256xbf16>
    %236 = vector.extract_strided_slice %235 {offsets = [0, 0], sizes = [32, 256], strides = [1, 1]} : vector<64x256xbf16> to vector<32x256xbf16>
    %237 = vector.extract_strided_slice %235 {offsets = [32, 0], sizes = [32, 256], strides = [1, 1]} : vector<64x256xbf16> to vector<32x256xbf16>
    %238 = tpu.concatenate %236, %233, %237 in 1 : vector<32x256xbf16>, vector<32x256xbf16>, vector<32x256xbf16> -> vector<32x768xbf16>
    %cst_114 = arith.constant dense<0.000000e+00> : vector<32x128xf32>
    %239 = tpu.matmul %238, %231, %cst_114 {dimension_numbers = #tpu.dot_dimension_numbers<[1], [0], [0], [1], [0, 0, 1, 1], [], []>} : vector<32x768xbf16>, vector<768x128xbf16>, vector<32x128xf32> -> vector<32x128xf32>
    %240 = vector.broadcast %232 : vector<1x128xf32> to vector<32x128xf32>
    %241 = arith.addf %239, %240 : vector<32x128xf32>
    %242 = arith.negf %241 : vector<32x128xf32>
    %243 = math.exp %242 : vector<32x128xf32>
    %cst_115 = arith.constant 1.000000e+00 : f32
    %244 = vector.broadcast %cst_115 : f32 to vector<32x128xf32>
    %245 = arith.addf %244, %243 : vector<32x128xf32>
    %246 = arith.divf %244, %245 : vector<32x128xf32>
    %247 = arith.mulf %241, %246 : vector<32x128xf32>
    %c0_116 = arith.constant 0 : index
    %c0_117 = arith.constant 0 : index
    %248 = vector.load %arg9[%c0_116, %c0_117] : memref<1x128xf32, #tpu.memory_space<vmem>>, vector<1x128xf32>
    %c0_118 = arith.constant 0 : index
    %c0_119 = arith.constant 0 : index
    %249 = vector.load %arg7[%c0_118, %c0_119] : memref<1x128xf32, #tpu.memory_space<vmem>>, vector<1x128xf32>
    %cst_120 = arith.constant dense<0.000000e+00> : vector<128xf32>
    %250 = vector.multi_reduction <add>, %247, %cst_120 [0] : vector<32x128xf32> to vector<128xf32>
    %251 = vector.shape_cast %250 : vector<128xf32> to vector<1x128xf32>
    %252 = arith.mulf %247, %247 : vector<32x128xf32>
    %cst_121 = arith.constant dense<0.000000e+00> : vector<128xf32>
    %253 = vector.multi_reduction <add>, %252, %cst_121 [0] : vector<32x128xf32> to vector<128xf32>
    %254 = vector.shape_cast %253 : vector<128xf32> to vector<1x128xf32>
    %cst_122 = arith.constant dense<0.000000e+00> : vector<1x128xf32>
    %255 = tpu.matmul %251, %0, %cst_122 {dimension_numbers = #tpu.dot_dimension_numbers<[1], [0], [0], [1], [0, 0, 1, 1], [], []>} : vector<1x128xf32>, vector<128x128xf32>, vector<1x128xf32> -> vector<1x128xf32>
    %cst_123 = arith.constant dense<0.000000e+00> : vector<1x128xf32>
    %256 = tpu.matmul %254, %0, %cst_123 {dimension_numbers = #tpu.dot_dimension_numbers<[1], [0], [0], [1], [0, 0, 1, 1], [], []>} : vector<1x128xf32>, vector<128x128xf32>, vector<1x128xf32> -> vector<1x128xf32>
    %257 = arith.mulf %255, %255 : vector<1x128xf32>
    %258 = arith.subf %256, %257 : vector<1x128xf32>
    %cst_124 = arith.constant 0.000000e+00 : f32
    %259 = vector.broadcast %cst_124 : f32 to vector<1x128xf32>
    %260 = arith.maximumf %258, %259 : vector<1x128xf32>
    %cst_125 = arith.constant 9.99999974E-6 : f32
    %261 = vector.broadcast %cst_125 : f32 to vector<1x128xf32>
    %262 = arith.addf %260, %261 : vector<1x128xf32>
    %263 = math.rsqrt %262 : vector<1x128xf32>
    %264 = arith.mulf %248, %263 : vector<1x128xf32>
    %265 = vector.broadcast %264 : vector<1x128xf32> to vector<32x128xf32>
    %266 = arith.mulf %247, %265 : vector<32x128xf32>
    %267 = arith.mulf %255, %264 : vector<1x128xf32>
    %268 = arith.subf %249, %267 : vector<1x128xf32>
    %269 = vector.broadcast %268 : vector<1x128xf32> to vector<32x128xf32>
    %270 = arith.addf %266, %269 : vector<32x128xf32>
    %c0_126 = arith.constant 0 : index
    %c0_127 = arith.constant 0 : index
    %271 = vector.load %arg11[%c0_126, %c0_127] : memref<384x128xbf16, #tpu.memory_space<vmem>>, vector<384x128xbf16>
    %c0_128 = arith.constant 0 : index
    %c0_129 = arith.constant 0 : index
    %272 = vector.load %arg5[%c0_128, %c0_129] : memref<32x128xf32, #tpu.memory_space<vmem>>, vector<32x128xf32>
    %273 = arith.truncf %270 : vector<32x128xf32> to vector<32x128xbf16>
    %cst_130 = arith.constant dense<0.000000e+00> : vector<64x128xf32>
    %274 = tpu.matmul %2, %273, %cst_130 {dimension_numbers = #tpu.dot_dimension_numbers<[1], [0], [0], [1], [0, 0, 1, 1], [], []>} : vector<64x32xbf16>, vector<32x128xbf16>, vector<64x128xf32> -> vector<64x128xf32>
    %275 = arith.truncf %274 : vector<64x128xf32> to vector<64x128xbf16>
    %276 = vector.extract_strided_slice %275 {offsets = [0, 0], sizes = [32, 128], strides = [1, 1]} : vector<64x128xbf16> to vector<32x128xbf16>
    %277 = vector.extract_strided_slice %275 {offsets = [32, 0], sizes = [32, 128], strides = [1, 1]} : vector<64x128xbf16> to vector<32x128xbf16>
    %278 = tpu.concatenate %276, %273, %277 in 1 : vector<32x128xbf16>, vector<32x128xbf16>, vector<32x128xbf16> -> vector<32x384xbf16>
    %cst_131 = arith.constant dense<0.000000e+00> : vector<32x128xf32>
    %279 = tpu.matmul %278, %271, %cst_131 {dimension_numbers = #tpu.dot_dimension_numbers<[1], [0], [0], [1], [0, 0, 1, 1], [], []>} : vector<32x384xbf16>, vector<384x128xbf16>, vector<32x128xf32> -> vector<32x128xf32>
    %280 = arith.addf %279, %272 : vector<32x128xf32>
    %281 = arith.negf %280 : vector<32x128xf32>
    %282 = math.exp %281 : vector<32x128xf32>
    %cst_132 = arith.constant 1.000000e+00 : f32
    %283 = vector.broadcast %cst_132 : f32 to vector<32x128xf32>
    %284 = arith.addf %283, %282 : vector<32x128xf32>
    %285 = arith.divf %283, %284 : vector<32x128xf32>
    %286 = arith.mulf %280, %285 : vector<32x128xf32>
    %c0_133 = arith.constant 0 : index
    %c0_134 = arith.constant 0 : index
    %287 = vector.load %arg10[%c0_133, %c0_134] : memref<1x128xf32, #tpu.memory_space<vmem>>, vector<1x128xf32>
    %c0_135 = arith.constant 0 : index
    %c0_136 = arith.constant 0 : index
    %288 = vector.load %arg8[%c0_135, %c0_136] : memref<1x128xf32, #tpu.memory_space<vmem>>, vector<1x128xf32>
    %cst_137 = arith.constant dense<0.000000e+00> : vector<128xf32>
    %289 = vector.multi_reduction <add>, %286, %cst_137 [0] : vector<32x128xf32> to vector<128xf32>
    %290 = vector.shape_cast %289 : vector<128xf32> to vector<1x128xf32>
    %291 = arith.mulf %286, %286 : vector<32x128xf32>
    %cst_138 = arith.constant dense<0.000000e+00> : vector<128xf32>
    %292 = vector.multi_reduction <add>, %291, %cst_138 [0] : vector<32x128xf32> to vector<128xf32>
    %293 = vector.shape_cast %292 : vector<128xf32> to vector<1x128xf32>
    %cst_139 = arith.constant dense<0.000000e+00> : vector<1x128xf32>
    %294 = tpu.matmul %290, %0, %cst_139 {dimension_numbers = #tpu.dot_dimension_numbers<[1], [0], [0], [1], [0, 0, 1, 1], [], []>} : vector<1x128xf32>, vector<128x128xf32>, vector<1x128xf32> -> vector<1x128xf32>
    %cst_140 = arith.constant dense<0.000000e+00> : vector<1x128xf32>
    %295 = tpu.matmul %293, %0, %cst_140 {dimension_numbers = #tpu.dot_dimension_numbers<[1], [0], [0], [1], [0, 0, 1, 1], [], []>} : vector<1x128xf32>, vector<128x128xf32>, vector<1x128xf32> -> vector<1x128xf32>
    %296 = arith.mulf %294, %294 : vector<1x128xf32>
    %297 = arith.subf %295, %296 : vector<1x128xf32>
    %cst_141 = arith.constant 0.000000e+00 : f32
    %298 = vector.broadcast %cst_141 : f32 to vector<1x128xf32>
    %299 = arith.maximumf %297, %298 : vector<1x128xf32>
    %cst_142 = arith.constant 9.99999974E-6 : f32
    %300 = vector.broadcast %cst_142 : f32 to vector<1x128xf32>
    %301 = arith.addf %299, %300 : vector<1x128xf32>
    %302 = math.rsqrt %301 : vector<1x128xf32>
    %303 = arith.mulf %287, %302 : vector<1x128xf32>
    %304 = vector.broadcast %303 : vector<1x128xf32> to vector<32x128xf32>
    %305 = arith.mulf %286, %304 : vector<32x128xf32>
    %306 = arith.mulf %294, %303 : vector<1x128xf32>
    %307 = arith.subf %288, %306 : vector<1x128xf32>
    %308 = vector.broadcast %307 : vector<1x128xf32> to vector<32x128xf32>
    %309 = arith.addf %305, %308 : vector<32x128xf32>
    %c0_143 = arith.constant 0 : index
    %c0_144 = arith.constant 0 : index
    %310 = vector.load %arg12[%c0_143, %c0_144] : memref<384x128xbf16, #tpu.memory_space<vmem>>, vector<384x128xbf16>
    %c0_145 = arith.constant 0 : index
    %c0_146 = arith.constant 0 : index
    %311 = vector.load %arg6[%c0_145, %c0_146] : memref<1x128xf32, #tpu.memory_space<vmem>>, vector<1x128xf32>
    %312 = arith.truncf %309 : vector<32x128xf32> to vector<32x128xbf16>
    %cst_147 = arith.constant dense<0.000000e+00> : vector<64x128xf32>
    %313 = tpu.matmul %2, %312, %cst_147 {dimension_numbers = #tpu.dot_dimension_numbers<[1], [0], [0], [1], [0, 0, 1, 1], [], []>} : vector<64x32xbf16>, vector<32x128xbf16>, vector<64x128xf32> -> vector<64x128xf32>
    %314 = arith.truncf %313 : vector<64x128xf32> to vector<64x128xbf16>
    %315 = vector.extract_strided_slice %314 {offsets = [0, 0], sizes = [32, 128], strides = [1, 1]} : vector<64x128xbf16> to vector<32x128xbf16>
    %316 = vector.extract_strided_slice %314 {offsets = [32, 0], sizes = [32, 128], strides = [1, 1]} : vector<64x128xbf16> to vector<32x128xbf16>
    %317 = tpu.concatenate %315, %312, %316 in 1 : vector<32x128xbf16>, vector<32x128xbf16>, vector<32x128xbf16> -> vector<32x384xbf16>
    %cst_148 = arith.constant dense<0.000000e+00> : vector<32x128xf32>
    %318 = tpu.matmul %317, %310, %cst_148 {dimension_numbers = #tpu.dot_dimension_numbers<[1], [0], [0], [1], [0, 0, 1, 1], [], []>} : vector<32x384xbf16>, vector<384x128xbf16>, vector<32x128xf32> -> vector<32x128xf32>
    %319 = vector.broadcast %311 : vector<1x128xf32> to vector<32x128xf32>
    %320 = arith.addf %318, %319 : vector<32x128xf32>
    %321 = arith.addf %320, %241 : vector<32x128xf32>
    %c0_149 = arith.constant 0 : index
    %c0_150 = arith.constant 0 : index
    %322 = vector.load %arg29[%c0_149, %c0_150] : memref<384x16xbf16, #tpu.memory_space<vmem>>, vector<384x16xbf16>
    %c0_151 = arith.constant 0 : index
    %c0_152 = arith.constant 0 : index
    %323 = vector.load %arg28[%c0_151, %c0_152] : memref<1x16xf32, #tpu.memory_space<vmem>>, vector<1x16xf32>
    %324 = arith.truncf %321 : vector<32x128xf32> to vector<32x128xbf16>
    %cst_153 = arith.constant dense<0.000000e+00> : vector<64x128xf32>
    %325 = tpu.matmul %2, %324, %cst_153 {dimension_numbers = #tpu.dot_dimension_numbers<[1], [0], [0], [1], [0, 0, 1, 1], [], []>} : vector<64x32xbf16>, vector<32x128xbf16>, vector<64x128xf32> -> vector<64x128xf32>
    %326 = arith.truncf %325 : vector<64x128xf32> to vector<64x128xbf16>
    %327 = vector.extract_strided_slice %326 {offsets = [0, 0], sizes = [32, 128], strides = [1, 1]} : vector<64x128xbf16> to vector<32x128xbf16>
    %328 = vector.extract_strided_slice %326 {offsets = [32, 0], sizes = [32, 128], strides = [1, 1]} : vector<64x128xbf16> to vector<32x128xbf16>
    %329 = tpu.concatenate %327, %324, %328 in 1 : vector<32x128xbf16>, vector<32x128xbf16>, vector<32x128xbf16> -> vector<32x384xbf16>
    %cst_154 = arith.constant dense<0.000000e+00> : vector<32x16xf32>
    %330 = tpu.matmul %329, %322, %cst_154 {dimension_numbers = #tpu.dot_dimension_numbers<[1], [0], [0], [1], [0, 0, 1, 1], [], []>} : vector<32x384xbf16>, vector<384x16xbf16>, vector<32x16xf32> -> vector<32x16xf32>
    %331 = vector.broadcast %323 : vector<1x16xf32> to vector<32x16xf32>
    %332 = arith.addf %330, %331 : vector<32x16xf32>
    %c0_155 = arith.constant 0 : index
    %c0_156 = arith.constant 0 : index
    %333 = vector.load %arg43[%c0_155, %c0_156] : memref<32x16xf32, #tpu.memory_space<vmem>>, vector<32x16xf32>
    tpu.vector_store %arg43[%c0_155, %c0_156], %332 {strides = array<i32>} : memref<32x16xf32, #tpu.memory_space<vmem>>, vector<32x16xf32>,
    return
  }
  func.func @transform_0(%arg0: i32) -> (i32, i32) {
    %c0_i32 = arith.constant 0 : i32
    %c0_i32_0 = arith.constant 0 : i32
    %c0_i32_1 = arith.constant 0 : i32
    return %c0_i32, %c0_i32_0 : i32, i32
  }
  func.func @transform_1(%arg0: i32) -> (i32, i32) {
    %c0_i32 = arith.constant 0 : i32
    %c0_i32_0 = arith.constant 0 : i32
    %c0_i32_1 = arith.constant 0 : i32
    return %c0_i32, %c0_i32_0 : i32, i32
  }
  func.func @transform_2(%arg0: i32) -> (i32, i32) {
    %c0_i32 = arith.constant 0 : i32
    %c0_i32_0 = arith.constant 0 : i32
    %c0_i32_1 = arith.constant 0 : i32
    return %c0_i32, %c0_i32_0 : i32, i32
  }
  func.func @transform_3(%arg0: i32) -> (i32, i32) {
    %c0_i32 = arith.constant 0 : i32
    %c0_i32_0 = arith.constant 0 : i32
    %c0_i32_1 = arith.constant 0 : i32
    return %c0_i32, %c0_i32_0 : i32, i32
  }
  func.func @transform_4(%arg0: i32) -> (i32, i32) {
    %c0_i32 = arith.constant 0 : i32
    %c0_i32_0 = arith.constant 0 : i32
    %c0_i32_1 = arith.constant 0 : i32
    return %c0_i32, %c0_i32_0 : i32, i32
  }
  func.func @transform_5(%arg0: i32) -> (i32, i32) {
    %c0_i32 = arith.constant 0 : i32
    %c0_i32_0 = arith.constant 0 : i32
    %c0_i32_1 = arith.constant 0 : i32
    return %c0_i32, %c0_i32_0 : i32, i32
  }
  func.func @transform_6(%arg0: i32) -> (i32, i32) {
    %c0_i32 = arith.constant 0 : i32
    %c0_i32_0 = arith.constant 0 : i32
    %c0_i32_1 = arith.constant 0 : i32
    return %c0_i32, %c0_i32_0 : i32, i32
  }
  func.func @transform_7(%arg0: i32) -> (i32, i32) {
    %c0_i32 = arith.constant 0 : i32
    %c0_i32_0 = arith.constant 0 : i32
    %c0_i32_1 = arith.constant 0 : i32
    return %c0_i32, %c0_i32_0 : i32, i32
  }
  func.func @transform_8(%arg0: i32) -> (i32, i32) {
    %c0_i32 = arith.constant 0 : i32
    %c0_i32_0 = arith.constant 0 : i32
    %c0_i32_1 = arith.constant 0 : i32
    return %c0_i32, %c0_i32_0 : i32, i32
  }
  func.func @transform_9(%arg0: i32) -> (i32, i32) {
    %c0_i32 = arith.constant 0 : i32
    %c0_i32_0 = arith.constant 0 : i32
    %c0_i32_1 = arith.constant 0 : i32
    return %c0_i32, %c0_i32_0 : i32, i32
  }
  func.func @transform_10(%arg0: i32) -> (i32, i32) {
    %c0_i32 = arith.constant 0 : i32
    %c0_i32_0 = arith.constant 0 : i32
    %c0_i32_1 = arith.constant 0 : i32
    return %c0_i32, %c0_i32_0 : i32, i32
  }
  func.func @transform_11(%arg0: i32) -> (i32, i32) {
    %c0_i32 = arith.constant 0 : i32
    %c0_i32_0 = arith.constant 0 : i32
    %c0_i32_1 = arith.constant 0 : i32
    return %c0_i32, %c0_i32_0 : i32, i32
  }
  func.func @transform_12(%arg0: i32) -> (i32, i32) {
    %c0_i32 = arith.constant 0 : i32
    %c0_i32_0 = arith.constant 0 : i32
    %c0_i32_1 = arith.constant 0 : i32
    return %c0_i32, %c0_i32_0 : i32, i32
  }
  func.func @transform_13(%arg0: i32) -> (i32, i32) {
    %c0_i32 = arith.constant 0 : i32
    %c0_i32_0 = arith.constant 0 : i32
    %c0_i32_1 = arith.constant 0 : i32
    return %c0_i32, %c0_i32_0 : i32, i32
  }
  func.func @transform_14(%arg0: i32) -> (i32, i32) {
    %c0_i32 = arith.constant 0 : i32
    %c0_i32_0 = arith.constant 0 : i32
    %c0_i32_1 = arith.constant 0 : i32
    return %c0_i32, %c0_i32_0 : i32, i32
  }
  func.func @transform_15(%arg0: i32) -> (i32, i32) {
    %c0_i32 = arith.constant 0 : i32
    %c0_i32_0 = arith.constant 0 : i32
    %c0_i32_1 = arith.constant 0 : i32
    return %c0_i32, %c0_i32_0 : i32, i32
  }
  func.func @transform_16(%arg0: i32) -> (i32, i32) {
    %c0_i32 = arith.constant 0 : i32
    %c0_i32_0 = arith.constant 0 : i32
    %c0_i32_1 = arith.constant 0 : i32
    return %c0_i32, %c0_i32_0 : i32, i32
  }
  func.func @transform_17(%arg0: i32) -> (i32, i32) {
    %c0_i32 = arith.constant 0 : i32
    %c0_i32_0 = arith.constant 0 : i32
    %c0_i32_1 = arith.constant 0 : i32
    return %c0_i32, %c0_i32_0 : i32, i32
  }
  func.func @transform_18(%arg0: i32) -> (i32, i32) {
    %c0_i32 = arith.constant 0 : i32
    %c0_i32_0 = arith.constant 0 : i32
    %c0_i32_1 = arith.constant 0 : i32
    return %c0_i32, %c0_i32_0 : i32, i32
  }
  func.func @transform_19(%arg0: i32) -> (i32, i32) {
    %c0_i32 = arith.constant 0 : i32
    %c0_i32_0 = arith.constant 0 : i32
    %c0_i32_1 = arith.constant 0 : i32
    return %c0_i32, %c0_i32_0 : i32, i32
  }
  func.func @transform_20(%arg0: i32) -> (i32, i32) {
    %c0_i32 = arith.constant 0 : i32
    %c0_i32_0 = arith.constant 0 : i32
    %c0_i32_1 = arith.constant 0 : i32
    return %c0_i32, %c0_i32_0 : i32, i32
  }
  func.func @transform_21(%arg0: i32) -> (i32, i32) {
    %c0_i32 = arith.constant 0 : i32
    %c0_i32_0 = arith.constant 0 : i32
    %c0_i32_1 = arith.constant 0 : i32
    return %c0_i32, %c0_i32_0 : i32, i32
  }
  func.func @transform_22(%arg0: i32) -> (i32, i32) {
    %c0_i32 = arith.constant 0 : i32
    %c0_i32_0 = arith.constant 0 : i32
    %c0_i32_1 = arith.constant 0 : i32
    return %c0_i32, %c0_i32_0 : i32, i32
  }
  func.func @transform_23(%arg0: i32) -> (i32, i32) {
    %c0_i32 = arith.constant 0 : i32
    %c0_i32_0 = arith.constant 0 : i32
    %c0_i32_1 = arith.constant 0 : i32
    return %c0_i32, %c0_i32_0 : i32, i32
  }
  func.func @transform_24(%arg0: i32) -> (i32, i32) {
    %c0_i32 = arith.constant 0 : i32
    %c0_i32_0 = arith.constant 0 : i32
    %c0_i32_1 = arith.constant 0 : i32
    return %c0_i32, %c0_i32_0 : i32, i32
  }
  func.func @transform_25(%arg0: i32) -> (i32, i32) {
    %c0_i32 = arith.constant 0 : i32
    %c0_i32_0 = arith.constant 0 : i32
    %c0_i32_1 = arith.constant 0 : i32
    return %c0_i32, %c0_i32_0 : i32, i32
  }
  func.func @transform_26(%arg0: i32) -> (i32, i32) {
    %c0_i32 = arith.constant 0 : i32
    %c0_i32_0 = arith.constant 0 : i32
    %c0_i32_1 = arith.constant 0 : i32
    return %c0_i32, %c0_i32_0 : i32, i32
  }
  func.func @transform_27(%arg0: i32) -> (i32, i32) {
    %c0_i32 = arith.constant 0 : i32
    %c0_i32_0 = arith.constant 0 : i32
    %c0_i32_1 = arith.constant 0 : i32
    return %c0_i32, %c0_i32_0 : i32, i32
  }
  func.func @transform_28(%arg0: i32) -> (i32, i32) {
    %c0_i32 = arith.constant 0 : i32
    %c0_i32_0 = arith.constant 0 : i32
    %c0_i32_1 = arith.constant 0 : i32
    return %c0_i32, %c0_i32_0 : i32, i32
  }
  func.func @transform_29(%arg0: i32) -> (i32, i32) {
    %c0_i32 = arith.constant 0 : i32
    %c0_i32_0 = arith.constant 0 : i32
    %c0_i32_1 = arith.constant 0 : i32
    return %c0_i32, %c0_i32_0 : i32, i32
  }
  func.func @transform_30(%arg0: i32) -> (i32, i32) {
    %c0_i32 = arith.constant 0 : i32
    %c0_i32_0 = arith.constant 0 : i32
    %c0_i32_1 = arith.constant 0 : i32
    return %c0_i32, %c0_i32_0 : i32, i32
  }
  func.func @transform_31(%arg0: i32) -> (i32, i32) {
    %c0_i32 = arith.constant 0 : i32
    %c0_i32_0 = arith.constant 0 : i32
    %c0_i32_1 = arith.constant 0 : i32
    return %c0_i32, %c0_i32_0 : i32, i32
  }
  func.func @transform_32(%arg0: i32) -> (i32, i32) {
    %c0_i32 = arith.constant 0 : i32
    %c0_i32_0 = arith.constant 0 : i32
    %c0_i32_1 = arith.constant 0 : i32
    return %c0_i32, %c0_i32_0 : i32, i32
  }
  func.func @transform_33(%arg0: i32) -> (i32, i32) {
    %c0_i32 = arith.constant 0 : i32
    %c0_i32_0 = arith.constant 0 : i32
    %c0_i32_1 = arith.constant 0 : i32
    return %c0_i32, %c0_i32_0 : i32, i32
  }
  func.func @transform_34(%arg0: i32) -> (i32, i32) {
    %c0_i32 = arith.constant 0 : i32
    %c0_i32_0 = arith.constant 0 : i32
    %c0_i32_1 = arith.constant 0 : i32
    return %c0_i32, %c0_i32_0 : i32, i32
  }
  func.func @transform_35(%arg0: i32) -> (i32, i32) {
    %c0_i32 = arith.constant 0 : i32
    %c0_i32_0 = arith.constant 0 : i32
    %c0_i32_1 = arith.constant 0 : i32
    return %c0_i32, %c0_i32_0 : i32, i32
  }
  func.func @transform_36(%arg0: i32) -> (i32, i32) {
    %c0_i32 = arith.constant 0 : i32
    %c0_i32_0 = arith.constant 0 : i32
    %c0_i32_1 = arith.constant 0 : i32
    return %c0_i32, %c0_i32_0 : i32, i32
  }
  func.func @transform_37(%arg0: i32) -> (i32, i32) {
    %c0_i32 = arith.constant 0 : i32
    %c0_i32_0 = arith.constant 0 : i32
    %c0_i32_1 = arith.constant 0 : i32
    return %c0_i32, %c0_i32_0 : i32, i32
  }
  func.func @transform_38(%arg0: i32) -> (i32, i32) {
    %c0_i32 = arith.constant 0 : i32
    %c0_i32_0 = arith.constant 0 : i32
    %c0_i32_1 = arith.constant 0 : i32
    return %c0_i32, %c0_i32_0 : i32, i32
  }
  func.func @transform_39(%arg0: i32) -> (i32, i32) {
    %c0_i32 = arith.constant 0 : i32
    %c0_i32_0 = arith.constant 0 : i32
    %c0_i32_1 = arith.constant 0 : i32
    return %c0_i32, %c0_i32_0 : i32, i32
  }
  func.func @transform_40(%arg0: i32) -> (i32, i32) {
    %c0_i32 = arith.constant 0 : i32
    %c0_i32_0 = arith.constant 0 : i32
    %c0_i32_1 = arith.constant 0 : i32
    return %c0_i32, %c0_i32_0 : i32, i32
  }
  func.func @transform_41(%arg0: i32) -> (i32, i32) {
    %c0_i32 = arith.constant 0 : i32
    %c0_i32_0 = arith.constant 0 : i32
    %c0_i32_1 = arith.constant 0 : i32
    return %c0_i32, %c0_i32_0 : i32, i32
  }
  func.func @transform_42(%arg0: i32) -> (i32, i32) {
    %c0_i32 = arith.constant 0 : i32
    %c0_i32_0 = arith.constant 0 : i32
    %c0_i32_1 = arith.constant 0 : i32
    return %c0_i32, %c0_i32_0 : i32, i32
  }
}

</mosaic_0001>

<bundles_post_ra>
// kernel: tile.24
= control target key start
LH: loop header
LB: loop body
LE: loop exit
PB: predicated region body
PF: predicated region fallthrough
CT: control target
= control target key end

     0   :  { %s7_s6 = smov 3  ;;  %s21_s9 = smov 3  ;;  %vm4_vm0 = vcmask 130048   ;;  %vm11_vm1 = vcmask 1048448   ;;  %vm18_vm2 = vcmask 917248   ;;  %vm25_vm3 = vcmask 786048   ;;  %s121_s0 = inlined_call_operand.vmem [shape: f32[2,8,16], index: 0, kind: input, shape index: {}]   ;;  %s122_s1 = inlined_call_operand.vmem [shape: f32[2,128], index: 1, kind: output, shape index: {}]  }
   0x1   :  { %v63_v0 = vld [vmem:[%s121_s0 + $0x7] ss:$8 sm:%s7_s6]   ;;  %s77_s10 = smov 112   ;;  %v65_v1 = vld [vmem:[%s121_s0 + $0x5] ss:$8 sm:%s21_s9]   ;;  %s14_s13 = smov 3 }
   0x2   :  { %9 = vrot.lane.b32.xlu0 %v63_v0, %s77_s10  ;;  %s78_s14 = smov 80   ;;  %v64_v2 = vld [vmem:[%s121_s0 + $0x6] ss:$8 sm:%s14_s13]   ;;  %s28_s17 = smov 3  ;;  %vm32_vm4 = vcmask 654848   ;;  %vm39_vm5 = vcmask 523648  }
   0x3   :  { %23 = vrot.lane.b32.xlu1 %v65_v1, %s78_s14  ;;  %v66_v3 = vld [vmem:[%s121_s0 + $0x4] ss:$8 sm:%s28_s17]   ;;  %s35_s20 = smov 3  ;;  %s42_s21 = smov 3  ;;  %vm46_vm6 = vcmask 392448   ;;  %vm53_vm7 = vcmask 261248  }
   0x4   :  { %s79_s22 = smov 96   ;;  %s80_s23 = smov 64   ;;  %v67_v4 = vld [vmem:[%s121_s0 + $0x3] ss:$8 sm:%s35_s20]   ;;  %v68_v5 = vld [vmem:[%s121_s0 + $0x2] ss:$8 sm:%s42_s21]  }
   0x5   :  { %s2_s26 = smov 3  ;;  %s49_s29 = smov 3 }
   0x6   :  { %16 = vrot.lane.b32.xlu0 %v64_v2, %s79_s22  ;;  %v3_v6 = vld [vmem:[%s121_s0] ss:$8 sm:%s2_s26]   ;;  %s81_s3 = smov 48   ;;  %s82_s4 = smov 32  }
   0x7   :  { %30 = vrot.lane.b32.xlu1 %v66_v3, %s80_s23  ;;  %5 = vst.msk [vmem:[#allocation0] sm:$0x3] %vm4_vm0, %v3_v6   ;;  %v69_v7 = vld [vmem:[%s121_s0 + $0x1] ss:$8 sm:%s49_s29]   ;;  %s83_s0 = smov 16  }
   0xa   :  { %37 = vrot.lane.b32.xlu0 %v67_v4, %s81_s3 }
   0xb   :  { %44 = vrot.lane.b32.xlu1 %v68_v5, %s82_s4 }
   0xe   :  { %51 = vrot.lane.b32.xlu0 %v69_v7, %s83_s0 }
  0x74   :  { %v10_v8 = vpop.permute.xlu0 %9  }
  0x75   :  { %12 = vst.msk [vmem:[#allocation0] sm:$0x3] %vm11_vm1, %v10_v8   ;;  %v24_v9 = vpop.permute.xlu1 %23  }
  0x78   :  { %v17_v10 = vpop.permute.xlu0 %16  }
  0x79   :  { %19 = vst.msk [vmem:[#allocation0] sm:$0x3] %vm18_vm2, %v17_v10   ;;  %v31_v11 = vpop.permute.xlu1 %30  }
  0x7a   :  { %26 = vst.msk [vmem:[#allocation0] sm:$0x3] %vm25_vm3, %v24_v9  }
  0x7b   :  { %33 = vst.msk [vmem:[#allocation0] sm:$0x3] %vm32_vm4, %v31_v11  }
  0x7c   :  { %v38_v12 = vpop.permute.xlu0 %37  }
  0x7d   :  { %40 = vst.msk [vmem:[#allocation0] sm:$0x3] %vm39_vm5, %v38_v12   ;;  %v45_v13 = vpop.permute.xlu1 %44  }
  0x7e   :  { %47 = vst.msk [vmem:[#allocation0] sm:$0x3] %vm46_vm6, %v45_v13  }
  0x80   :  { %v52_v14 = vpop.permute.xlu0 %51  }
  0x81   :  { %54 = vst.msk [vmem:[#allocation0] sm:$0x3] %vm53_vm7, %v52_v14  }
  0x88   :  { %v59_v15 = vld [vmem:[#allocation0] sm:$0x3] }
  0x89   :  { %62 = vst [vmem:[%s122_s1] sm:$0x3] %v59_v15 }

// kernel: tile.29
= control target key start
LH: loop header
LB: loop body
LE: loop exit
PB: predicated region body
PF: predicated region fallthrough
CT: control target
= control target key end

     0   :  { %s7_s6 = smov 3  ;;  %s21_s9 = smov 3  ;;  %vm4_vm0 = vcmask 64512   ;;  %vm11_vm1 = vcmask 1048512   ;;  %vm18_vm2 = vcmask 982912   ;;  %vm25_vm3 = vcmask 917312   ;;  %s225_s0 = inlined_call_operand.vmem [shape: f32[2,16,8], index: 0, kind: input, shape index: {}]   ;;  %s226_s1 = inlined_call_operand.vmem [shape: f32[2,128], index: 1, kind: output, shape index: {}]  }
   0x1   :  { %v119_v0 = vld [vmem:[%s225_s0 + $0xf] ss:$16 sm:%s7_s6]   ;;  %s149_s10 = smov 120   ;;  %v121_v1 = vld [vmem:[%s225_s0 + $0xd] ss:$16 sm:%s21_s9]   ;;  %s14_s13 = smov 3 }
   0x2   :  { %9 = vrot.lane.b32.xlu0 %v119_v0, %s149_s10  ;;  %s150_s14 = smov 104   ;;  %v120_v2 = vld [vmem:[%s225_s0 + $0xe] ss:$16 sm:%s14_s13]   ;;  %s28_s17 = smov 3  ;;  %vm32_vm4 = vcmask 851712   ;;  %vm39_vm5 = vcmask 786112  }
   0x3   :  { %23 = vrot.lane.b32.xlu1 %v121_v1, %s150_s14  ;;  %v122_v3 = vld [vmem:[%s225_s0 + $0xc] ss:$16 sm:%s28_s17]   ;;  %s35_s20 = smov 3  ;;  %s42_s21 = smov 3  ;;  %vm46_vm6 = vcmask 720512   ;;  %vm53_vm7 = vcmask 654912  }
   0x4   :  { %s151_s22 = smov 112   ;;  %s152_s23 = smov 96   ;;  %v123_v4 = vld [vmem:[%s225_s0 + $0xb] ss:$16 sm:%s35_s20]   ;;  %v124_v5 = vld [vmem:[%s225_s0 + $0xa] ss:$16 sm:%s42_s21]  }
   0x5   :  { %s49_s28 = smov 3  ;;  %s56_s29 = smov 3  ;;  %vm60_vm8 = vcmask 589312   ;;  %vm67_vm9 = vcmask 523712   ;;  %vm74_vm10 = vcmask 458112   ;;  %vm81_vm11 = vcmask 392512  }
   0x6   :  { %16 = vrot.lane.b32.xlu0 %v120_v2, %s151_s22  ;;  %s153_s30 = smov 88   ;;  %s154_s2 = smov 80   ;;  %v125_v6 = vld [vmem:[%s225_s0 + $0x9] ss:$16 sm:%s49_s28]   ;;  %vm88_vm12 = vcmask 326912   ;;  %vm95_vm13 = vcmask 261312  }
   0x7   :  { %30 = vrot.lane.b32.xlu1 %v122_v3, %s152_s23  ;;  %v126_v7 = vld [vmem:[%s225_s0 + $0x8] ss:$16 sm:%s56_s29]   ;;  %s63_s7 = smov 3  ;;  %s70_s8 = smov 3  ;;  %vm102_vm14 = vcmask 195712   ;;  %vm109_vm15 = vcmask 130112  }
   0x8   :  { %s155_s9 = smov 72   ;;  %s156_s10 = smov 64   ;;  %v127_v8 = vld [vmem:[%s225_s0 + $0x7] ss:$16 sm:%s63_s7]   ;;  %v128_v9 = vld [vmem:[%s225_s0 + $0x6] ss:$16 sm:%s70_s8]  }
   0x9   :  { %s2_s13 = smov 3  ;;  %s77_s16 = smov 3 }
   0xa   :  { %37 = vrot.lane.b32.xlu0 %v123_v4, %s153_s30  ;;  %v3_v10 = vld [vmem:[%s225_s0] ss:$16 sm:%s2_s13]   ;;  %s84_s19 = smov 3  ;;  %s157_s20 = smov 56  }
   0xb   :  { %44 = vrot.lane.b32.xlu1 %v124_v5, %s154_s2  ;;  %5 = vst.msk [vmem:[#allocation0] sm:$0x3] %vm4_vm0, %v3_v10   ;;  %s158_s21 = smov 48   ;;  %v129_v11 = vld [vmem:[%s225_s0 + $0x5] ss:$16 sm:%s77_s16]   ;;  %s91_s26 = smov 3 }
   0xc   :  { %v130_v12 = vld [vmem:[%s225_s0 + $0x4] ss:$16 sm:%s84_s19]   ;;  %s98_s27 = smov 3  ;;  %s159_s28 = smov 40   ;;  %v131_v13 = vld [vmem:[%s225_s0 + $0x3] ss:$16 sm:%s91_s26]  }
   0xd   :  { %s160_s29 = smov 32   ;;  %v132_v14 = vld [vmem:[%s225_s0 + $0x2] ss:$16 sm:%s98_s27]   ;;  %s105_s5 = smov 3 }
   0xe   :  { %51 = vrot.lane.b32.xlu0 %v125_v6, %s155_s9  ;;  %s161_s6 = smov 24   ;;  %s162_s7 = smov 16   ;;  %v133_v15 = vld [vmem:[%s225_s0 + $0x1] ss:$16 sm:%s105_s5]  }
   0xf   :  { %58 = vrot.lane.b32.xlu1 %v126_v7, %s156_s10  ;;  %s163_s0 = smov 8  }
  0x12   :  { %65 = vrot.lane.b32.xlu0 %v127_v8, %s157_s20 }
  0x13   :  { %72 = vrot.lane.b32.xlu1 %v128_v9, %s158_s21 }
  0x16   :  { %79 = vrot.lane.b32.xlu0 %v129_v11, %s159_s28 }
  0x17   :  { %86 = vrot.lane.b32.xlu1 %v130_v12, %s160_s29 }
  0x1a   :  { %93 = vrot.lane.b32.xlu0 %v131_v13, %s161_s6 }
  0x1b   :  { %100 = vrot.lane.b32.xlu1 %v132_v14, %s162_s7 }
  0x1e   :  { %107 = vrot.lane.b32.xlu0 %v133_v15, %s163_s0 }
  0x74   :  { %v10_v16 = vpop.permute.xlu0 %9  }
  0x75   :  { %12 = vst.msk [vmem:[#allocation0] sm:$0x3] %vm11_vm1, %v10_v16   ;;  %v24_v17 = vpop.permute.xlu1 %23  }
  0x78   :  { %v17_v18 = vpop.permute.xlu0 %16  }
  0x79   :  { %19 = vst.msk [vmem:[#allocation0] sm:$0x3] %vm18_vm2, %v17_v18   ;;  %v31_v19 = vpop.permute.xlu1 %30  }
  0x7a   :  { %26 = vst.msk [vmem:[#allocation0] sm:$0x3] %vm25_vm3, %v24_v17  }
  0x7b   :  { %33 = vst.msk [vmem:[#allocation0] sm:$0x3] %vm32_vm4, %v31_v19  }
  0x7c   :  { %v38_v20 = vpop.permute.xlu0 %37  }
  0x7d   :  { %40 = vst.msk [vmem:[#allocation0] sm:$0x3] %vm39_vm5, %v38_v20   ;;  %v45_v21 = vpop.permute.xlu1 %44  }
  0x7e   :  { %47 = vst.msk [vmem:[#allocation0] sm:$0x3] %vm46_vm6, %v45_v21  }
  0x80   :  { %v52_v22 = vpop.permute.xlu0 %51  }
  0x81   :  { %54 = vst.msk [vmem:[#allocation0] sm:$0x3] %vm53_vm7, %v52_v22   ;;  %v59_v23 = vpop.permute.xlu1 %58  }
  0x82   :  { %61 = vst.msk [vmem:[#allocation0] sm:$0x3] %vm60_vm8, %v59_v23  }
  0x84   :  { %v66_v24 = vpop.permute.xlu0 %65  }
  0x85   :  { %68 = vst.msk [vmem:[#allocation0] sm:$0x3] %vm67_vm9, %v66_v24   ;;  %v73_v25 = vpop.permute.xlu1 %72  }
  0x86   :  { %75 = vst.msk [vmem:[#allocation0] sm:$0x3] %vm74_vm10, %v73_v25  }
  0x88   :  { %v80_v26 = vpop.permute.xlu0 %79  }
  0x89   :  { %82 = vst.msk [vmem:[#allocation0] sm:$0x3] %vm81_vm11, %v80_v26   ;;  %v87_v27 = vpop.permute.xlu1 %86  }
  0x8a   :  { %89 = vst.msk [vmem:[#allocation0] sm:$0x3] %vm88_vm12, %v87_v27  }
  0x8c   :  { %v94_v28 = vpop.permute.xlu0 %93  }
  0x8d   :  { %96 = vst.msk [vmem:[#allocation0] sm:$0x3] %vm95_vm13, %v94_v28   ;;  %v101_v29 = vpop.permute.xlu1 %100  }
  0x8e   :  { %103 = vst.msk [vmem:[#allocation0] sm:$0x3] %vm102_vm14, %v101_v29  }
  0x90   :  { %v108_v30 = vpop.permute.xlu0 %107  }
  0x91   :  { %110 = vst.msk [vmem:[#allocation0] sm:$0x3] %vm109_vm15, %v108_v30  }
  0x98   :  { %v115_v31 = vld [vmem:[#allocation0] sm:$0x3] }
  0x99   :  { %118 = vst [vmem:[%s226_s1] sm:$0x3] %v115_v31 }

// kernel: _lambda_.1
= control target key start
LH: loop header
LB: loop body
LE: loop exit
PB: predicated region body
PF: predicated region fallthrough
CT: control target
= control target key end

     0   :  { %s9018_s6 = smov 1   ;;  %s9019_s10 = smov 2   ;;  %s10413_s0 = inlined_call_operand.smem [shape: u32[43], index: -1, kind: input, shape index: {}] }
   0x1   :  { %s9103_s5 = sld [smem:[%s10413_s0]]   ;;  %s9020_s14 = smov 3  }
   0x2   :  { %s9108_s9 = sld [smem:[%s10413_s0 + %s9018_s6]]   ;;  %s9021_s18 = smov 4  }
   0x3   :  { %s9113_s13 = sld [smem:[%s10413_s0 + %s9019_s10]]   ;;  %s9022_s22 = smov 5  }
   0x4   :  { %s9118_s17 = sld [smem:[%s10413_s0 + %s9020_s14]]   ;;  %s9023_s26 = smov 6  }
   0x5   :  { %s9123_s21 = sld [smem:[%s10413_s0 + %s9021_s18]]   ;;  %s9024_s30 = smov 7  }
   0x6   :  { %s9128_s25 = sld [smem:[%s10413_s0 + %s9022_s22]]   ;;  %s9025_s4 = smov 8  }
   0x7   :  { %s9133_s29 = sld [smem:[%s10413_s0 + %s9023_s26]]   ;;  %s9026_s10 = smov 9  }
   0x8   :  { %s9138_s3 = sld [smem:[%s10413_s0 + %s9024_s30]]   ;;  %s9027_s15 = smov 10  }
   0x9   :  { %10426 = sst [smem:[#allocation60_spill]] %s9113_s13  ;;  %s9028_s20 = smov 11  }
   0xa   :  { %10427 = sst [smem:[#allocation61_spill]] %s9118_s17  ;;  %s9029_s26 = smov 12  }
   0xb   :  { %10428 = sst [smem:[#allocation62_spill]] %s9123_s21  ;;  %s9030_s1 = smov 13  }
   0xc   :  { %10429 = sst [smem:[#allocation63_spill]] %s9128_s25  ;;  %s9031_s7 = smov 14  }
   0xd   :  { %10430 = sst [smem:[#allocation64_spill]] %s9133_s29  ;;  %s9033_s22 = smov 16  }
   0xe   :  { %s9143_s8 = sld [smem:[%s10413_s0 + %s9025_s4]]   ;;  %s9034_s28 = smov 17  }
   0xf   :  { %s9148_s14 = sld [smem:[%s10413_s0 + %s9026_s10]]  }
  0x10   :  { %s9153_s19 = sld [smem:[%s10413_s0 + %s9027_s15]]   ;;  %s9032_s15 = smov 15  }
  0x11   :  { %s9158_s24 = sld [smem:[%s10413_s0 + %s9028_s20]]  }
  0x12   :  { %s9163_s30 = sld [smem:[%s10413_s0 + %s9029_s26]]  }
  0x13   :  { %s9168_s6 = sld [smem:[%s10413_s0 + %s9030_s1]]  }
  0x14   :  { %s9173_s12 = sld [smem:[%s10413_s0 + %s9031_s7]]   ;;  %s9035_s7 = smov 18  }
  0x15   :  { %10431 = sst [smem:[#allocation65_spill]] %s9148_s14 }
  0x16   :  { %10432 = sst [smem:[#allocation66_spill]] %s9153_s19 }
  0x17   :  { %10433 = sst [smem:[#allocation67_spill]] %s9158_s24 }
  0x18   :  { %10434 = sst [smem:[#allocation68_spill]] %s9163_s30 }
  0x19   :  { %s9178_s20 = sld [smem:[%s10413_s0 + %s9032_s15]]   ;;  %s9036_s15 = smov 19  }
  0x1a   :  { %10435 = sst [smem:[#allocation69_spill]] %s9173_s12 }
  0x1b   :  { %s9183_s27 = sld [smem:[%s10413_s0 + %s9033_s22]]   ;;  %s9037_s22 = smov 20  }
  0x1c   :  { %s9188_s4 = sld [smem:[%s10413_s0 + %s9034_s28]]   ;;  %s9038_s28 = smov 21  }
  0x1d   :  { %s9193_s25 = sld [smem:[%s10413_s0 + %s9035_s7]]   ;;  %s9039_s7 = smov 22  }
  0x1e   :  { %s9198_s24 = sld [smem:[%s10413_s0 + %s9036_s15]]   ;;  %s9040_s15 = smov 23  }
  0x1f   :  { %10436 = sst [smem:[#allocation70_spill]] %s9178_s20 }
  0x20   :  { %s9203_s21 = sld [smem:[%s10413_s0 + %s9037_s22]]   ;;  %s9041_s22 = smov 24  }
  0x21   :  { %10437 = sst [smem:[#allocation71_spill]] %s9183_s27 }
  0x22   :  { %s9208_s29 = sld [smem:[%s10413_s0 + %s9038_s28]]   ;;  %s9042_s28 = smov 25  }
  0x23   :  { %10438 = sst [smem:[#allocation72_spill]] %s9193_s25 }
  0x24   :  { %10439 = sst [smem:[#allocation73_spill]] %s9198_s24 }
  0x25   :  { %s9213_s19 = sld [smem:[%s10413_s0 + %s9039_s7]]   ;;  %s9043_s7 = smov 26  }
  0x26   :  { %s9218_s30 = sld [smem:[%s10413_s0 + %s9040_s15]]   ;;  %s9044_s15 = smov 27  }
  0x27   :  { %s9223_s20 = sld [smem:[%s10413_s0 + %s9041_s22]]   ;;  %s9045_s22 = smov 28  }
  0x28   :  { %10440 = sst [smem:[#allocation74_spill]] %s9208_s29 }
  0x29   :  { %s9228_s17 = sld [smem:[%s10413_s0 + %s9042_s28]]   ;;  %s9046_s28 = smov 29  }
  0x2a   :  { %s9233_s27 = sld [smem:[%s10413_s0 + %s9043_s7]]   ;;  %s9047_s7 = smov 30  }
  0x2b   :  { %s9238_s24 = sld [smem:[%s10413_s0 + %s9044_s15]]   ;;  %s9048_s15 = smov 31  }
  0x2c   :  { %10441 = sst [smem:[#allocation75_spill]] %s9218_s30 }
  0x2d   :  { %s9243_s13 = sld [smem:[%s10413_s0 + %s9045_s22]]   ;;  %s9049_s22 = smov 32  }
  0x2e   :  { %s9258_s30 = sld [smem:[%s10413_s0 + %s9048_s15]]   ;;  %s9052_s15 = smov 35  }
  0x2f   :  { %10442 = sst [smem:[#allocation76_spill]] %s9228_s17 }
  0x30   :  { %10443 = sst [smem:[#allocation77_spill]] %s9233_s27 }
  0x31   :  { %s9248_s17 = sld [smem:[%s10413_s0 + %s9046_s28]]   ;;  %s9050_s28 = smov 33  }
  0x32   :  { %s9253_s27 = sld [smem:[%s10413_s0 + %s9047_s7]]   ;;  %s9051_s7 = smov 34  }
  0x33   :  { %10444 = sst [smem:[#allocation78_spill]] %s9243_s13 }
  0x34   :  { %10446 = sst [smem:[#allocation80_spill]] %s9258_s30 }
  0x35   :  { %s9263_s13 = sld [smem:[%s10413_s0 + %s9049_s22]]   ;;  %s9053_s22 = smov 36  }
  0x36   :  { %s9273_s29 = sld [smem:[%s10413_s0 + %s9051_s7]]   ;;  %s9055_s7 = smov 38  }
  0x37   :  { %10445 = sst [smem:[#allocation79_spill]] %s9248_s17 }
  0x38   :  { %s9268_s17 = sld [smem:[%s10413_s0 + %s9050_s28]]   ;;  %s9054_s28 = smov 37  }
  0x39   :  { %s9278_s30 = sld [smem:[%s10413_s0 + %s9052_s15]]   ;;  %s9056_s15 = smov 39  }
  0x3a   :  { %s9283_s25 = sld [smem:[%s10413_s0 + %s9053_s22]]   ;;  %s9057_s22 = smov 40  }
  0x3b   :  { %s9298_s12 = sld [smem:[%s10413_s0 + %s9056_s15]]  }
  0x3c   :  { %10448 = sst [smem:[#allocation82_spill]] %s9273_s29 }
  0x3d   :  { %s9293_s29 = sld [smem:[%s10413_s0 + %s9055_s7]]   ;;  %s9059_s7 = smov 42  }
  0x3e   :  { %10447 = sst [smem:[#allocation81_spill]] %s9268_s17 }
  0x3f   :  { %s9288_s17 = sld [smem:[%s10413_s0 + %s9054_s28]]   ;;  %s9058_s28 = smov 41  }
  0x40   :  { %10449 = sst [smem:[#allocation83_spill]] %s9283_s25 }
  0x41   :  { %s9303_s25 = sld [smem:[%s10413_s0 + %s9057_s22]]  }
  0x42   :  { %s9308_s14 = sld [smem:[%s10413_s0 + %s9058_s28]]  }
  0x43   :  { %10450 = sst [smem:[#allocation84_spill]] %s9293_s29 }
  0x44   :  { %s9313_s29 = sld [smem:[%s10413_s0 + %s9059_s7]]  }
  0x45   :  { %90 = vsyncpa [#allocation3], 0 }
  0x46   :  { %91 = vsyncpa [#allocation6], 0 }
  0x47   :  { %92 = vsyncpa [#allocation9], 0 }
  0x48   :  { %93 = vsyncpa [#allocation12], 0 }
  0x49   :  { %94 = vsyncpa [#allocation15], 0 }
  0x4a   :  { %95 = vsyncpa [#allocation18], 0 }
  0x4b   :  { %96 = vsyncpa [#allocation21], 0 }
  0x4c   :  { %97 = vsyncpa [#allocation24], 0 }
  0x4d   :  { %98 = vsyncpa [#allocation27], 0 }
  0x4e   :  { %99 = vsyncpa [#allocation30], 0 }
  0x4f   :  { %100 = vsyncpa [#allocation33], 0 }
  0x50   :  { %101 = vsyncpa [#allocation36], 0 }
  0x51   :  { %102 = vsyncpa [#allocation39], 0 }
  0x52   :  { %103 = vsyncpa [#allocation42], 0 }
  0x53   :  { %104 = vsyncpa [#allocation4], 0  ;;  %s9060_s15 = smov [#allocation5]   ;;  %s9061_s18 = smov [#allocation8]  }
  0x54   :  { %s122_s16 = sshll.u32 %s9060_s15, 4  ;;  %s155_s0 = sshll.u32 %s9061_s18, 4  ;;  %s123_s16 = int_to_ptr.vmem [resolvable:$true] %s122_s16  ;;  %s156_s0 = int_to_ptr.vmem [resolvable:$true] %s155_s0 }
  0x55   :  { %s8436_s22 = scalar_lea.vmem %s123_s16, 2048  ;;  %p8441_p1 = scmp.lt.s32.totalorder %s123_s16, %s123_s16 }
  0x56   :  { %p8437_p0 = scmp.ne.s32.totalorder %s123_s16, %s8436_s22  ;;  %p8442_p2 = scmp.lt.s32.totalorder %s8436_s22, %s8436_s22 }
  0x58   :  { %p8443_p3 = por %p8442_p2, %p8441_p1 }
  0x5a   :  { %p8444_p4 = pnand %p8443_p3, %p8437_p0 }
  0x5c   :  { %8447 = shalt.err (!%p8444_p4)
}
  0x5d   :  { %s9062_s23 = smov 128   ;;  %s9063_s26 = smov 8  }
  0x5e   :  { %128 = dma.hbm_to_vmem [thread:$0]  %s9108_s9, 2048, %s123_s16, [#allocation6], %s9062_s23, %s9062_s23, %s9063_s26  }
  0x5f   :  { %s8456_s28 = scalar_lea.vmem %s156_s0, 16  ;;  %s8460_s1 = scalar_lea.vmem %s156_s0, 32 }
  0x60   :  { %p8457_p5 = scmp.ne.s32.totalorder %s156_s0, %s8456_s28  ;;  %p8461_p6 = scmp.lt.s32.totalorder %s156_s0, %s156_s0 }
  0x61   :  { %p8462_p7 = scmp.lt.s32.totalorder %s8460_s1, %s8456_s28 }
  0x63   :  { %p8463_p8 = por %p8462_p7, %p8461_p6 }
  0x65   :  { %p8464_p9 = pnand %p8463_p8, %p8457_p5 }
  0x67   :  { %8467 = shalt.err (!%p8464_p9)
}
  0x68   :  { %158 = dma.hbm_to_vmem [thread:$0]  %s9143_s8, 16, %s156_s0, [#allocation9]  }
  0x69   :  { %s9064_s2 = smov [#allocation11]   ;;  %s9065_s10 = smov [#allocation14]  }
  0x6a   :  { %s180_s7 = sshll.u32 %s9064_s2, 4  ;;  %s207_s11 = sshll.u32 %s9065_s10, 4  ;;  %s181_s7 = int_to_ptr.vmem [resolvable:$true] %s180_s7  ;;  %s208_s11 = int_to_ptr.vmem [resolvable:$true] %s207_s11 }
  0x6b   :  { %s8476_s15 = scalar_lea.vmem %s181_s7, 2048  ;;  %p8481_p11 = scmp.lt.s32.totalorder %s181_s7, %s181_s7 }
  0x6c   :  { %p8477_p10 = scmp.ne.s32.totalorder %s181_s7, %s8476_s15  ;;  %p8482_p12 = scmp.lt.s32.totalorder %s8476_s15, %s8476_s15 }
  0x6e   :  { %p8483_p13 = por %p8482_p12, %p8481_p11 }
  0x70   :  { %p8484_p0 = pnand %p8483_p13, %p8477_p10 }
  0x72   :  { %8487 = shalt.err (!%p8484_p0)
}
  0x73   :  { %186 = dma.hbm_to_vmem [thread:$0]  %s9168_s6, 2048, %s181_s7, [#allocation12], %s9062_s23, %s9062_s23, %s9063_s26  }
  0x74   :  { %s8496_s9 = scalar_lea.vmem %s208_s11, 16  ;;  %s8500_s8 = scalar_lea.vmem %s208_s11, 32 }
  0x75   :  { %p8497_p1 = scmp.ne.s32.totalorder %s208_s11, %s8496_s9  ;;  %p8501_p2 = scmp.lt.s32.totalorder %s208_s11, %s208_s11 }
  0x76   :  { %p8502_p3 = scmp.lt.s32.totalorder %s8500_s8, %s8496_s9 }
  0x78   :  { %p8503_p4 = por %p8502_p3, %p8501_p2 }
  0x7a   :  { %p8504_p5 = pnand %p8503_p4, %p8497_p1 }
  0x7c   :  { %8507 = shalt.err (!%p8504_p5)
}
  0x7d   :  { %210 = dma.hbm_to_vmem [thread:$0]  %s9188_s4, 16, %s208_s11, [#allocation15]  }
  0x7e   :  { %s9066_s16 = smov [#allocation17]   ;;  %s9067_s0 = smov [#allocation20]  }
  0x7f   :  { %s231_s18 = sshll.u32 %s9066_s16, 4  ;;  %s251_s22 = sshll.u32 %s9067_s0, 4  ;;  %s232_s18 = int_to_ptr.vmem [resolvable:$true] %s231_s18  ;;  %s252_s22 = int_to_ptr.vmem [resolvable:$true] %s251_s22 }
  0x80   :  { %s8516_s28 = scalar_lea.vmem %s232_s18, 16  ;;  %s8520_s1 = scalar_lea.vmem %s232_s18, 32 }
  0x81   :  { %p8517_p6 = scmp.ne.s32.totalorder %s232_s18, %s8516_s28  ;;  %p8521_p7 = scmp.lt.s32.totalorder %s232_s18, %s232_s18 }
  0x82   :  { %p8522_p8 = scmp.lt.s32.totalorder %s8520_s1, %s8516_s28 }
  0x84   :  { %p8523_p9 = por %p8522_p8, %p8521_p7 }
  0x86   :  { %p8524_p10 = pnand %p8523_p9, %p8517_p6 }
  0x88   :  { %8527 = shalt.err (!%p8524_p10)
}
  0x89   :  { %234 = dma.hbm_to_vmem [thread:$0]  %s9203_s21, 16, %s232_s18, [#allocation18]  }
  0x8a   :  { %s8536_s6 = scalar_lea.vmem %s252_s22, 16  ;;  %s8540_s2 = scalar_lea.vmem %s252_s22, 32 }
  0x8b   :  { %p8537_p11 = scmp.ne.s32.totalorder %s252_s22, %s8536_s6  ;;  %p8541_p12 = scmp.lt.s32.totalorder %s252_s22, %s252_s22 }
  0x8c   :  { %p8542_p13 = scmp.lt.s32.totalorder %s8540_s2, %s8536_s6 }
  0x8e   :  { %p8543_p0 = por %p8542_p13, %p8541_p12 }
  0x90   :  { %p8544_p1 = pnand %p8543_p0, %p8537_p11 }
  0x92   :  { %8547 = shalt.err (!%p8544_p1)
}
  0x93   :  { %254 = dma.hbm_to_vmem [thread:$0]  %s9213_s19, 16, %s252_s22, [#allocation21]  }
  0x94   :  { %s9068_s4 = smov [#allocation23]   ;;  %s9069_s10 = smov [#allocation26]  }
  0x95   :  { %s271_s7 = sshll.u32 %s9068_s4, 4  ;;  %s295_s11 = sshll.u32 %s9069_s10, 4  ;;  %s272_s7 = int_to_ptr.vmem [resolvable:$true] %s271_s7  ;;  %s296_s11 = int_to_ptr.vmem [resolvable:$true] %s295_s11 }
  0x96   :  { %s8556_s15 = scalar_lea.vmem %s272_s7, 16  ;;  %s8560_s9 = scalar_lea.vmem %s272_s7, 32 }
  0x97   :  { %p8557_p2 = scmp.ne.s32.totalorder %s272_s7, %s8556_s15  ;;  %p8561_p3 = scmp.lt.s32.totalorder %s272_s7, %s272_s7 }
  0x98   :  { %p8562_p4 = scmp.lt.s32.totalorder %s8560_s9, %s8556_s15 }
  0x9a   :  { %p8563_p5 = por %p8562_p4, %p8561_p3 }
  0x9c   :  { %p8564_p6 = pnand %p8563_p5, %p8557_p2 }
  0x9e   :  { %8567 = shalt.err (!%p8564_p6)
}
  0x9f   :  { %274 = dma.hbm_to_vmem [thread:$0]  %s9223_s20, 16, %s272_s7, [#allocation24]  }
  0xa0   :  { %s8576_s21 = scalar_lea.vmem %s296_s11, 16  ;;  %s8580_s8 = scalar_lea.vmem %s296_s11, 32 }
  0xa1   :  { %p8577_p7 = scmp.ne.s32.totalorder %s296_s11, %s8576_s21  ;;  %p8581_p8 = scmp.lt.s32.totalorder %s296_s11, %s296_s11 }
  0xa2   :  { %p8582_p9 = scmp.lt.s32.totalorder %s8580_s8, %s8576_s21 }
  0xa4   :  { %p8583_p10 = por %p8582_p9, %p8581_p8 }
  0xa6   :  { %p8584_p11 = pnand %p8583_p10, %p8577_p7 }
  0xa8   :  { %8587 = shalt.err (!%p8584_p11)
}
  0xa9   :  { %298 = dma.hbm_to_vmem [thread:$0]  %s9238_s24, 16, %s296_s11, [#allocation27]  }
  0xaa   :  { %s9070_s19 = smov [#allocation29]  }
  0xab   :  { %s317_s16 = sshll.u32 %s9070_s19, 4  ;;  %s318_s16 = int_to_ptr.vmem [resolvable:$true] %s317_s16 }
  0xac   :  { %s8596_s18 = scalar_lea.vmem %s318_s16, 16  ;;  %s8600_s0 = scalar_lea.vmem %s318_s16, 32 }
  0xad   :  { %p8597_p12 = scmp.ne.s32.totalorder %s318_s16, %s8596_s18  ;;  %p8601_p13 = scmp.lt.s32.totalorder %s318_s16, %s318_s16 }
  0xae   :  { %p8602_p0 = scmp.lt.s32.totalorder %s8600_s0, %s8596_s18 }
  0xb0   :  { %p8603_p1 = por %p8602_p0, %p8601_p13 }
  0xb2   :  { %p8604_p2 = pnand %p8603_p1, %p8597_p12 }
  0xb4   :  { %8607 = shalt.err (!%p8604_p2)
}
  0xb5   :  { %320 = dma.hbm_to_vmem [thread:$0]  %s9253_s27, 16, %s318_s16, [#allocation30]  }
  0xb6   :  { %s9071_s20 = smov [#allocation32]   ;;  %s9072_s28 = smov [#allocation35]  }
  0xb7   :  { %s336_s22 = sshll.u32 %s9071_s20, 4  ;;  %s361_s1 = sshll.u32 %s9072_s28, 4  ;;  %s337_s22 = int_to_ptr.vmem [resolvable:$true] %s336_s22  ;;  %s362_s1 = int_to_ptr.vmem [resolvable:$true] %s361_s1 }
  0xb8   :  { %s8616_s6 = scalar_lea.vmem %s337_s22, 384  ;;  %p8621_p4 = scmp.lt.s32.totalorder %s337_s22, %s337_s22 }
  0xb9   :  { %p8617_p3 = scmp.ne.s32.totalorder %s337_s22, %s8616_s6  ;;  %p8622_p5 = scmp.lt.s32.totalorder %s8616_s6, %s8616_s6 }
  0xbb   :  { %p8623_p6 = por %p8622_p5, %p8621_p4 }
  0xbd   :  { %p8624_p7 = pnand %p8623_p6, %p8617_p3 }
  0xbf   :  { %8627 = shalt.err (!%p8624_p7)
}
  0xc0   :  { %s9073_s24 = smov 64   ;;  %s9074_s2 = smov 4  }
  0xc1   :  { %342 = dma.hbm_to_vmem [thread:$0]  %s9263_s13, 384, %s337_s22, [#allocation33], %s9073_s24, %s9073_s24, %s9074_s2  }
  0xc2   :  { %s8636_s27 = scalar_lea.vmem %s362_s1, 16  ;;  %s8640_s4 = scalar_lea.vmem %s362_s1, 32 }
  0xc3   :  { %p8637_p8 = scmp.ne.s32.totalorder %s362_s1, %s8636_s27  ;;  %p8641_p9 = scmp.lt.s32.totalorder %s362_s1, %s362_s1 }
  0xc4   :  { %p8642_p10 = scmp.lt.s32.totalorder %s8640_s4, %s8636_s27 }
  0xc6   :  { %p8643_p11 = por %p8642_p10, %p8641_p9 }
  0xc8   :  { %p8644_p12 = pnand %p8643_p11, %p8637_p8 }
  0xca   :  { %8647 = shalt.err (!%p8644_p12)
}
  0xcb   :  { %364 = dma.hbm_to_vmem [thread:$0]  %s9278_s30, 16, %s362_s1, [#allocation36]  }
  0xcc   :  { %s9075_s7 = smov [#allocation38]   ;;  %s9076_s11 = smov [#allocation41]  }
  0xcd   :  { %s381_s10 = sshll.u32 %s9075_s7, 4  ;;  %s400_s15 = sshll.u32 %s9076_s11, 4  ;;  %s382_s10 = int_to_ptr.vmem [resolvable:$true] %s381_s10  ;;  %s401_s15 = int_to_ptr.vmem [resolvable:$true] %s400_s15 }
  0xce   :  { %s8656_s9 = scalar_lea.vmem %s382_s10, 16  ;;  %s8660_s21 = scalar_lea.vmem %s382_s10, 32 }
  0xcf   :  { %p8657_p13 = scmp.ne.s32.totalorder %s382_s10, %s8656_s9  ;;  %p8661_p0 = scmp.lt.s32.totalorder %s382_s10, %s382_s10 }
  0xd0   :  { %p8662_p1 = scmp.lt.s32.totalorder %s8660_s21, %s8656_s9 }
  0xd2   :  { %p8663_p2 = por %p8662_p1, %p8661_p0 }
  0xd4   :  { %p8664_p3 = pnand %p8663_p2, %p8657_p13 }
  0xd6   :  { %8667 = shalt.err (!%p8664_p3)
}
  0xd7   :  { %384 = dma.hbm_to_vmem [thread:$0]  %s9288_s17, 16, %s382_s10, [#allocation39]  }
  0xd8   :  { %s8676_s13 = scalar_lea.vmem %s401_s15, 3072  ;;  %p8681_p5 = scmp.lt.s32.totalorder %s401_s15, %s401_s15 }
  0xd9   :  { %p8677_p4 = scmp.ne.s32.totalorder %s401_s15, %s8676_s13  ;;  %p8682_p6 = scmp.lt.s32.totalorder %s8676_s13, %s8676_s13 }
  0xdb   :  { %p8683_p7 = por %p8682_p6, %p8681_p5 }
  0xdd   :  { %p8684_p8 = pnand %p8683_p7, %p8677_p4 }
  0xdf   :  { %8687 = shalt.err (!%p8684_p8)
}
  0xe0   :  { %406 = dma.hbm_to_vmem [thread:$0]  %s9298_s12, 3072, %s401_s15, [#allocation42], %s9073_s24, %s9073_s24, %s9074_s2  }
  0xe1   :  { %s9077_s30 = smov [#allocation2]   ;;  %s9078_s19 = smov [#allocation7]  }
  0xe2   :  { %s110_s8 = sshll.u32 %s9077_s30, 4  ;;  %s145_s16 = sshll.u32 %s9078_s19, 4  ;;  %s111_s8 = int_to_ptr.vmem [resolvable:$true] %s110_s8  ;;  %s146_s16 = int_to_ptr.vmem [resolvable:$true] %s145_s16 }
  0xe3   :  { %s8696_s18 = scalar_lea.vmem %s111_s8, 2048  ;;  %p8701_p10 = scmp.lt.s32.totalorder %s111_s8, %s111_s8 }
  0xe4   :  { %p8697_p9 = scmp.ne.s32.totalorder %s111_s8, %s8696_s18  ;;  %p8702_p11 = scmp.lt.s32.totalorder %s8696_s18, %s8696_s18 }
  0xe6   :  { %p8703_p12 = por %p8702_p11, %p8701_p10 }
  0xe8   :  { %p8704_p13 = pnand %p8703_p12, %p8697_p9 }
  0xea   :  { %8707 = shalt.err (!%p8704_p13)
}
  0xeb   :  { %116 = dma.hbm_to_vmem [thread:$0]  %s9103_s5, 2048, %s111_s8, [#allocation3], %s9062_s23, %s9062_s23, %s9063_s26  }
  0xec   :  { %s8716_s17 = scalar_lea.vmem %s146_s16, 16  ;;  %s8720_s12 = scalar_lea.vmem %s146_s16, 32 }
  0xed   :  { %p8717_p0 = scmp.ne.s32.totalorder %s146_s16, %s8716_s17  ;;  %p8721_p1 = scmp.lt.s32.totalorder %s146_s16, %s146_s16 }
  0xee   :  { %p8722_p2 = scmp.lt.s32.totalorder %s8720_s12, %s8716_s17 }
  0xf0   :  { %p8723_p3 = por %p8722_p2, %p8721_p1 }
  0xf2   :  { %p8724_p4 = pnand %p8723_p3, %p8717_p0 }
  0xf4   :  { %8727 = shalt.err (!%p8724_p4)
}
  0xf5   :  { %148 = dma.hbm_to_vmem [thread:$0]  %s9138_s3, 16, %s146_s16, [#allocation6]  }
  0xf6   :  { %s9079_s0 = smov [#allocation10]   ;;  %s9080_s22 = smov [#allocation13]  }
  0xf7   :  { %s165_s20 = sshll.u32 %s9079_s0, 4  ;;  %s193_s28 = sshll.u32 %s9080_s22, 4  ;;  %s166_s20 = int_to_ptr.vmem [resolvable:$true] %s165_s20  ;;  %s194_s28 = int_to_ptr.vmem [resolvable:$true] %s193_s28 }
  0xf8   :  { %s8736_s1 = scalar_lea.vmem %s166_s20, 16  ;;  %s8740_s6 = scalar_lea.vmem %s166_s20, 32 }
  0xf9   :  { %p8737_p5 = scmp.ne.s32.totalorder %s166_s20, %s8736_s1  ;;  %p8741_p6 = scmp.lt.s32.totalorder %s166_s20, %s166_s20 }
  0xfa   :  { %p8742_p7 = scmp.lt.s32.totalorder %s8740_s6, %s8736_s1 }
  0xfc   :  { %p8743_p8 = por %p8742_p7, %p8741_p6 }
  0xfe   :  { %p8744_p9 = pnand %p8743_p8, %p8737_p5 }
 0x100   :  { %8747 = shalt.err (!%p8744_p9)
}
 0x101   :  { %s10451_s5 = sld [smem:[#allocation65_spill]]  ;;  %s8756_s27 = scalar_lea.vmem %s194_s28, 16 }
 0x102   :  { %p8757_p10 = scmp.ne.s32.totalorder %s194_s28, %s8756_s27  ;;  %s8760_s4 = scalar_lea.vmem %s194_s28, 32 }
 0x103   :  { %p8761_p11 = scmp.lt.s32.totalorder %s194_s28, %s194_s28  ;;  %p8762_p12 = scmp.lt.s32.totalorder %s8760_s4, %s8756_s27 }
 0x105   :  { %p8763_p13 = por %p8762_p12, %p8761_p11 }
 0x107   :  { %168 = dma.hbm_to_vmem [thread:$0]  %s10451_s5, 16, %s166_s20, [#allocation9]  }
 0x108   :  { %p8764_p0 = pnand %p8763_p13, %p8757_p10 }
 0x10a   :  { %8767 = shalt.err (!%p8764_p0)
}
 0x10b   :  { %s10452_s3 = sld [smem:[#allocation69_spill]]  ;;  %s9081_s7 = smov [#allocation16]  }
 0x10c   :  { %s216_s10 = sshll.u32 %s9081_s7, 4  ;;  %s9082_s11 = smov [#allocation19]   ;;  %s217_s10 = int_to_ptr.vmem [resolvable:$true] %s216_s10 }
 0x10d   :  { %s241_s15 = sshll.u32 %s9082_s11, 4  ;;  %s8776_s9 = scalar_lea.vmem %s217_s10, 3072  ;;  %s242_s15 = int_to_ptr.vmem [resolvable:$true] %s241_s15 }
 0x10e   :  { %p8777_p1 = scmp.ne.s32.totalorder %s217_s10, %s8776_s9  ;;  %p8781_p2 = scmp.lt.s32.totalorder %s217_s10, %s217_s10 }
 0x10f   :  { %p8782_p3 = scmp.lt.s32.totalorder %s8776_s9, %s8776_s9 }
 0x111   :  { %196 = dma.hbm_to_vmem [thread:$0]  %s10452_s3, 16, %s194_s28, [#allocation12]  }
 0x112   :  { %p8783_p4 = por %p8782_p3, %p8781_p2 }
 0x114   :  { %p8784_p5 = pnand %p8783_p4, %p8777_p1 }
 0x116   :  { %8787 = shalt.err (!%p8784_p5)
}
 0x117   :  { %s10453_s21 = sld [smem:[#allocation72_spill]]  ;;  %s8796_s13 = scalar_lea.vmem %s242_s15, 16 }
 0x118   :  { %p8797_p6 = scmp.ne.s32.totalorder %s242_s15, %s8796_s13  ;;  %s8800_s30 = scalar_lea.vmem %s242_s15, 32 }
 0x119   :  { %p8801_p7 = scmp.lt.s32.totalorder %s242_s15, %s242_s15  ;;  %p8802_p8 = scmp.lt.s32.totalorder %s8800_s30, %s8796_s13 }
 0x11b   :  { %p8803_p9 = por %p8802_p8, %p8801_p7 }
 0x11d   :  { %222 = dma.hbm_to_vmem [thread:$0]  %s10453_s21, 3072, %s217_s10, [#allocation15], %s9073_s24, %s9073_s24, %s9074_s2  }
 0x11e   :  { %p8804_p10 = pnand %p8803_p9, %p8797_p6 }
 0x120   :  { %8807 = shalt.err (!%p8804_p10)
}
 0x121   :  { %s10454_s8 = sld [smem:[#allocation74_spill]]  ;;  %s9083_s19 = smov [#allocation22]  }
 0x122   :  { %s261_s16 = sshll.u32 %s9083_s19, 4  ;;  %s9084_s18 = smov [#allocation25]   ;;  %s262_s16 = int_to_ptr.vmem [resolvable:$true] %s261_s16 }
 0x123   :  { %s282_s17 = sshll.u32 %s9084_s18, 4  ;;  %s8816_s12 = scalar_lea.vmem %s262_s16, 16  ;;  %s283_s17 = int_to_ptr.vmem [resolvable:$true] %s282_s17 }
 0x124   :  { %p8817_p11 = scmp.ne.s32.totalorder %s262_s16, %s8816_s12  ;;  %s8820_s0 = scalar_lea.vmem %s262_s16, 32 }
 0x125   :  { %p8821_p12 = scmp.lt.s32.totalorder %s262_s16, %s262_s16  ;;  %p8822_p13 = scmp.lt.s32.totalorder %s8820_s0, %s8816_s12 }
 0x127   :  { %244 = dma.hbm_to_vmem [thread:$0]  %s10454_s8, 16, %s242_s15, [#allocation18]  }
 0x128   :  { %p8823_p0 = por %p8822_p13, %p8821_p12 }
 0x12a   :  { %p8824_p1 = pnand %p8823_p0, %p8817_p11 }
 0x12c   :  { %8827 = shalt.err (!%p8824_p1)
}
 0x12d   :  { %s10455_s20 = sld [smem:[#allocation75_spill]]  ;;  %s8836_s22 = scalar_lea.vmem %s283_s17, 3072 }
 0x12e   :  { %p8837_p2 = scmp.ne.s32.totalorder %s283_s17, %s8836_s22  ;;  %p8841_p3 = scmp.lt.s32.totalorder %s283_s17, %s283_s17 }
 0x12f   :  { %p8842_p4 = scmp.lt.s32.totalorder %s8836_s22, %s8836_s22 }
 0x131   :  { %p8843_p5 = por %p8842_p4, %p8841_p3 }
 0x133   :  { %264 = dma.hbm_to_vmem [thread:$0]  %s10455_s20, 16, %s262_s16, [#allocation21]  }
 0x134   :  { %p8844_p6 = pnand %p8843_p5, %p8837_p2 }
 0x136   :  { %8847 = shalt.err (!%p8844_p6)
}
 0x137   :  { %s10456_s28 = sld [smem:[#allocation77_spill]]  ;;  %s9085_s1 = smov [#allocation28]  }
 0x138   :  { %s307_s6 = sshll.u32 %s9085_s1, 4  ;;  %s9086_s5 = smov [#allocation31]   ;;  %s308_s6 = int_to_ptr.vmem [resolvable:$true] %s307_s6 }
 0x139   :  { %s327_s27 = sshll.u32 %s9086_s5, 4  ;;  %s8856_s4 = scalar_lea.vmem %s308_s6, 16  ;;  %s328_s27 = int_to_ptr.vmem [resolvable:$true] %s327_s27 }
 0x13a   :  { %p8857_p7 = scmp.ne.s32.totalorder %s308_s6, %s8856_s4  ;;  %s8860_s3 = scalar_lea.vmem %s308_s6, 32 }
 0x13b   :  { %p8861_p8 = scmp.lt.s32.totalorder %s308_s6, %s308_s6  ;;  %p8862_p9 = scmp.lt.s32.totalorder %s8860_s3, %s8856_s4 }
 0x13d   :  { %288 = dma.hbm_to_vmem [thread:$0]  %s10456_s28, 3072, %s283_s17, [#allocation24], %s9073_s24, %s9073_s24, %s9074_s2  }
 0x13e   :  { %p8863_p10 = por %p8862_p9, %p8861_p8 }
 0x140   :  { %p8864_p11 = pnand %p8863_p10, %p8857_p7 }
 0x142   :  { %8867 = shalt.err (!%p8864_p11)
}
 0x143   :  { %s10457_s7 = sld [smem:[#allocation79_spill]]  ;;  %s8876_s10 = scalar_lea.vmem %s328_s27, 16 }
 0x144   :  { %p8877_p12 = scmp.ne.s32.totalorder %s328_s27, %s8876_s10  ;;  %s8880_s11 = scalar_lea.vmem %s328_s27, 32 }
 0x145   :  { %p8881_p13 = scmp.lt.s32.totalorder %s328_s27, %s328_s27  ;;  %p8882_p0 = scmp.lt.s32.totalorder %s8880_s11, %s8876_s10 }
 0x147   :  { %p8883_p1 = por %p8882_p0, %p8881_p13 }
 0x149   :  { %310 = dma.hbm_to_vmem [thread:$0]  %s10457_s7, 16, %s308_s6, [#allocation27]  }
 0x14a   :  { %p8884_p2 = pnand %p8883_p1, %p8877_p12 }
 0x14c   :  { %8887 = shalt.err (!%p8884_p2)
}
 0x14d   :  { %s10458_s15 = sld [smem:[#allocation80_spill]]  ;;  %s9087_s9 = smov [#allocation34]  }
 0x14e   :  { %s351_s21 = sshll.u32 %s9087_s9, 4  ;;  %s9088_s13 = smov [#allocation37]   ;;  %s352_s21 = int_to_ptr.vmem [resolvable:$true] %s351_s21 }
 0x14f   :  { %s371_s30 = sshll.u32 %s9088_s13, 4  ;;  %s8896_s8 = scalar_lea.vmem %s352_s21, 16  ;;  %s372_s30 = int_to_ptr.vmem [resolvable:$true] %s371_s30 }
 0x150   :  { %p8897_p3 = scmp.ne.s32.totalorder %s352_s21, %s8896_s8  ;;  %s8900_s19 = scalar_lea.vmem %s352_s21, 32 }
 0x151   :  { %p8901_p4 = scmp.lt.s32.totalorder %s352_s21, %s352_s21  ;;  %p8902_p5 = scmp.lt.s32.totalorder %s8900_s19, %s8896_s8 }
 0x153   :  { %330 = dma.hbm_to_vmem [thread:$0]  %s10458_s15, 16, %s328_s27, [#allocation30]  }
 0x154   :  { %p8903_p6 = por %p8902_p5, %p8901_p4 }
 0x156   :  { %p8904_p7 = pnand %p8903_p6, %p8897_p3 }
 0x158   :  { %8907 = shalt.err (!%p8904_p7)
}
 0x159   :  { %s10459_s16 = sld [smem:[#allocation82_spill]]  ;;  %s8916_s18 = scalar_lea.vmem %s372_s30, 16 }
 0x15a   :  { %p8917_p8 = scmp.ne.s32.totalorder %s372_s30, %s8916_s18  ;;  %s8920_s17 = scalar_lea.vmem %s372_s30, 32 }
 0x15b   :  { %p8921_p9 = scmp.lt.s32.totalorder %s372_s30, %s372_s30  ;;  %p8922_p10 = scmp.lt.s32.totalorder %s8920_s17, %s8916_s18 }
 0x15d   :  { %p8923_p11 = por %p8922_p10, %p8921_p9 }
 0x15f   :  { %354 = dma.hbm_to_vmem [thread:$0]  %s10459_s16, 16, %s352_s21, [#allocation33]  }
 0x160   :  { %p8924_p12 = pnand %p8923_p11, %p8917_p8 }
 0x162   :  { %8927 = shalt.err (!%p8924_p12)
}
 0x163   :  { %s10460_s12 = sld [smem:[#allocation83_spill]]  ;;  %s9089_s0 = smov [#allocation40]  }
 0x164   :  { %s391_s20 = sshll.u32 %s9089_s0, 4  ;;  %s9090_s22 = smov [#allocation43]   ;;  %s392_s20 = int_to_ptr.vmem [resolvable:$true] %s391_s20 }
 0x165   :  { %s412_s28 = sshll.u32 %s9090_s22, 4  ;;  %s8936_s1 = scalar_lea.vmem %s392_s20, 16  ;;  %s413_s28 = int_to_ptr.vmem [resolvable:$true] %s412_s28 }
 0x166   :  { %p8937_p13 = scmp.ne.s32.totalorder %s392_s20, %s8936_s1  ;;  %s8940_s6 = scalar_lea.vmem %s392_s20, 32 }
 0x167   :  { %p8941_p0 = scmp.lt.s32.totalorder %s392_s20, %s392_s20  ;;  %p8942_p1 = scmp.lt.s32.totalorder %s8940_s6, %s8936_s1 }
 0x169   :  { %374 = dma.hbm_to_vmem [thread:$0]  %s10460_s12, 16, %s372_s30, [#allocation36]  }
 0x16a   :  { %p8943_p2 = por %p8942_p1, %p8941_p0 }
 0x16c   :  { %p8944_p3 = pnand %p8943_p2, %p8937_p13 }
 0x16e   :  { %8947 = shalt.err (!%p8944_p3)
}
 0x16f   :  { %s10461_s5 = sld [smem:[#allocation84_spill]]  ;;  %s8956_s27 = scalar_lea.vmem %s413_s28, 3072 }
 0x170   :  { %p8957_p4 = scmp.ne.s32.totalorder %s413_s28, %s8956_s27  ;;  %p8961_p5 = scmp.lt.s32.totalorder %s413_s28, %s413_s28 }
 0x171   :  { %p8962_p6 = scmp.lt.s32.totalorder %s8956_s27, %s8956_s27 }
 0x173   :  { %p8963_p7 = por %p8962_p6, %p8961_p5 }
 0x175   :  { %394 = dma.hbm_to_vmem [thread:$0]  %s10461_s5, 16, %s392_s20, [#allocation39]  }
 0x176   :  { %p8964_p8 = pnand %p8963_p7, %p8957_p4 }
 0x178   :  { %8967 = shalt.err (!%p8964_p8)
}
 0x179   :  { %418 = dma.hbm_to_vmem [thread:$0]  %s9303_s25, 3072, %s413_s28, [#allocation42], %s9073_s24, %s9073_s24, %s9074_s2  }
 0x17a   :  { %8988 = dma.done.wait [#allocation3], 2048  }
 0x17b   :  { %8989 = vsyncadd [#allocation3], 4294965248 }
 0x17c   :  { %8990 = dma.done.wait [#allocation6], 2064  }
 0x17d   :  { %8991 = vsyncadd [#allocation6], 4294965232 }
 0x17e   :  { %8992 = dma.done.wait [#allocation9], 32  }
 0x17f   :  { %8993 = vsyncadd [#allocation9], 4294967264 }
 0x180   :  { %8994 = dma.done.wait [#allocation12], 2064  }
 0x181   :  { %8995 = vsyncadd [#allocation12], 4294965232 }
 0x182   :  { %8996 = dma.done.wait [#allocation15], 3088  }
 0x183   :  { %8997 = vsyncadd [#allocation15], 4294964208 }
 0x184   :  { %8998 = dma.done.wait [#allocation18], 32  }
 0x185   :  { %8999 = vsyncadd [#allocation18], 4294967264 }
 0x186   :  { %9000 = dma.done.wait [#allocation21], 32  }
 0x187   :  { %9001 = vsyncadd [#allocation21], 4294967264 }
 0x188   :  { %9002 = dma.done.wait [#allocation24], 3088  }
 0x189   :  { %9003 = vsyncadd [#allocation24], 4294964208 }
 0x18a   :  { %9004 = dma.done.wait [#allocation27], 32  }
 0x18b   :  { %9005 = vsyncadd [#allocation27], 4294967264 }
 0x18c   :  { %9006 = dma.done.wait [#allocation30], 32  }
 0x18d   :  { %9007 = vsyncadd [#allocation30], 4294967264 }
 0x18e   :  { %9008 = dma.done.wait [#allocation33], 400  }
 0x18f   :  { %9009 = vsyncadd [#allocation33], 4294966896 }
 0x190   :  { %9010 = dma.done.wait [#allocation36], 32  }
 0x191   :  { %9011 = vsyncadd [#allocation36], 4294967264 }
 0x192   :  { %9012 = dma.done.wait [#allocation39], 32  }
 0x193   :  { %9013 = vsyncadd [#allocation39], 4294967264 }
 0x194   :  { %9014 = dma.done.wait [#allocation42], 6144  }
 0x195   :  { %9015 = vsyncadd [#allocation42], 4294961152  ;;  %s10462_s25 = sld [smem:[#allocation60_spill]]  ;;  %v549_v0 = vld [vmem:[%s9308_s14 + $0x10] sm:$0xff]  ;;  %v550_v1 = vld [vmem:[%s9308_s14 + $0x18] sm:$0xff]  ;;  %vm580_vm0 = vcmask 261120  }
 0x196   :  { %v547_v2 = vld [vmem:[%s9308_s14] sm:$0xff]  ;;  %v559_v3 = vpack.c.bf16 %v550_v1, %v549_v0  ;;  %v548_v4 = vld [vmem:[%s9308_s14 + $0x8] sm:$0xff]  ;;  %vm668_vm1 = vcmask 130048   ;;  %v9091_v25 = vmov 0.0   ;;  %v9385_v26 = vld [vmem:[#allocation2 + $0x78] sm:$0xff]  ;;  %vm9092_vm2 = vmmov 0  }
 0x197   :  { %v558_v5 = vpack.c.bf16 %v548_v4, %v547_v2  ;;  %v8016_v9 = vld [vmem:[#allocation32 + $0x8] sm:$0xff]   ;;  %v8017_v11 = vld [vmem:[#allocation32] sm:$0xff]   ;;  %v8018_v12 = vld [vmem:[#allocation32 + $0x10] sm:$0xff]   ;;  %s10463_s14 = sld [smem:[#allocation76_spill]]  ;;  %s9094_s8 = smov [#allocation44]  }
 0x198   :  { %7167 = vmatprep.subr.bf16.mxu0 %v559_v3  ;;  %7179 = vmatprep.subr.bf16.mxu1 %v8016_v9  ;;  %v9391_v27 = vld [vmem:[#allocation2 + $0x70] sm:$0xff]  ;;  %v9397_v28 = vld [vmem:[#allocation2 + $0x68] sm:$0xff]  ;;  %v9403_v29 = vld [vmem:[#allocation2 + $0x60] sm:$0xff]  ;;  %s10464_s24 = sld [smem:[#allocation73_spill]]  ;;  %s6095_s19 = sshll.u32 %s9094_s8, 4  ;;  %s6096_s19 = int_to_ptr.vmem [resolvable:$true] %s6095_s19 }
 0x199   :  { %7168 = vmatpush3.bf16.msra.mxu0 %v559_v3  ;;  %7181 = vmatprep.mubr.msk.bf16.mxu1 %vm668_vm1, %v558_v5  ;;  %v9409_v30 = vld [vmem:[#allocation2 + $0x58] sm:$0xff]  ;;  %v9415_v31 = vld [vmem:[#allocation2 + $0x50] sm:$0xff]  ;;  %v9421_v32 = vld [vmem:[#allocation2 + $0x48] sm:$0xff]  ;;  %s10465_s2 = sld [smem:[#allocation71_spill]]  ;;  %s8968_s16 = scalar_lea.vmem %s6096_s19, 512 }
 0x19a   :  { %7169 = vmatprep.subr.bf16.mxu0 %v558_v5  ;;  %7180 = vmatpush3.bf16.msra.mxu1 %v8016_v9  ;;  %v9427_v33 = vld [vmem:[#allocation2 + $0x40] sm:$0xff]  ;;  %v9433_v34 = vld [vmem:[#allocation2 + $0x38] sm:$0xff]  ;;  %v9439_v35 = vld [vmem:[#allocation2 + $0x30] sm:$0xff]  ;;  %s10466_s4 = sld [smem:[#allocation61_spill]]  ;;  %p8969_p9 = scmp.ne.s32.totalorder %s6096_s19, %s8968_s16 }
 0x19b   :  { %v8012_v6 = vld [vmem:[%s10462_s25] sm:$0xff]   ;;  %v8013_v7 = vld [vmem:[%s10462_s25 + $0x8] sm:$0xff]   ;;  %v8014_v8 = vld [vmem:[%s10462_s25 + $0x10] sm:$0xff]   ;;  %7185 = vmatprep.subr.bf16.mxu1 %v8017_v11  ;;  %s10467_s3 = sld [smem:[#allocation81_spill]]  ;;  %p8973_p10 = scmp.lt.s32.totalorder %s6096_s19, %s6096_s19 }
 0x19c   :  { %7171 = vmatprep.mubr.msk.bf16.mxu0 %vm580_vm0, %v8012_v6  ;;  %v8015_v10 = vld [vmem:[%s10462_s25 + $0x18] sm:$0xff]   ;;  %v9445_v36 = vld [vmem:[#allocation2 + $0x28] sm:$0xff]  ;;  %v9451_v37 = vld [vmem:[#allocation2 + $0x20] sm:$0xff]  ;;  %s10468_s7 = sld [smem:[#allocation70_spill]]  ;;  %p8974_p11 = scmp.lt.s32.totalorder %s8968_s16, %s8968_s16 }
 0x19d   :  { %7170 = vmatpush3.bf16.msra.mxu0 %v558_v5  ;;  %7182 = vmatmul.mubr.msk.bf16.vlgmr.msra.gmra.mxu1 %vm668_vm1, %v559_v3  ;;  %v9457_v38 = vld [vmem:[#allocation2 + $0x18] sm:$0xff]  ;;  %v9460_v39 = vld [vmem:[#allocation2 + $0x10] sm:$0xff]  ;;  %v9466_v40 = vld [vmem:[#allocation2 + $0x8] sm:$0xff]  ;;  %s10469_s10 = sld [smem:[#allocation68_spill]] }
 0x19e   :  { %7186 = vmatpush3.bf16.msra.mxu1 %v8017_v11  ;;  %7197 = vmatprep.subr.mxu0 %v9091_v25  ;;  %v9472_v41 = vld [vmem:[#allocation2] sm:$0xff]  ;;  %v6179_v59 = vld [vmem:[#allocation28] ss:$0 sm:$0xff]  ;;  %s10470_s11 = sld [smem:[#allocation66_spill]]  ;;  %p8975_p12 = por %p8974_p11, %p8973_p10 }
 0x19f   :  { %7191 = vmatprep.subr.bf16.mxu1 %v8018_v12  ;;  %s10471_s15 = sld [smem:[#allocation64_spill]] }
 0x1a0   :  { %7172 = vmatmul.mubr.msk.bf16.vlgmr.msra.gmra.mxu0 %vm580_vm0, %v8013_v7  ;;  %s10472_s9 = sld [smem:[#allocation62_spill]]  ;;  %p8976_p13 = pnand %p8975_p12, %p8969_p9 }
 0x1a1   :  { %7175 = vmatprep.mubr.msk.bf16.mxu0 %vm580_vm0, %v8014_v8  ;;  %7198 = vmatpush3.msra.mxu0 %v9385_v26  ;;  %s10473_s21 = sld [smem:[#allocation67_spill]] }
 0x1a2   :  { %7199 = vmatprep.subr.mxu0 %v9091_v25  ;;  %s10474_s13 = sld [smem:[#allocation78_spill]] }
 0x1a3   :  { %7200 = vmatpush3.msra.mxu0 %v9391_v27  ;;  %s10475_s30 = sld [smem:[#allocation63_spill]] }
 0x1a4   :  { %7201 = vmatprep.subr.mxu0 %v9091_v25 }
 0x1a5   :  { %7202 = vmatpush3.msra.mxu0 %v9397_v28 }
 0x1a6   :  { %7203 = vmatprep.subr.mxu0 %v9091_v25 }
 0x1a7   :  { %7204 = vmatpush3.msra.mxu0 %v9403_v29 }
 0x1a8   :  { %7176 = vmatmul.mubr.msk.bf16.gmra.mxu0 %vm580_vm0, %v8015_v10  ;;  %7205 = vmatprep.subr.mxu0 %v9091_v25 }
 0x1a9   :  { %7206 = vmatpush3.msra.mxu0 %v9409_v30  ;;  %7229 = vmatprep.mubr.msk.f32.mxu0 %vm9092_vm2, %v9091_v25 }
 0x1aa   :  { %7207 = vmatprep.subr.mxu0 %v9091_v25 }
 0x1ab   :  { %7208 = vmatpush3.msra.mxu0 %v9415_v31 }
 0x1ac   :  { %7209 = vmatprep.subr.mxu0 %v9091_v25 }
 0x1ad   :  { %7210 = vmatpush3.msra.mxu0 %v9421_v32 }
 0x1ae   :  { %7211 = vmatprep.subr.mxu0 %v9091_v25 }
 0x1af   :  { %7212 = vmatpush3.msra.mxu0 %v9427_v33 }
 0x1b0   :  { %7213 = vmatprep.subr.mxu0 %v9091_v25 }
 0x1b1   :  { %7214 = vmatpush3.msra.mxu0 %v9433_v34 }
 0x1b2   :  { %7215 = vmatprep.subr.mxu0 %v9091_v25 }
 0x1b3   :  { %7216 = vmatpush3.msra.mxu0 %v9439_v35 }
 0x1b4   :  { %7217 = vmatprep.subr.mxu0 %v9091_v25 }
 0x1b5   :  { %7218 = vmatpush3.msra.mxu0 %v9445_v36 }
 0x1b6   :  { %7219 = vmatprep.subr.mxu0 %v9091_v25 }
 0x1b7   :  { %7220 = vmatpush3.msra.mxu0 %v9451_v37 }
 0x1b8   :  { %7221 = vmatprep.subr.mxu0 %v9091_v25 }
 0x1b9   :  { %7222 = vmatpush3.msra.mxu0 %v9457_v38 }
 0x1ba   :  { %7223 = vmatprep.subr.mxu0 %v9091_v25 }
 0x1bb   :  { %7224 = vmatpush3.msra.mxu0 %v9460_v39 }
 0x1bc   :  { %7225 = vmatprep.subr.mxu0 %v9091_v25 }
 0x1bd   :  { %7226 = vmatpush3.msra.mxu0 %v9466_v40 }
 0x1be   :  { %7227 = vmatprep.subr.mxu0 %v9091_v25 }
 0x1bf   :  { %7228 = vmatpush3.msra.mxu0 %v9472_v41 }
 0x1c0   :  { %7267 = vmatprep.subr.mxu0 %v9091_v25 }
 0x25d   :  { %v7183_v42 = vpop.f32.mrf.mxu1 }
 0x25f   :  { %v709_v43 = vpop.f32.mrf.mxu1 }
 0x260   :  { %v7173_v13 = vpop.f32.mrf.mxu0 }
 0x261   :  { %v7184_v44 = vpop.f32.mrf.mxu1 }
 0x262   :  { %v627_v14 = vpop.f32.mrf.mxu0 }
 0x263   :  { %v712_v45 = vpop.f32.mrf.mxu1 }
 0x264   :  { %v7174_v15 = vpop.f32.mrf.mxu0 }
 0x265   :  { %v659_v18 = vpack.c.bf16 %v7174_v15, %v7173_v13 }
 0x266   :  { %v630_v16 = vpop.f32.mrf.mxu0 }
 0x267   :  { %v658_v17 = vpack.c.bf16 %v630_v16, %v627_v14 }
 0x268   :  { %v7177_v19 = vpop.f32.mrf.mxu0 }
 0x269   :  { %7187 = vmatprep.mubr.msk.bf16.mxu1 %vm668_vm1, %v658_v17 }
 0x26a   :  { %v643_v20 = vpop.f32.mrf.mxu0  ;;  %7188 = vmatmul.mubr.msk.bf16.vlgmr.msra.gmra.mxu1 %vm668_vm1, %v659_v18 }
 0x26b   :  { %7192 = vmatpush3.bf16.msra.mxu1 %v8018_v12 }
 0x26c   :  { %v7178_v21 = vpop.f32.mrf.mxu0  ;;  %7232 = vmatprep.subr.mxu1 %v9091_v25 }
 0x26d   :  { %v661_v24 = vpack.c.bf16 %v7178_v21, %v7177_v19 }
 0x26e   :  { %v646_v22 = vpop.f32.mrf.mxu0 }
 0x26f   :  { %v660_v23 = vpack.c.bf16 %v646_v22, %v643_v20 }
 0x271   :  { %7193 = vmatprep.mubr.msk.bf16.mxu1 %vm668_vm1, %v660_v23 }
 0x272   :  { %7194 = vmatmul.mubr.msk.bf16.vlgmr.msra.gmra.mxu1 %vm668_vm1, %v661_v24 }
 0x273   :  { %7233 = vmatpush3.msra.mxu1 %v9385_v26  ;;  %7264 = vmatprep.mubr.msk.f32.mxu1 %vm9092_vm2, %v9091_v25 }
 0x274   :  { %7234 = vmatprep.subr.mxu1 %v9091_v25 }
 0x275   :  { %7235 = vmatpush3.msra.mxu1 %v9391_v27 }
 0x276   :  { %7236 = vmatprep.subr.mxu1 %v9091_v25 }
 0x277   :  { %7237 = vmatpush3.msra.mxu1 %v9397_v28 }
 0x278   :  { %7238 = vmatprep.subr.mxu1 %v9091_v25 }
 0x279   :  { %7239 = vmatpush3.msra.mxu1 %v9403_v29 }
 0x27a   :  { %7240 = vmatprep.subr.mxu1 %v9091_v25 }
 0x27b   :  { %7241 = vmatpush3.msra.mxu1 %v9409_v30 }
 0x27c   :  { %7242 = vmatprep.subr.mxu1 %v9091_v25 }
 0x27d   :  { %7243 = vmatpush3.msra.mxu1 %v9415_v31 }
 0x27e   :  { %7244 = vmatprep.subr.mxu1 %v9091_v25 }
 0x27f   :  { %7245 = vmatpush3.msra.mxu1 %v9421_v32 }
 0x280   :  { %7246 = vmatprep.subr.mxu1 %v9091_v25 }
 0x281   :  { %7247 = vmatpush3.msra.mxu1 %v9427_v33 }
 0x282   :  { %7248 = vmatprep.subr.mxu1 %v9091_v25 }
 0x283   :  { %7249 = vmatpush3.msra.mxu1 %v9433_v34 }
 0x284   :  { %7250 = vmatprep.subr.mxu1 %v9091_v25 }
 0x285   :  { %7251 = vmatpush3.msra.mxu1 %v9439_v35 }
 0x286   :  { %7252 = vmatprep.subr.mxu1 %v9091_v25 }
 0x287   :  { %7253 = vmatpush3.msra.mxu1 %v9445_v36 }
 0x288   :  { %7254 = vmatprep.subr.mxu1 %v9091_v25 }
 0x289   :  { %7255 = vmatpush3.msra.mxu1 %v9451_v37 }
 0x28a   :  { %7256 = vmatprep.subr.mxu1 %v9091_v25 }
 0x28b   :  { %7257 = vmatpush3.msra.mxu1 %v9457_v38 }
 0x28c   :  { %7258 = vmatprep.subr.mxu1 %v9091_v25 }
 0x28d   :  { %7259 = vmatpush3.msra.mxu1 %v9460_v39 }
 0x28e   :  { %7260 = vmatprep.subr.mxu1 %v9091_v25 }
 0x28f   :  { %7261 = vmatpush3.msra.mxu1 %v9466_v40 }
 0x290   :  { %7262 = vmatprep.subr.mxu1 %v9091_v25 }
 0x291   :  { %7263 = vmatpush3.msra.mxu1 %v9472_v41 }
 0x292   :  { %7302 = vmatprep.subr.mxu1 %v9091_v25 }
 0x32a   :  { %v7189_v46 = vpop.f32.mrf.mxu1 }
 0x32b   :  { %v779_v53 = vadd.f32 %v7189_v46, %v7183_v42 }
 0x32c   :  { %v770_v47 = vpop.f32.mrf.mxu1 }
 0x32d   :  { %v771_v51 = vadd.f32 %v770_v47, %v709_v43 }
 0x32e   :  { %v7190_v48 = vpop.f32.mrf.mxu1 }
 0x32f   :  { %v782_v56 = vadd.f32 %v7190_v48, %v7184_v44 }
 0x330   :  { %v773_v49 = vpop.f32.mrf.mxu1 }
 0x331   :  { %v774_v57 = vadd.f32 %v773_v49, %v712_v45 }
 0x332   :  { %v7195_v50 = vpop.f32.mrf.mxu1 }
 0x333   :  { %v848_v58 = vadd.f32 %v7195_v50, %v779_v53  ;;  %v1031_v50 = vlaneseq }
 0x334   :  { %v831_v52 = vpop.f32.mrf.mxu1 }
 0x335   :  { %v846_v54 = vadd.f32 %v831_v52, %v771_v51  ;;  %v9488_v0 = vadd.f32 %v6179_v59, %v848_v58  ;;  %v1032_v51 = vshrl.u32 %v1031_v50, 7  ;;  %v860_v52 = vld [vmem:[#allocation31] sm:$0x1] }
 0x336   :  { %v7196_v55 = vpop.f32.mrf.mxu1 }
 0x337   :  { %v9486_v61 = vadd.f32 %v6179_v59, %v846_v54  ;;  %v849_v62 = vadd.f32 %v7196_v55, %v782_v56  ;;  %v873_v6 = vmul.f32 %v9488_v0, %v9488_v0  ;;  %v9572_v53 = vsub.s32 0, %v1032_v51  ;;  %v861_v56 = vld [vmem:[#allocation29] sm:$0x1] }
 0x338   :  { %v834_v60 = vpop.f32.mrf.mxu1 }
 0x339   :  { %v847_v63 = vadd.f32 %v834_v60, %v774_v57  ;;  %v871_v2 = vmul.f32 %v9486_v61, %v9486_v61  ;;  %v9494_v3 = vadd.f32 %v6179_v59, %v849_v62 }
 0x33b   :  { %v9490_v1 = vadd.f32 %v6179_v59, %v847_v63  ;;  %v874_v9 = vmul.f32 %v9494_v3, %v9494_v3 }
 0x33d   :  { %v862_v4 = vadd.f32 %v9490_v1, %v9486_v61  ;;  %v872_v5 = vmul.f32 %v9490_v1, %v9490_v1 }
 0x33f   :  { %v863_v7 = vadd.f32 %v862_v4, %v9488_v0  ;;  %v875_v8 = vadd.f32 %v872_v5, %v871_v2 }
 0x341   :  { %v864_v10 = vadd.f32 %v863_v7, %v9494_v3  ;;  %v876_v11 = vadd.f32 %v875_v8, %v873_v6 }
 0x343   :  { %v865_v12 = vrot.slane %v864_v10, 4  ;;  %v877_v13 = vadd.f32 %v876_v11, %v874_v9 }
 0x345   :  { %v866_v14 = vadd.f32 %v865_v12, %v864_v10  ;;  %v878_v15 = vrot.slane %v877_v13, 4 }
 0x347   :  { %v867_v16 = vrot.slane %v866_v14, 2  ;;  %v879_v17 = vadd.f32 %v878_v15, %v877_v13 }
 0x349   :  { %v868_v18 = vadd.f32 %v867_v16, %v866_v14  ;;  %v880_v19 = vrot.slane %v879_v17, 2 }
 0x34b   :  { %v869_v20 = vrot.slane %v868_v18, 1  ;;  %v881_v21 = vadd.f32 %v880_v19, %v879_v17 }
 0x34d   :  { %v870_v22 = vadd.f32 %v869_v20, %v868_v18  ;;  %v882_v23 = vrot.slane %v881_v21, 1 }
 0x34f   :  { %7230 = vmatmul.mubr.f32.vlgmr.msra.gmra.mxu0 %v870_v22  ;;  %v883_v24 = vadd.f32 %v882_v23, %v881_v21 }
 0x350   :  { %7268 = vmatpush3.msra.mxu0 %v9385_v26  ;;  %7299 = vmatprep.mubr.msk.f32.mxu0 %vm9092_vm2, %v9091_v25 }
 0x351   :  { %7265 = vmatmul.mubr.f32.vlgmr.msra.gmra.mxu1 %v883_v24  ;;  %7269 = vmatprep.subr.mxu0 %v9091_v25 }
 0x352   :  { %7270 = vmatpush3.msra.mxu0 %v9391_v27  ;;  %7303 = vmatpush3.msra.mxu1 %v9385_v26 }
 0x353   :  { %7271 = vmatprep.subr.mxu0 %v9091_v25  ;;  %7304 = vmatprep.subr.mxu1 %v9091_v25 }
 0x354   :  { %7272 = vmatpush3.msra.mxu0 %v9397_v28  ;;  %7305 = vmatpush3.msra.mxu1 %v9391_v27 }
 0x355   :  { %7273 = vmatprep.subr.mxu0 %v9091_v25  ;;  %7306 = vmatprep.subr.mxu1 %v9091_v25 }
 0x356   :  { %7274 = vmatpush3.msra.mxu0 %v9403_v29  ;;  %7307 = vmatpush3.msra.mxu1 %v9397_v28 }
 0x357   :  { %7275 = vmatprep.subr.mxu0 %v9091_v25  ;;  %7308 = vmatprep.subr.mxu1 %v9091_v25 }
 0x358   :  { %7276 = vmatpush3.msra.mxu0 %v9409_v30  ;;  %7309 = vmatpush3.msra.mxu1 %v9403_v29 }
 0x359   :  { %7277 = vmatprep.subr.mxu0 %v9091_v25  ;;  %7310 = vmatprep.subr.mxu1 %v9091_v25 }
 0x35a   :  { %7278 = vmatpush3.msra.mxu0 %v9415_v31  ;;  %7311 = vmatpush3.msra.mxu1 %v9409_v30 }
 0x35b   :  { %7279 = vmatprep.subr.mxu0 %v9091_v25  ;;  %7312 = vmatprep.subr.mxu1 %v9091_v25 }
 0x35c   :  { %7280 = vmatpush3.msra.mxu0 %v9421_v32  ;;  %7313 = vmatpush3.msra.mxu1 %v9415_v31 }
 0x35d   :  { %7281 = vmatprep.subr.mxu0 %v9091_v25  ;;  %7314 = vmatprep.subr.mxu1 %v9091_v25 }
 0x35e   :  { %7282 = vmatpush3.msra.mxu0 %v9427_v33  ;;  %7315 = vmatpush3.msra.mxu1 %v9421_v32 }
 0x35f   :  { %7283 = vmatprep.subr.mxu0 %v9091_v25  ;;  %7316 = vmatprep.subr.mxu1 %v9091_v25 }
 0x360   :  { %7284 = vmatpush3.msra.mxu0 %v9433_v34  ;;  %7317 = vmatpush3.msra.mxu1 %v9427_v33 }
 0x361   :  { %7285 = vmatprep.subr.mxu0 %v9091_v25  ;;  %7318 = vmatprep.subr.mxu1 %v9091_v25 }
 0x362   :  { %7286 = vmatpush3.msra.mxu0 %v9439_v35  ;;  %7319 = vmatpush3.msra.mxu1 %v9433_v34 }
 0x363   :  { %7287 = vmatprep.subr.mxu0 %v9091_v25  ;;  %7320 = vmatprep.subr.mxu1 %v9091_v25 }
 0x364   :  { %7288 = vmatpush3.msra.mxu0 %v9445_v36  ;;  %7321 = vmatpush3.msra.mxu1 %v9439_v35 }
 0x365   :  { %7289 = vmatprep.subr.mxu0 %v9091_v25  ;;  %7322 = vmatprep.subr.mxu1 %v9091_v25 }
 0x366   :  { %7290 = vmatpush3.msra.mxu0 %v9451_v37  ;;  %7323 = vmatpush3.msra.mxu1 %v9445_v36 }
 0x367   :  { %7291 = vmatprep.subr.mxu0 %v9091_v25  ;;  %7324 = vmatprep.subr.mxu1 %v9091_v25 }
 0x368   :  { %7292 = vmatpush3.msra.mxu0 %v9457_v38  ;;  %7325 = vmatpush3.msra.mxu1 %v9451_v37 }
 0x369   :  { %7293 = vmatprep.subr.mxu0 %v9091_v25  ;;  %7326 = vmatprep.subr.mxu1 %v9091_v25 }
 0x36a   :  { %7294 = vmatpush3.msra.mxu0 %v9460_v39  ;;  %7327 = vmatpush3.msra.mxu1 %v9457_v38 }
 0x36b   :  { %7295 = vmatprep.subr.mxu0 %v9091_v25  ;;  %7328 = vmatprep.subr.mxu1 %v9091_v25 }
 0x36c   :  { %7296 = vmatpush3.msra.mxu0 %v9466_v40  ;;  %7329 = vmatpush3.msra.mxu1 %v9460_v39 }
 0x36d   :  { %7297 = vmatprep.subr.mxu0 %v9091_v25  ;;  %7330 = vmatprep.subr.mxu1 %v9091_v25 }
 0x36e   :  { %7298 = vmatpush3.msra.mxu0 %v9472_v41  ;;  %7331 = vmatpush3.msra.mxu1 %v9466_v40 }
 0x36f   :  { %7332 = vmatprep.subr.mxu1 %v9091_v25  ;;  %7334 = vmatprep.mubr.msk.f32.mxu1 %vm9092_vm2, %v9091_v25 }
 0x370   :  { %7333 = vmatpush3.msra.mxu1 %v9472_v41 }
 0x40f   :  { %v950_v42 = vpop.f32.mrf.mxu0 }
 0x410   :  { %v1024_v43 = vmul.f32 %v950_v42, %v950_v42 }
 0x411   :  { %v7231_v44 = vpop.f32.mrf.mxu0  ;;  %v1020_v45 = vpop.f32.mrf.mxu1 }
 0x412   :  { %v1025_v46 = vsub.f32 %v1020_v45, %v1024_v43 }
 0x413   :  { %v7266_v47 = vpop.f32.mrf.mxu1 }
 0x414   :  { %v1026_v48 = vmax.f32 %v1025_v46, 0.0 }
 0x416   :  { %v1027_v49 = vadd.f32 1e-05, %v1026_v48 }
 0x418   :  { %8290 = vrsqrt.f32 %v1027_v49 }
 0x425   :  { %v8291_v54 = vpop.eup %8290 }
 0x426   :  { %v1029_v55 = vmul.f32 %v8291_v54, %v860_v52 }
 0x428   :  { %v1034_v57 = vrot.slane %v1029_v55, %v9572_v53  ;;  %v1040_v58 = vmul.f32 %v1029_v55, %v950_v42 }
 0x42a   :  { %v1041_v59 = vsub.f32 %v861_v56, %v1040_v58  ;;  %v1036_v60 = vmul.f32 %v1034_v57, %v9486_v61  ;;  %v1037_v62 = vmul.f32 %v1034_v57, %v9490_v1  ;;  %v1038_v63 = vmul.f32 %v1034_v57, %v9488_v0 }
 0x42b   :  { %v1039_v2 = vmul.f32 %v1034_v57, %v9494_v3 }
 0x42c   :  { %v1046_v4 = vrot.slane %v1041_v59, %v9572_v53 }
 0x42e   :  { %v1048_v5 = vadd.f32 %v1046_v4, %v1036_v60  ;;  %v1049_v6 = vadd.f32 %v1046_v4, %v1037_v62  ;;  %v1050_v7 = vadd.f32 %v1046_v4, %v1038_v63  ;;  %v1051_v8 = vadd.f32 %v1046_v4, %v1039_v2 }
 0x430   :  { %v6180_v9 = vmul.f32 -1.442695, %v1048_v5  ;;  %v6181_v10 = vmul.f32 -1.442695, %v1049_v6  ;;  %v6182_v11 = vmul.f32 -1.442695, %v1050_v7 }
 0x431   :  { %v6183_v12 = vmul.f32 -1.442695, %v1051_v8 }
 0x432   :  { %8292 = vpow2.f32 %v6180_v9 }
 0x433   :  { %8294 = vpow2.f32 %v6181_v10 }
 0x434   :  { %8296 = vpow2.f32 %v6182_v11 }
 0x435   :  { %8298 = vpow2.f32 %v6183_v12 }
 0x43f   :  { %v8293_v61 = vpop.eup %8292 }
 0x440   :  { %v8295_v1 = vpop.eup %8294  ;;  %v1064_v13 = vadd.f32 1.0, %v8293_v61 }
 0x441   :  { %v8297_v0 = vpop.eup %8296  ;;  %v1065_v14 = vadd.f32 1.0, %v8295_v1 }
 0x442   :  { %v8299_v3 = vpop.eup %8298  ;;  %8300 = vrcp.f32 %v1064_v13  ;;  %v1066_v15 = vadd.f32 1.0, %v8297_v0 }
 0x443   :  { %8302 = vrcp.f32 %v1065_v14  ;;  %v1067_v16 = vadd.f32 1.0, %v8299_v3 }
 0x444   :  { %8304 = vrcp.f32 %v1066_v15 }
 0x445   :  { %8306 = vrcp.f32 %v1067_v16 }
 0x44f   :  { %v8301_v17 = vpop.eup %8300 }
 0x450   :  { %v8303_v18 = vpop.eup %8302  ;;  %v9580_v19 = vmul.f32 %v8301_v17, %v1048_v5 }
 0x451   :  { %v8305_v20 = vpop.eup %8304  ;;  %v9582_v21 = vmul.f32 %v8303_v18, %v1049_v6 }
 0x452   :  { %v8307_v22 = vpop.eup %8306  ;;  %v9584_v23 = vmul.f32 %v8305_v20, %v1050_v7  ;;  %v6184_v24 = vmul.f32 -1.442695, %v9580_v19 }
 0x453   :  { %v9587_v42 = vmul.f32 %v8307_v22, %v1051_v8  ;;  %v6185_v43 = vmul.f32 -1.442695, %v9582_v21 }
 0x454   :  { %8308 = vpow2.f32 %v6184_v24  ;;  %v6186_v44 = vmul.f32 -1.442695, %v9584_v23  ;;  %v9602_v24 = vld [vmem:[%s10462_s25] sm:$0xff]  }
 0x455   :  { %8310 = vpow2.f32 %v6185_v43  ;;  %v6187_v45 = vmul.f32 -1.442695, %v9587_v42  ;;  %v8025_v43 = vld [vmem:[%s10463_s14 + $0xb8] sm:$0xff]  }
 0x456   :  { %8312 = vpow2.f32 %v6186_v44  ;;  %7349 = vmatprep.subr.bf16.mxu1 %v8025_v43  ;;  %v8028_v44 = vld [vmem:[%s10463_s14 + $0xb0] sm:$0xff]  }
 0x457   :  { %8314 = vpow2.f32 %v6187_v45  ;;  %v8031_v45 = vld [vmem:[%s10463_s14 + $0xa8] sm:$0xff]  }
 0x461   :  { %v8309_v46 = vpop.eup %8308 }
 0x462   :  { %v8311_v47 = vpop.eup %8310  ;;  %v1092_v48 = vadd.f32 1.0, %v8309_v46  ;;  %v8034_v46 = vld [vmem:[%s10463_s14 + $0xa0] sm:$0xff]  }
 0x463   :  { %v8313_v49 = vpop.eup %8312  ;;  %v1093_v50 = vadd.f32 1.0, %v8311_v47 }
 0x464   :  { %v8315_v51 = vpop.eup %8314  ;;  %v1094_v52 = vadd.f32 1.0, %v8313_v49  ;;  %8316 = vrcp.f32 %v1092_v48 }
 0x465   :  { %v1095_v54 = vadd.f32 1.0, %v8315_v51  ;;  %8318 = vrcp.f32 %v1093_v50 }
 0x466   :  { %8320 = vrcp.f32 %v1094_v52 }
 0x467   :  { %8322 = vrcp.f32 %v1095_v54 }
 0x471   :  { %v8317_v55 = vpop.eup %8316 }
 0x472   :  { %v8319_v56 = vpop.eup %8318  ;;  %v9593_v57 = vmul.f32 %v8317_v55, %v9580_v19 }
 0x473   :  { %v8321_v58 = vpop.eup %8320  ;;  %v1105_v59 = vmul.f32 %v8319_v56, %v9582_v21  ;;  %v1108_v56 = vld [vmem:[#allocation22] sm:$0x1] }
 0x474   :  { %v8323_v60 = vpop.eup %8322  ;;  %v1106_v62 = vmul.f32 %v8321_v58, %v9584_v23  ;;  %v1119_v63 = vmul.f32 %v9593_v57, %v9593_v57 }
 0x475   :  { %v1107_v2 = vmul.f32 %v8323_v60, %v9587_v42  ;;  %v1110_v4 = vadd.f32 %v1105_v59, %v9593_v57  ;;  %v1120_v5 = vmul.f32 %v1105_v59, %v1105_v59 }
 0x476   :  { %v1121_v7 = vmul.f32 %v1106_v62, %v1106_v62 }
 0x477   :  { %v1111_v6 = vadd.f32 %v1110_v4, %v1106_v62  ;;  %v1123_v8 = vadd.f32 %v1120_v5, %v1119_v63  ;;  %v1122_v10 = vmul.f32 %v1107_v2, %v1107_v2  ;;  %v1109_v63 = vld [vmem:[#allocation19] sm:$0x1] }
 0x479   :  { %v1112_v9 = vadd.f32 %v1111_v6, %v1107_v2  ;;  %v1124_v11 = vadd.f32 %v1123_v8, %v1121_v7 }
 0x47b   :  { %v1113_v12 = vrot.slane %v1112_v9, 4  ;;  %v1125_v61 = vadd.f32 %v1124_v11, %v1122_v10 }
 0x47d   :  { %v1114_v1 = vadd.f32 %v1113_v12, %v1112_v9  ;;  %v1126_v13 = vrot.slane %v1125_v61, 4 }
 0x47f   :  { %v1115_v0 = vrot.slane %v1114_v1, 2  ;;  %v1127_v14 = vadd.f32 %v1126_v13, %v1125_v61 }
 0x481   :  { %v1116_v3 = vadd.f32 %v1115_v0, %v1114_v1  ;;  %v1128_v15 = vrot.slane %v1127_v14, 2 }
 0x483   :  { %v1117_v16 = vrot.slane %v1116_v3, 1  ;;  %v1129_v17 = vadd.f32 %v1128_v15, %v1127_v14  ;;  %v9621_v14 = vld [vmem:[%s10462_s25 + $0x8] sm:$0xff]   ;;  %v8022_v15 = vld [vmem:[%s10463_s14 + $0x30] sm:$0xff]  }
 0x485   :  { %v1118_v18 = vadd.f32 %v1117_v16, %v1116_v3  ;;  %v1130_v20 = vrot.slane %v1129_v17, 1  ;;  %v9626_v3 = vld [vmem:[%s10462_s25 + $0x10] sm:$0xff]   ;;  %v8023_v16 = vld [vmem:[%s10463_s14 + $0x68] sm:$0xff]  }
 0x487   :  { %7300 = vmatmul.mubr.f32.vlgmr.msra.gmra.mxu0 %v1118_v18  ;;  %v1131_v22 = vadd.f32 %v1130_v20, %v1129_v17  ;;  %v8024_v17 = vld [vmem:[%s10463_s14 + $0x28] sm:$0xff]   ;;  %v8026_v18 = vld [vmem:[%s10463_s14 + $0x60] sm:$0xff]   ;;  %v9635_v20 = vld [vmem:[%s10462_s25 + $0x18] sm:$0xff]  }
 0x488   :  { %7341 = vmatprep.mubr.msk.bf16.mxu0 %vm580_vm0, %v9602_v24 }
 0x489   :  { %7335 = vmatmul.mubr.f32.vlgmr.msra.gmra.mxu1 %v1131_v22  ;;  %v8027_v22 = vld [vmem:[%s10463_s14 + $0x20] sm:$0xff]  }
 0x48a   :  { %7350 = vmatpush3.bf16.msra.mxu1 %v8025_v43  ;;  %v8029_v43 = vld [vmem:[%s10463_s14 + $0x58] sm:$0xff]  }
 0x48b   :  { %7351 = vmatprep.subr.bf16.mxu1 %v8028_v44 }
 0x48e   :  { %7352 = vmatpush3.bf16.msra.mxu1 %v8028_v44  ;;  %v8030_v44 = vld [vmem:[%s10463_s14 + $0x18] sm:$0xff]  }
 0x48f   :  { %7353 = vmatprep.subr.bf16.mxu1 %v8031_v45 }
 0x492   :  { %7354 = vmatpush3.bf16.msra.mxu1 %v8031_v45  ;;  %v8032_v45 = vld [vmem:[%s10463_s14 + $0x50] sm:$0xff]  }
 0x493   :  { %7355 = vmatprep.subr.bf16.mxu1 %v8034_v46 }
 0x496   :  { %7356 = vmatpush3.bf16.msra.mxu1 %v8034_v46  ;;  %v8033_v46 = vld [vmem:[%s10463_s14 + $0x10] sm:$0xff]  }
 0x547   :  { %v1198_v47 = vpop.f32.mrf.mxu0 }
 0x548   :  { %v1272_v48 = vmul.f32 %v1198_v47, %v1198_v47 }
 0x549   :  { %v7301_v49 = vpop.f32.mrf.mxu0  ;;  %v1268_v50 = vpop.f32.mrf.mxu1 }
 0x54a   :  { %v1273_v51 = vsub.f32 %v1268_v50, %v1272_v48  ;;  %v8036_v48 = vld [vmem:[%s10463_s14 + $0x8] sm:$0xff]   ;;  %v8037_v49 = vld [vmem:[%s10463_s14 + $0x98] sm:$0xff]   ;;  %v8038_v50 = vld [vmem:[%s10463_s14 + $0x40] sm:$0xff]  }
 0x54b   :  { %v7336_v52 = vpop.f32.mrf.mxu1  ;;  %7357 = vmatprep.subr.bf16.mxu1 %v8037_v49 }
 0x54c   :  { %v1274_v54 = vmax.f32 %v1273_v51, 0.0  ;;  %7358 = vmatpush3.bf16.msra.mxu1 %v8037_v49  ;;  %v8039_v51 = vld [vmem:[%s10463_s14] sm:$0xff]   ;;  %v8040_v52 = vld [vmem:[%s10463_s14 + $0x90] sm:$0xff]  }
 0x54d   :  { %7359 = vmatprep.subr.bf16.mxu1 %v8040_v52 }
 0x54e   :  { %v1275_v55 = vadd.f32 1e-05, %v1274_v54  ;;  %v8041_v54 = vld [vmem:[%s10463_s14 + $0x88] sm:$0xff]  }
 0x550   :  { %8324 = vrsqrt.f32 %v1275_v55  ;;  %7360 = vmatpush3.bf16.msra.mxu1 %v8040_v52  ;;  %v8042_v55 = vld [vmem:[%s10463_s14 + $0x80] sm:$0xff]  }
 0x551   :  { %7361 = vmatprep.subr.bf16.mxu1 %v8041_v54 }
 0x554   :  { %7362 = vmatpush3.bf16.msra.mxu1 %v8041_v54 }
 0x555   :  { %7363 = vmatprep.subr.bf16.mxu1 %v8042_v55 }
 0x558   :  { %7364 = vmatpush3.bf16.msra.mxu1 %v8042_v55 }
 0x559   :  { %7404 = vmatprep.subr.mxu1 %v9091_v25 }
 0x55d   :  { %v8325_v58 = vpop.eup %8324 }
 0x55e   :  { %v1277_v60 = vmul.f32 %v8325_v58, %v1108_v56 }
 0x560   :  { %v1282_v4 = vrot.slane %v1277_v60, %v9572_v53  ;;  %v1288_v5 = vmul.f32 %v1277_v60, %v1198_v47  ;;  %v8035_v47 = vld [vmem:[%s10463_s14 + $0x48] sm:$0xff]  }
 0x562   :  { %v1289_v6 = vsub.f32 %v1109_v63, %v1288_v5  ;;  %v1286_v7 = vmul.f32 %v1282_v4, %v1106_v62  ;;  %v1287_v8 = vmul.f32 %v1282_v4, %v1107_v2  ;;  %v1284_v10 = vmul.f32 %v1282_v4, %v9593_v57  ;;  %v8019_v2 = vld [vmem:[%s10463_s14 + $0x78] sm:$0xff]  }
 0x563   :  { %v1285_v11 = vmul.f32 %v1282_v4, %v1105_v59  ;;  %v8020_v57 = vld [vmem:[%s10463_s14 + $0x38] sm:$0xff]   ;;  %v8021_v59 = vld [vmem:[%s10463_s14 + $0x70] sm:$0xff]  }
 0x564   :  { %v1294_v9 = vrot.slane %v1289_v6, %v9572_v53 }
 0x566   :  { %v1298_v12 = vadd.f32 %v1294_v9, %v1286_v7  ;;  %v1299_v61 = vadd.f32 %v1294_v9, %v1287_v8  ;;  %v1296_v1 = vadd.f32 %v1294_v9, %v1284_v10  ;;  %v1297_v13 = vadd.f32 %v1294_v9, %v1285_v11 }
 0x568   :  { %v9613_v0 = vpack.c.bf16 %v1299_v61, %v1298_v12  ;;  %v1352_v62 = vpack.c.bf16 %v1297_v13, %v1296_v1 }
 0x56a   :  { %7337 = vmatprep.subr.bf16.mxu0 %v9613_v0 }
 0x56b   :  { %7338 = vmatpush3.bf16.msra.mxu0 %v9613_v0 }
 0x56c   :  { %7339 = vmatprep.subr.bf16.mxu0 %v1352_v62 }
 0x56f   :  { %7340 = vmatpush3.bf16.msra.mxu0 %v1352_v62 }
 0x570   :  { %6595 = vmatprep.subr.bf16.mxu0 %v8019_v2 }
 0x572   :  { %7342 = vmatmul.mubr.msk.bf16.vlgmr.msra.gmra.mxu0 %vm580_vm0, %v9621_v14 }
 0x573   :  { %7345 = vmatprep.mubr.msk.bf16.mxu0 %vm580_vm0, %v9626_v3  ;;  %6596 = vmatpush3.bf16.msra.mxu0 %v8020_v57 }
 0x574   :  { %6597 = vmatprep.subr.bf16.mxu0 %v8021_v59 }
 0x577   :  { %6598 = vmatpush3.bf16.msra.mxu0 %v8022_v15 }
 0x578   :  { %6599 = vmatprep.subr.bf16.mxu0 %v8023_v16 }
 0x57a   :  { %7346 = vmatmul.mubr.msk.bf16.gmra.mxu0 %vm580_vm0, %v9635_v20 }
 0x57b   :  { %1599 = vmatprep.mubr.bf16.mxu0 %v1352_v62  ;;  %6600 = vmatpush3.bf16.msra.mxu0 %v8024_v17 }
 0x57c   :  { %6601 = vmatprep.subr.bf16.mxu0 %v8026_v18 }
 0x57f   :  { %6602 = vmatpush3.bf16.msra.mxu0 %v8027_v22 }
 0x580   :  { %6603 = vmatprep.subr.bf16.mxu0 %v8029_v43 }
 0x583   :  { %6604 = vmatpush3.bf16.msra.mxu0 %v8030_v44 }
 0x584   :  { %6605 = vmatprep.subr.bf16.mxu0 %v8032_v45 }
 0x587   :  { %6606 = vmatpush3.bf16.msra.mxu0 %v8033_v46 }
 0x588   :  { %6607 = vmatprep.subr.bf16.mxu0 %v8035_v47 }
 0x58b   :  { %6608 = vmatpush3.bf16.msra.mxu0 %v8036_v48 }
 0x58c   :  { %6609 = vmatprep.subr.bf16.mxu0 %v8038_v50 }
 0x58f   :  { %6610 = vmatpush3.bf16.msra.mxu0 %v8039_v51 }
 0x590   :  { %7369 = vmatprep.subr.mxu0 %v9091_v25 }
 0x632   :  { %v7343_v56 = vpop.f32.mrf.mxu0 }
 0x634   :  { %v1388_v58 = vpop.f32.mrf.mxu0 }
 0x636   :  { %v7344_v60 = vpop.f32.mrf.mxu0 }
 0x637   :  { %v1420_v9 = vpack.c.bf16 %v7344_v60, %v7343_v56 }
 0x638   :  { %v1391_v63 = vpop.f32.mrf.mxu0 }
 0x639   :  { %v1419_v4 = vpack.c.bf16 %v1391_v63, %v1388_v58 }
 0x63a   :  { %v7347_v5 = vpop.f32.mrf.mxu0 }
 0x63b   :  { %1600 = vmatmul.mubr.bf16.vlgmr.msra.gmra.mxu0 %v1419_v4 }
 0x63c   :  { %v1404_v6 = vpop.f32.mrf.mxu0  ;;  %1607 = vmatprep.mubr.bf16.mxu0 %v9613_v0  ;;  %7370 = vmatpush3.msra.mxu0 %v9385_v26  ;;  %v1351_v0 = vld [vmem:[%s10464_s24 + $0x18] sm:$0xff] }
 0x63d   :  { %7371 = vmatprep.subr.mxu0 %v9091_v25 }
 0x63e   :  { %v7348_v7 = vpop.f32.mrf.mxu0  ;;  %7372 = vmatpush3.msra.mxu0 %v9391_v27 }
 0x63f   :  { %7373 = vmatprep.subr.mxu0 %v9091_v25  ;;  %v1422_v11 = vpack.c.bf16 %v7348_v7, %v7347_v5 }
 0x640   :  { %v1407_v8 = vpop.f32.mrf.mxu0  ;;  %7374 = vmatpush3.msra.mxu0 %v9397_v28 }
 0x641   :  { %v1421_v10 = vpack.c.bf16 %v1407_v8, %v1404_v6  ;;  %7375 = vmatprep.subr.mxu0 %v9091_v25 }
 0x642   :  { %7376 = vmatpush3.msra.mxu0 %v9403_v29 }
 0x643   :  { %1608 = vmatmul.mubr.bf16.gmra.mxu0 %v1420_v9  ;;  %7365 = vmatprep.mubr.bf16.mxu1 %v1421_v10 }
 0x644   :  { %7366 = vmatmul.mubr.bf16.vlgmr.msra.gmra.mxu1 %v1422_v11  ;;  %7377 = vmatprep.subr.mxu0 %v9091_v25 }
 0x645   :  { %7405 = vmatpush3.msra.mxu1 %v9385_v26  ;;  %7378 = vmatpush3.msra.mxu0 %v9409_v30 }
 0x646   :  { %7406 = vmatprep.subr.mxu1 %v9091_v25  ;;  %7379 = vmatprep.subr.mxu0 %v9091_v25 }
 0x647   :  { %7407 = vmatpush3.msra.mxu1 %v9391_v27  ;;  %7380 = vmatpush3.msra.mxu0 %v9415_v31 }
 0x648   :  { %7408 = vmatprep.subr.mxu1 %v9091_v25  ;;  %7381 = vmatprep.subr.mxu0 %v9091_v25 }
 0x649   :  { %7409 = vmatpush3.msra.mxu1 %v9397_v28  ;;  %7382 = vmatpush3.msra.mxu0 %v9421_v32 }
 0x64a   :  { %7410 = vmatprep.subr.mxu1 %v9091_v25  ;;  %7383 = vmatprep.subr.mxu0 %v9091_v25 }
 0x64b   :  { %7411 = vmatpush3.msra.mxu1 %v9403_v29  ;;  %7384 = vmatpush3.msra.mxu0 %v9427_v33 }
 0x64c   :  { %7412 = vmatprep.subr.mxu1 %v9091_v25  ;;  %7385 = vmatprep.subr.mxu0 %v9091_v25 }
 0x64d   :  { %7413 = vmatpush3.msra.mxu1 %v9409_v30  ;;  %7386 = vmatpush3.msra.mxu0 %v9433_v34 }
 0x64e   :  { %7414 = vmatprep.subr.mxu1 %v9091_v25  ;;  %7387 = vmatprep.subr.mxu0 %v9091_v25 }
 0x64f   :  { %7415 = vmatpush3.msra.mxu1 %v9415_v31  ;;  %7388 = vmatpush3.msra.mxu0 %v9439_v35  ;;  %v1348_v31 = vld [vmem:[%s10464_s24] sm:$0xff] }
 0x650   :  { %7416 = vmatprep.subr.mxu1 %v9091_v25  ;;  %7389 = vmatprep.subr.mxu0 %v9091_v25 }
 0x651   :  { %7417 = vmatpush3.msra.mxu1 %v9421_v32  ;;  %7390 = vmatpush3.msra.mxu0 %v9445_v36 }
 0x652   :  { %7418 = vmatprep.subr.mxu1 %v9091_v25  ;;  %7391 = vmatprep.subr.mxu0 %v9091_v25 }
 0x653   :  { %7419 = vmatpush3.msra.mxu1 %v9427_v33  ;;  %7392 = vmatpush3.msra.mxu0 %v9451_v37 }
 0x654   :  { %7420 = vmatprep.subr.mxu1 %v9091_v25  ;;  %7393 = vmatprep.subr.mxu0 %v9091_v25 }
 0x655   :  { %7421 = vmatpush3.msra.mxu1 %v9433_v34  ;;  %7394 = vmatpush3.msra.mxu0 %v9457_v38 }
 0x656   :  { %7422 = vmatprep.subr.mxu1 %v9091_v25  ;;  %7395 = vmatprep.subr.mxu0 %v9091_v25 }
 0x657   :  { %7423 = vmatpush3.msra.mxu1 %v9439_v35  ;;  %7396 = vmatpush3.msra.mxu0 %v9460_v39  ;;  %v1350_v35 = vld [vmem:[%s10464_s24 + $0x10] sm:$0xff] }
 0x658   :  { %7424 = vmatprep.subr.mxu1 %v9091_v25  ;;  %7397 = vmatprep.subr.mxu0 %v9091_v25 }
 0x659   :  { %7425 = vmatpush3.msra.mxu1 %v9445_v36  ;;  %7398 = vmatpush3.msra.mxu0 %v9466_v40 }
 0x65a   :  { %7426 = vmatprep.subr.mxu1 %v9091_v25  ;;  %7399 = vmatprep.subr.mxu0 %v9091_v25 }
 0x65b   :  { %7427 = vmatpush3.msra.mxu1 %v9451_v37  ;;  %7400 = vmatpush3.msra.mxu0 %v9472_v41 }
 0x65c   :  { %7428 = vmatprep.subr.mxu1 %v9091_v25  ;;  %7401 = vmatprep.mubr.msk.f32.mxu0 %vm9092_vm2, %v9091_v25 }
 0x65d   :  { %7429 = vmatpush3.msra.mxu1 %v9457_v38  ;;  %7436 = vmatprep.mubr.msk.f32.mxu1 %vm9092_vm2, %v9091_v25 }
 0x65e   :  { %7430 = vmatprep.subr.mxu1 %v9091_v25 }
 0x65f   :  { %7431 = vmatpush3.msra.mxu1 %v9460_v39 }
 0x660   :  { %7432 = vmatprep.subr.mxu1 %v9091_v25 }
 0x661   :  { %7433 = vmatpush3.msra.mxu1 %v9466_v40  ;;  %v1349_v40 = vld [vmem:[%s10464_s24 + $0x8] sm:$0xff] }
 0x662   :  { %7434 = vmatprep.subr.mxu1 %v9091_v25 }
 0x663   :  { %7435 = vmatpush3.msra.mxu1 %v9472_v41 }
 0x6fb   :  { %v6611_v26 = vpop.f32.mrf.mxu0 }
 0x6fd   :  { %v6612_v27 = vpop.f32.mrf.mxu0 }
 0x6fe   :  { %v6613_v29 = vadd.f32 %v6612_v27, %v6611_v26 }
 0x6ff   :  { %v6614_v28 = vpop.f32.mrf.mxu0 }
 0x700   :  { %v1602_v37 = vadd.f32 %v6613_v29, %v1348_v31 }
 0x701   :  { %v6615_v30 = vpop.f32.mrf.mxu0 }
 0x702   :  { %v6616_v34 = vadd.f32 %v6615_v30, %v6614_v28 }
 0x703   :  { %v6617_v32 = vpop.f32.mrf.mxu0 }
 0x704   :  { %v7367_v33 = vpop.f32.mrf.mxu1  ;;  %v1605_v2 = vadd.f32 %v6616_v34, %v1349_v40 }
 0x705   :  { %v6618_v36 = vpop.f32.mrf.mxu0 }
 0x706   :  { %v6619_v38 = vadd.f32 %v6618_v36, %v6617_v32  ;;  %v1650_v39 = vpop.f32.mrf.mxu1 }
 0x707   :  { %v1651_v12 = vadd.f32 %v1650_v39, %v1602_v37  ;;  %v6620_v61 = vpop.f32.mrf.mxu0 }
 0x708   :  { %v1610_v1 = vadd.f32 %v6619_v38, %v1350_v35  ;;  %v7368_v41 = vpop.f32.mrf.mxu1 }
 0x709   :  { %v6216_v13 = vmul.f32 -1.442695, %v1651_v12  ;;  %v6621_v62 = vpop.f32.mrf.mxu0 }
 0x70a   :  { %v1659_v57 = vadd.f32 %v7367_v33, %v1610_v1  ;;  %v6622_v59 = vadd.f32 %v6621_v62, %v6620_v61  ;;  %v1653_v15 = vpop.f32.mrf.mxu1  ;;  %v8043_v61 = vld [vmem:[#allocation25 + $0x78] sm:$0xff]   ;;  %v8048_v62 = vld [vmem:[#allocation25 + $0x28] sm:$0xff]  }
 0x70b   :  { %8326 = vpow2.f32 %v6216_v13  ;;  %v1654_v16 = vadd.f32 %v1653_v15, %v1605_v2  ;;  %v8044_v1 = vld [vmem:[#allocation25 + $0x38] sm:$0xff]   ;;  %6673 = vmatprep.subr.bf16.mxu1 %v8043_v61  ;;  %v8046_v13 = vld [vmem:[#allocation25 + $0x30] sm:$0xff]   ;;  %v8050_v2 = vld [vmem:[#allocation25 + $0x60] sm:$0xff]  }
 0x70c   :  { %v6218_v17 = vmul.f32 -1.442695, %v1659_v57  ;;  %v1613_v18 = vadd.f32 %v6622_v59, %v1351_v0  ;;  %v8047_v0 = vld [vmem:[#allocation25 + $0x68] sm:$0xff]   ;;  %v8053_v59 = vld [vmem:[#allocation25 + $0x58] sm:$0xff]  }
 0x70d   :  { %v6217_v22 = vmul.f32 -1.442695, %v1654_v16  ;;  %v8054_v15 = vld [vmem:[#allocation25 + $0x18] sm:$0xff]  }
 0x70e   :  { %8328 = vpow2.f32 %v6218_v17  ;;  %v1662_v43 = vadd.f32 %v7368_v41, %v1613_v18  ;;  %v8045_v41 = vld [vmem:[#allocation25 + $0x70] sm:$0xff]  }
 0x70f   :  { %8330 = vpow2.f32 %v6217_v22 }
 0x710   :  { %v6219_v44 = vmul.f32 -1.442695, %v1662_v43 }
 0x712   :  { %8332 = vpow2.f32 %v6219_v44 }
 0x718   :  { %v8327_v45 = vpop.eup %8326 }
 0x719   :  { %v1677_v46 = vadd.f32 1.0, %v8327_v45 }
 0x71b   :  { %v8329_v47 = vpop.eup %8328  ;;  %8334 = vrcp.f32 %v1677_v46 }
 0x71c   :  { %v8331_v48 = vpop.eup %8330  ;;  %v1679_v49 = vadd.f32 1.0, %v8329_v47 }
 0x71d   :  { %v1678_v50 = vadd.f32 1.0, %v8331_v48  ;;  %v1693_v48 = vld [vmem:[#allocation23] sm:$0x1] }
 0x71e   :  { %8336 = vrcp.f32 %v1679_v49 }
 0x71f   :  { %v8333_v51 = vpop.eup %8332  ;;  %8338 = vrcp.f32 %v1678_v50 }
 0x720   :  { %v1680_v52 = vadd.f32 1.0, %v8333_v51  ;;  %v1694_v51 = vld [vmem:[#allocation20] sm:$0x1] }
 0x722   :  { %8340 = vrcp.f32 %v1680_v52 }
 0x728   :  { %v8335_v54 = vpop.eup %8334 }
 0x729   :  { %v9725_v56 = vmul.f32 %v8335_v54, %v1651_v12 }
 0x72b   :  { %v8337_v55 = vpop.eup %8336  ;;  %v1704_v5 = vmul.f32 %v9725_v56, %v9725_v56 }
 0x72c   :  { %v8339_v58 = vpop.eup %8338  ;;  %v9727_v60 = vmul.f32 %v8337_v55, %v1659_v57  ;;  %v8051_v57 = vld [vmem:[#allocation25 + $0x20] sm:$0xff]  }
 0x72d   :  { %v9729_v63 = vmul.f32 %v8339_v58, %v1654_v16  ;;  %v8057_v16 = vld [vmem:[#allocation25 + $0x10] sm:$0xff]  }
 0x72e   :  { %v1706_v9 = vmul.f32 %v9727_v60, %v9727_v60 }
 0x72f   :  { %v8341_v4 = vpop.eup %8340  ;;  %v1695_v6 = vadd.f32 %v9729_v63, %v9725_v56  ;;  %v1705_v7 = vmul.f32 %v9729_v63, %v9729_v63 }
 0x730   :  { %v9737_v8 = vmul.f32 %v8341_v4, %v1662_v43 }
 0x731   :  { %v1696_v10 = vadd.f32 %v1695_v6, %v9727_v60  ;;  %v1708_v11 = vadd.f32 %v1705_v7, %v1704_v5 }
 0x732   :  { %v1707_v26 = vmul.f32 %v9737_v8, %v9737_v8 }
 0x733   :  { %v1697_v27 = vadd.f32 %v1696_v10, %v9737_v8  ;;  %v1709_v28 = vadd.f32 %v1708_v11, %v1706_v9 }
 0x735   :  { %v1698_v29 = vrot.slane %v1697_v27, 4  ;;  %v1710_v30 = vadd.f32 %v1709_v28, %v1707_v26 }
 0x737   :  { %v1699_v31 = vadd.f32 %v1698_v29, %v1697_v27  ;;  %v1711_v32 = vrot.slane %v1710_v30, 4  ;;  %v8049_v29 = vld [vmem:[#allocation25 + $0xb8] sm:$0xff]  }
 0x739   :  { %v1700_v33 = vrot.slane %v1699_v31, 2  ;;  %v1712_v34 = vadd.f32 %v1711_v32, %v1710_v30  ;;  %v8060_v30 = vld [vmem:[#allocation25 + $0x8] sm:$0xff]   ;;  %v8064_v32 = vld [vmem:[#allocation25 + $0x90] sm:$0xff]  }
 0x73b   :  { %v1701_v35 = vadd.f32 %v1700_v33, %v1699_v31  ;;  %v1713_v36 = vrot.slane %v1712_v34, 2  ;;  %v8061_v31 = vld [vmem:[#allocation25 + $0x98] sm:$0xff]   ;;  %v8065_v33 = vld [vmem:[#allocation25 + $0x88] sm:$0xff]  }
 0x73d   :  { %v1702_v37 = vrot.slane %v1701_v35, 1  ;;  %v1714_v38 = vadd.f32 %v1713_v36, %v1712_v34 }
 0x73f   :  { %v1703_v39 = vadd.f32 %v1702_v37, %v1701_v35  ;;  %v1715_v40 = vrot.slane %v1714_v38, 1 }
 0x741   :  { %7402 = vmatmul.mubr.f32.vlgmr.msra.gmra.mxu0 %v1703_v39  ;;  %v1716_v12 = vadd.f32 %v1715_v40, %v1714_v38 }
 0x742   :  { %7443 = vmatprep.mubr.msk.bf16.mxu0 %vm580_vm0, %v9602_v24  ;;  %v8056_v24 = vld [vmem:[#allocation25 + $0x50] sm:$0xff]  }
 0x743   :  { %7437 = vmatmul.mubr.f32.vlgmr.msra.gmra.mxu1 %v1716_v12 }
 0x744   :  { %6674 = vmatpush3.bf16.msra.mxu1 %v8044_v1 }
 0x745   :  { %6675 = vmatprep.subr.bf16.mxu1 %v8045_v41 }
 0x748   :  { %6676 = vmatpush3.bf16.msra.mxu1 %v8046_v13 }
 0x749   :  { %6677 = vmatprep.subr.bf16.mxu1 %v8047_v0  ;;  %v8070_v0 = vld [vmem:[#allocation16 + $0x78] sm:$0xff]  }
 0x74c   :  { %6678 = vmatpush3.bf16.msra.mxu1 %v8048_v62  ;;  %v8071_v62 = vld [vmem:[#allocation16 + $0x38] sm:$0xff]  }
 0x74d   :  { %6679 = vmatprep.subr.bf16.mxu1 %v8050_v2  ;;  %v8072_v2 = vld [vmem:[#allocation16 + $0x70] sm:$0xff]  }
 0x750   :  { %6680 = vmatpush3.bf16.msra.mxu1 %v8051_v57  ;;  %v8073_v57 = vld [vmem:[#allocation16 + $0x30] sm:$0xff]  }
 0x751   :  { %6681 = vmatprep.subr.bf16.mxu1 %v8053_v59  ;;  %v8074_v59 = vld [vmem:[#allocation16 + $0x68] sm:$0xff]  }
 0x754   :  { %6682 = vmatpush3.bf16.msra.mxu1 %v8054_v15  ;;  %v8076_v15 = vld [vmem:[#allocation16 + $0x28] sm:$0xff]  }
 0x755   :  { %6683 = vmatprep.subr.bf16.mxu1 %v8056_v24  ;;  %v8077_v24 = vld [vmem:[#allocation16 + $0x60] sm:$0xff]  }
 0x758   :  { %6684 = vmatpush3.bf16.msra.mxu1 %v8057_v16  ;;  %v8079_v16 = vld [vmem:[#allocation16 + $0x20] sm:$0xff]  }
 0x801   :  { %v1783_v17 = vpop.f32.mrf.mxu0 }
 0x802   :  { %v1857_v18 = vmul.f32 %v1783_v17, %v1783_v17 }
 0x803   :  { %v7403_v22 = vpop.f32.mrf.mxu0  ;;  %v1853_v43 = vpop.f32.mrf.mxu1 }
 0x804   :  { %v1858_v44 = vsub.f32 %v1853_v43, %v1857_v18 }
 0x805   :  { %v7438_v45 = vpop.f32.mrf.mxu1 }
 0x806   :  { %v1859_v46 = vmax.f32 %v1858_v44, 0.0 }
 0x808   :  { %v1860_v47 = vadd.f32 1e-05, %v1859_v46 }
 0x80a   :  { %8342 = vrsqrt.f32 %v1860_v47 }
 0x817   :  { %v8343_v49 = vpop.eup %8342 }
 0x818   :  { %v1862_v50 = vmul.f32 %v8343_v49, %v1693_v48  ;;  %v6224_v49 = vld [vmem:[#allocation17] ss:$0 sm:$0xff] }
 0x81a   :  { %v1867_v52 = vrot.slane %v1862_v50, %v9572_v53  ;;  %v1873_v54 = vmul.f32 %v1862_v50, %v1783_v17 }
 0x81c   :  { %v1874_v55 = vsub.f32 %v1694_v51, %v1873_v54  ;;  %v1871_v58 = vmul.f32 %v1867_v52, %v9727_v60  ;;  %v1872_v4 = vmul.f32 %v1867_v52, %v9737_v8  ;;  %v1869_v6 = vmul.f32 %v1867_v52, %v9725_v56  ;;  %v8052_v60 = vld [vmem:[#allocation25 + $0xb0] sm:$0xff]   ;;  %v8055_v56 = vld [vmem:[#allocation25 + $0xa8] sm:$0xff]  }
 0x81d   :  { %v1870_v7 = vmul.f32 %v1867_v52, %v9729_v63  ;;  %v8058_v63 = vld [vmem:[#allocation25 + $0xa0] sm:$0xff]   ;;  %v8059_v8 = vld [vmem:[#allocation25 + $0x48] sm:$0xff]  }
 0x81e   :  { %v1879_v5 = vrot.slane %v1874_v55, %v9572_v53  ;;  %6685 = vmatprep.subr.bf16.mxu1 %v8059_v8 }
 0x81f   :  { %6686 = vmatpush3.bf16.msra.mxu1 %v8060_v30  ;;  %v8067_v30 = vld [vmem:[%s10465_s2] sm:$0xff]  }
 0x820   :  { %v1883_v9 = vadd.f32 %v1879_v5, %v1871_v58  ;;  %v1884_v10 = vadd.f32 %v1879_v5, %v1872_v4  ;;  %v1881_v11 = vadd.f32 %v1879_v5, %v1869_v6  ;;  %v1882_v26 = vadd.f32 %v1879_v5, %v1870_v7 }
 0x822   :  { %v1935_v27 = vpack.c.bf16 %v1884_v10, %v1883_v9  ;;  %v1934_v28 = vpack.c.bf16 %v1882_v26, %v1881_v11 }
 0x824   :  { %7439 = vmatprep.subr.bf16.mxu0 %v1935_v27  ;;  %2187 = vmatprep.mubr.bf16.mxu1 %v1934_v28 }
 0x825   :  { %7440 = vmatpush3.bf16.msra.mxu0 %v1935_v27 }
 0x826   :  { %7441 = vmatprep.subr.bf16.mxu0 %v1934_v28 }
 0x829   :  { %7442 = vmatpush3.bf16.msra.mxu0 %v1934_v28 }
 0x82a   :  { %7451 = vmatprep.subr.bf16.mxu0 %v8049_v29 }
 0x82c   :  { %7444 = vmatmul.mubr.msk.bf16.vlgmr.msra.gmra.mxu0 %vm580_vm0, %v9621_v14  ;;  %v8062_v14 = vld [vmem:[#allocation25 + $0x40] sm:$0xff]  }
 0x82d   :  { %7447 = vmatprep.mubr.msk.bf16.mxu0 %vm580_vm0, %v9626_v3  ;;  %7452 = vmatpush3.bf16.msra.mxu0 %v8049_v29  ;;  %v8063_v3 = vld [vmem:[#allocation25] sm:$0xff]  }
 0x82e   :  { %7453 = vmatprep.subr.bf16.mxu0 %v8052_v60  ;;  %6687 = vmatprep.subr.bf16.mxu1 %v8062_v14  ;;  %v8081_v14 = vld [vmem:[#allocation16 + $0xa8] sm:$0xff]  }
 0x82f   :  { %6688 = vmatpush3.bf16.msra.mxu1 %v8063_v3  ;;  %v8082_v3 = vld [vmem:[#allocation16 + $0x18] sm:$0xff]  }
 0x830   :  { %6716 = vmatprep.subr.bf16.mxu1 %v8070_v0 }
 0x831   :  { %7454 = vmatpush3.bf16.msra.mxu0 %v8052_v60 }
 0x832   :  { %7455 = vmatprep.subr.bf16.mxu0 %v8055_v56 }
 0x834   :  { %7448 = vmatmul.mubr.msk.bf16.gmra.mxu0 %vm580_vm0, %v9635_v20  ;;  %v8066_v20 = vld [vmem:[#allocation25 + $0x80] sm:$0xff]  }
 0x835   :  { %7456 = vmatpush3.bf16.msra.mxu0 %v8055_v56 }
 0x836   :  { %7457 = vmatprep.subr.bf16.mxu0 %v8058_v63 }
 0x839   :  { %7458 = vmatpush3.bf16.msra.mxu0 %v8058_v63 }
 0x83a   :  { %7459 = vmatprep.subr.bf16.mxu0 %v8061_v31 }
 0x83d   :  { %7460 = vmatpush3.bf16.msra.mxu0 %v8061_v31  ;;  %v8075_v31 = vld [vmem:[#allocation16 + $0xb8] sm:$0xff]  }
 0x83e   :  { %7461 = vmatprep.subr.bf16.mxu0 %v8064_v32 }
 0x841   :  { %7462 = vmatpush3.bf16.msra.mxu0 %v8064_v32  ;;  %v8083_v32 = vld [vmem:[#allocation16 + $0x50] sm:$0xff]  }
 0x842   :  { %7463 = vmatprep.subr.bf16.mxu0 %v8065_v33 }
 0x845   :  { %7464 = vmatpush3.bf16.msra.mxu0 %v8065_v33  ;;  %v8084_v33 = vld [vmem:[#allocation16 + $0xa0] sm:$0xff]  }
 0x846   :  { %7465 = vmatprep.subr.bf16.mxu0 %v8066_v20 }
 0x849   :  { %7466 = vmatpush3.bf16.msra.mxu0 %v8066_v20  ;;  %v8085_v20 = vld [vmem:[#allocation16 + $0x10] sm:$0xff]  }
 0x84a   :  { %7471 = vmatprep.subr.bf16.mxu0 %v9091_v25 }
 0x8ec   :  { %v7445_v34 = vpop.f32.mrf.mxu0 }
 0x8ee   :  { %v1970_v35 = vpop.f32.mrf.mxu0 }
 0x8f0   :  { %v7446_v36 = vpop.f32.mrf.mxu0 }
 0x8f1   :  { %v2002_v1 = vpack.c.bf16 %v7446_v36, %v7445_v34  ;;  %v8086_v34 = vld [vmem:[#allocation16 + $0x48] sm:$0xff]  }
 0x8f2   :  { %v1973_v37 = vpop.f32.mrf.mxu0  ;;  %v8088_v36 = vld [vmem:[#allocation16 + $0x8] sm:$0xff]  }
 0x8f3   :  { %v2001_v38 = vpack.c.bf16 %v1973_v37, %v1970_v35  ;;  %v8087_v35 = vld [vmem:[#allocation16 + $0x98] sm:$0xff]   ;;  %v8089_v37 = vld [vmem:[#allocation16 + $0x40] sm:$0xff]  }
 0x8f4   :  { %v7449_v39 = vpop.f32.mrf.mxu0 }
 0x8f5   :  { %2188 = vmatmul.mubr.bf16.vlgmr.msra.gmra.mxu1 %v2001_v38  ;;  %v8090_v38 = vld [vmem:[#allocation16 + $0x90] sm:$0xff]  }
 0x8f6   :  { %v1986_v40 = vpop.f32.mrf.mxu0  ;;  %2195 = vmatprep.mubr.bf16.mxu1 %v1935_v27  ;;  %6717 = vmatpush3.bf16.msra.mxu1 %v8071_v62 }
 0x8f7   :  { %6718 = vmatprep.subr.bf16.mxu1 %v8072_v2 }
 0x8f8   :  { %v7450_v12 = vpop.f32.mrf.mxu0 }
 0x8f9   :  { %v2004_v13 = vpack.c.bf16 %v7450_v12, %v7449_v39  ;;  %v8091_v39 = vld [vmem:[#allocation16] sm:$0xff]  }
 0x8fa   :  { %v1989_v61 = vpop.f32.mrf.mxu0  ;;  %6719 = vmatpush3.bf16.msra.mxu1 %v8073_v57  ;;  %v8093_v12 = vld [vmem:[#allocation16 + $0x80] sm:$0xff]  }
 0x8fb   :  { %v2003_v41 = vpack.c.bf16 %v1989_v61, %v1986_v40  ;;  %6720 = vmatprep.subr.bf16.mxu1 %v8074_v59  ;;  %v8092_v40 = vld [vmem:[#allocation16 + $0x88] sm:$0xff]  }
 0x8fd   :  { %2196 = vmatmul.mubr.bf16.gmra.mxu1 %v2002_v1  ;;  %7467 = vmatprep.mubr.bf16.mxu0 %v2003_v41 }
 0x8fe   :  { %7468 = vmatmul.mubr.bf16.vlgmr.msra.gmra.mxu0 %v2004_v13  ;;  %6721 = vmatpush3.bf16.msra.mxu1 %v8076_v15 }
 0x8ff   :  { %7475 = vmatprep.mubr.msk.bf16.mxu0 %vm9092_vm2, %v9091_v25  ;;  %6722 = vmatprep.subr.bf16.mxu1 %v8077_v24 }
 0x902   :  { %6723 = vmatpush3.bf16.msra.mxu1 %v8079_v16 }
 0x9b5   :  { %v6689_v17 = vpop.f32.mrf.mxu1 }
 0x9b7   :  { %v6690_v18 = vpop.f32.mrf.mxu1 }
 0x9b8   :  { %v6691_v58 = vadd.f32 %v6690_v18, %v6689_v17 }
 0x9b9   :  { %v6692_v22 = vpop.f32.mrf.mxu1 }
 0x9ba   :  { %v2190_v10 = vadd.f32 %v6691_v58, %v6224_v49  ;;  %v9861_v58 = vld [vmem:[#allocation5 + $0x18] sm:$0xff] }
 0x9bb   :  { %v6693_v43 = vpop.f32.mrf.mxu1 }
 0x9bc   :  { %v6694_v51 = vadd.f32 %v6693_v43, %v6692_v22  ;;  %v9793_v43 = vld [vmem:[#allocation5 + $0x78] sm:$0xff] }
 0x9bd   :  { %v6695_v44 = vpop.f32.mrf.mxu1 }
 0x9be   :  { %v7469_v45 = vpop.f32.mrf.mxu0  ;;  %v2193_v9 = vadd.f32 %v6694_v51, %v6224_v49  ;;  %v9840_v51 = vld [vmem:[#allocation5 + $0x38] sm:$0xff] }
 0x9bf   :  { %v6696_v46 = vpop.f32.mrf.mxu1 }
 0x9c0   :  { %v6697_v47 = vadd.f32 %v6696_v46, %v6695_v44  ;;  %v2238_v48 = vpop.f32.mrf.mxu0  ;;  %v9798_v44 = vld [vmem:[#allocation5 + $0x70] sm:$0xff]  ;;  %v9810_v46 = vld [vmem:[#allocation5 + $0x60] sm:$0xff] }
 0x9c1   :  { %v6698_v50 = vpop.f32.mrf.mxu1  ;;  %v2239_v28 = vadd.f32 %v2238_v48, %v2190_v10  ;;  %v9822_v48 = vld [vmem:[#allocation5 + $0x50] sm:$0xff]  ;;  %v6255_v10 = vld [vmem:[#allocation14] ss:$0 sm:$0xff] }
 0x9c2   :  { %v2198_v52 = vadd.f32 %v6697_v47, %v6224_v49  ;;  %v7470_v54 = vpop.f32.mrf.mxu0  ;;  %v9816_v47 = vld [vmem:[#allocation5 + $0x58] sm:$0xff] }
 0x9c3   :  { %v6699_v55 = vpop.f32.mrf.mxu1  ;;  %v2253_v63 = vadd.f32 %v2239_v28, %v9580_v19  ;;  %v8068_v19 = vld [vmem:[%s10465_s2 + $0x8] sm:$0xff]  }
 0x9c4   :  { %v6700_v4 = vadd.f32 %v6699_v55, %v6698_v50  ;;  %v2241_v5 = vpop.f32.mrf.mxu0  ;;  %v2247_v6 = vadd.f32 %v7469_v45, %v2198_v52  ;;  %v9804_v45 = vld [vmem:[#allocation5 + $0x68] sm:$0xff]  ;;  %v9834_v50 = vld [vmem:[#allocation5 + $0x40] sm:$0xff]  ;;  %v9843_v52 = vld [vmem:[#allocation5 + $0x30] sm:$0xff] }
 0x9c5   :  { %v2242_v26 = vadd.f32 %v2241_v5, %v2193_v9  ;;  %v9855_v55 = vld [vmem:[#allocation5 + $0x20] sm:$0xff]  ;;  %v9873_v5 = vld [vmem:[#allocation5 + $0x8] sm:$0xff] }
 0x9c6   :  { %v2201_v7 = vadd.f32 %v6700_v4, %v6224_v49  ;;  %v2255_v27 = vadd.f32 %v2247_v6, %v9584_v23  ;;  %v8069_v23 = vld [vmem:[%s10465_s2 + $0x10] sm:$0xff]   ;;  %v9828_v49 = vld [vmem:[#allocation5 + $0x48] sm:$0xff]  ;;  %v9879_v6 = vld [vmem:[#allocation5] sm:$0xff] }
 0x9c7   :  { %v2254_v60 = vadd.f32 %v2242_v26, %v9582_v21  ;;  %v8078_v21 = vld [vmem:[#allocation16 + $0xb0] sm:$0xff]   ;;  %v9867_v4 = vld [vmem:[#allocation5 + $0x10] sm:$0xff] }
 0x9c8   :  { %v2250_v11 = vadd.f32 %v7470_v54, %v2201_v7  ;;  %v9849_v54 = vld [vmem:[#allocation5 + $0x28] sm:$0xff] }
 0x9c9   :  { %v2257_v8 = vpack.c.bf16 %v2254_v60, %v2253_v63 }
 0x9ca   :  { %v2256_v29 = vadd.f32 %v2250_v11, %v9587_v42  ;;  %v8080_v42 = vld [vmem:[#allocation16 + $0x58] sm:$0xff]  }
 0x9cb   :  { %6724 = vmatprep.subr.bf16.mxu1 %v8080_v42 }
 0x9cc   :  { %v2258_v56 = vpack.c.bf16 %v2256_v29, %v2255_v27  ;;  %6725 = vmatpush3.bf16.msra.mxu1 %v8082_v3 }
 0x9cd   :  { %6726 = vmatprep.subr.bf16.mxu1 %v8083_v32 }
 0x9ce   :  { %7472 = vmatpush3.bf16.msra.mxu0 %v2258_v56 }
 0x9cf   :  { %7473 = vmatprep.subr.bf16.mxu0 %v9091_v25 }
 0x9d0   :  { %6727 = vmatpush3.bf16.msra.mxu1 %v8085_v20 }
 0x9d1   :  { %6728 = vmatprep.subr.bf16.mxu1 %v8086_v34 }
 0x9d2   :  { %7474 = vmatpush3.bf16.msra.mxu0 %v2257_v8 }
 0x9d3   :  { %7487 = vmatprep.subr.bf16.mxu0 %v9091_v25 }
 0x9d4   :  { %6729 = vmatpush3.bf16.msra.mxu1 %v8088_v36 }
 0x9d5   :  { %7476 = vmatmul.mubr.msk.bf16.vlgmr.msra.gmra.mxu0 %vm580_vm0, %v8067_v30  ;;  %6730 = vmatprep.subr.bf16.mxu1 %v8089_v37 }
 0x9d6   :  { %7479 = vmatprep.mubr.msk.bf16.mxu0 %vm9092_vm2, %v9091_v25  ;;  %7488 = vmatpush3.bf16.msra.mxu0 %v8075_v31 }
 0x9d7   :  { %7489 = vmatprep.subr.bf16.mxu0 %v9091_v25 }
 0x9d8   :  { %6731 = vmatpush3.bf16.msra.mxu1 %v8091_v39 }
 0x9d9   :  { %7507 = vmatprep.subr.mxu1 %v9091_v25 }
 0x9da   :  { %7490 = vmatpush3.bf16.msra.mxu0 %v8078_v21 }
 0x9db   :  { %7491 = vmatprep.subr.bf16.mxu0 %v9091_v25 }
 0x9dd   :  { %7480 = vmatmul.mubr.msk.bf16.gmra.mxu0 %vm580_vm0, %v8068_v19 }
 0x9de   :  { %7483 = vmatprep.mubr.msk.bf16.mxu0 %vm9092_vm2, %v9091_v25  ;;  %7492 = vmatpush3.bf16.msra.mxu0 %v8081_v14 }
 0x9df   :  { %7493 = vmatprep.subr.bf16.mxu0 %v9091_v25 }
 0x9e2   :  { %7494 = vmatpush3.bf16.msra.mxu0 %v8084_v33 }
 0x9e3   :  { %7495 = vmatprep.subr.bf16.mxu0 %v9091_v25 }
 0x9e5   :  { %7484 = vmatmul.mubr.msk.bf16.gmra.mxu0 %vm580_vm0, %v8069_v23 }
 0x9e6   :  { %7503 = vmatprep.mubr.msk.bf16.mxu0 %vm9092_vm2, %v9091_v25  ;;  %7496 = vmatpush3.bf16.msra.mxu0 %v8087_v35 }
 0x9e7   :  { %7497 = vmatprep.subr.bf16.mxu0 %v9091_v25 }
 0x9ea   :  { %7498 = vmatpush3.bf16.msra.mxu0 %v8090_v38 }
 0x9eb   :  { %7499 = vmatprep.subr.bf16.mxu0 %v9091_v25 }
 0x9ee   :  { %7500 = vmatpush3.bf16.msra.mxu0 %v8092_v40 }
 0x9ef   :  { %7501 = vmatprep.subr.bf16.mxu0 %v9091_v25 }
 0x9f2   :  { %7502 = vmatpush3.bf16.msra.mxu0 %v8093_v12 }
 0x9f3   :  { %7542 = vmatprep.subr.mxu0 %v9091_v25 }
 0xa95   :  { %v2323_v61 = vpop.f32.mrf.mxu0 }
 0xa97   :  { %v7477_v1 = vpop.f32.mrf.mxu0 }
 0xa99   :  { %v2326_v41 = vpop.f32.mrf.mxu0 }
 0xa9a   :  { %v2346_v59 = vpack.c.bf16 %v2326_v41, %v2323_v61 }
 0xa9b   :  { %v7478_v13 = vpop.f32.mrf.mxu0 }
 0xa9d   :  { %v2331_v0 = vpop.f32.mrf.mxu0 }
 0xa9f   :  { %v7481_v62 = vpop.f32.mrf.mxu0 }
 0xaa1   :  { %v2334_v2 = vpop.f32.mrf.mxu0 }
 0xaa2   :  { %v2347_v57 = vpack.c.bf16 %v2334_v2, %v2331_v0 }
 0xaa3   :  { %v7482_v15 = vpop.f32.mrf.mxu0 }
 0xaa4   :  { %2580 = vmatprep.mubr.bf16.mxu1 %v2347_v57 }
 0xaa5   :  { %v2339_v24 = vpop.f32.mrf.mxu0  ;;  %2581 = vmatmul.mubr.bf16.vlgmr.msra.gmra.mxu1 %v2346_v59 }
 0xaa6   :  { %7539 = vmatprep.mubr.msk.f32.mxu1 %vm9092_vm2, %v9091_v25  ;;  %7508 = vmatpush3.msra.mxu1 %v9793_v43 }
 0xaa7   :  { %v7485_v16 = vpop.f32.mrf.mxu0  ;;  %7509 = vmatprep.subr.mxu1 %v9091_v25 }
 0xaa8   :  { %7510 = vmatpush3.msra.mxu1 %v9798_v44  ;;  %v8096_v16 = vld [vmem:[#allocation41 + $0xb8] sm:$0xff]  }
 0xaa9   :  { %v2342_v17 = vpop.f32.mrf.mxu0  ;;  %7511 = vmatprep.subr.mxu1 %v9091_v25 }
 0xaaa   :  { %v2348_v18 = vpack.c.bf16 %v2342_v17, %v2339_v24  ;;  %7512 = vmatpush3.msra.mxu1 %v9804_v45  ;;  %v9899_v24 = vld [vmem:[%s10466_s4] sm:$0xff]   ;;  %v8099_v17 = vld [vmem:[#allocation41 + $0xb0] sm:$0xff]  }
 0xaab   :  { %v7486_v22 = vpop.f32.mrf.mxu0  ;;  %7513 = vmatprep.subr.mxu1 %v9091_v25 }
 0xaac   :  { %7504 = vmatmul.mubr.bf16.vlgmr.msra.gmra.mxu0 %v2348_v18  ;;  %7514 = vmatpush3.msra.mxu1 %v9810_v46  ;;  %v8102_v18 = vld [vmem:[#allocation41 + $0xa8] sm:$0xff]   ;;  %v8105_v22 = vld [vmem:[#allocation41 + $0xa0] sm:$0xff]  }
 0xaad   :  { %7574 = vmatprep.mubr.msk.f32.mxu0 %vm9092_vm2, %v9091_v25  ;;  %7543 = vmatpush3.msra.mxu0 %v9793_v43 }
 0xaae   :  { %7544 = vmatprep.subr.mxu0 %v9091_v25  ;;  %7515 = vmatprep.subr.mxu1 %v9091_v25 }
 0xaaf   :  { %7545 = vmatpush3.msra.mxu0 %v9798_v44  ;;  %7516 = vmatpush3.msra.mxu1 %v9816_v47 }
 0xab0   :  { %7546 = vmatprep.subr.mxu0 %v9091_v25  ;;  %7517 = vmatprep.subr.mxu1 %v9091_v25 }
 0xab1   :  { %7547 = vmatpush3.msra.mxu0 %v9804_v45  ;;  %7518 = vmatpush3.msra.mxu1 %v9822_v48 }
 0xab2   :  { %7548 = vmatprep.subr.mxu0 %v9091_v25  ;;  %7519 = vmatprep.subr.mxu1 %v9091_v25 }
 0xab3   :  { %7549 = vmatpush3.msra.mxu0 %v9810_v46  ;;  %7520 = vmatpush3.msra.mxu1 %v9828_v49 }
 0xab4   :  { %7550 = vmatprep.subr.mxu0 %v9091_v25  ;;  %7521 = vmatprep.subr.mxu1 %v9091_v25 }
 0xab5   :  { %7551 = vmatpush3.msra.mxu0 %v9816_v47  ;;  %7522 = vmatpush3.msra.mxu1 %v9834_v50 }
 0xab6   :  { %7552 = vmatprep.subr.mxu0 %v9091_v25  ;;  %7523 = vmatprep.subr.mxu1 %v9091_v25 }
 0xab7   :  { %7553 = vmatpush3.msra.mxu0 %v9822_v48  ;;  %7524 = vmatpush3.msra.mxu1 %v9840_v51 }
 0xab8   :  { %7554 = vmatprep.subr.mxu0 %v9091_v25  ;;  %7525 = vmatprep.subr.mxu1 %v9091_v25 }
 0xab9   :  { %7555 = vmatpush3.msra.mxu0 %v9828_v49  ;;  %7526 = vmatpush3.msra.mxu1 %v9843_v52 }
 0xaba   :  { %7556 = vmatprep.subr.mxu0 %v9091_v25  ;;  %7527 = vmatprep.subr.mxu1 %v9091_v25 }
 0xabb   :  { %7557 = vmatpush3.msra.mxu0 %v9834_v50  ;;  %7528 = vmatpush3.msra.mxu1 %v9849_v54 }
 0xabc   :  { %7558 = vmatprep.subr.mxu0 %v9091_v25  ;;  %7529 = vmatprep.subr.mxu1 %v9091_v25 }
 0xabd   :  { %7559 = vmatpush3.msra.mxu0 %v9840_v51  ;;  %7530 = vmatpush3.msra.mxu1 %v9855_v55 }
 0xabe   :  { %7560 = vmatprep.subr.mxu0 %v9091_v25  ;;  %7531 = vmatprep.subr.mxu1 %v9091_v25 }
 0xabf   :  { %7561 = vmatpush3.msra.mxu0 %v9843_v52  ;;  %7532 = vmatpush3.msra.mxu1 %v9861_v58 }
 0xac0   :  { %7562 = vmatprep.subr.mxu0 %v9091_v25  ;;  %7533 = vmatprep.subr.mxu1 %v9091_v25 }
 0xac1   :  { %7563 = vmatpush3.msra.mxu0 %v9849_v54  ;;  %7534 = vmatpush3.msra.mxu1 %v9867_v4 }
 0xac2   :  { %7564 = vmatprep.subr.mxu0 %v9091_v25  ;;  %7535 = vmatprep.subr.mxu1 %v9091_v25 }
 0xac3   :  { %7565 = vmatpush3.msra.mxu0 %v9855_v55  ;;  %7536 = vmatpush3.msra.mxu1 %v9873_v5 }
 0xac4   :  { %7566 = vmatprep.subr.mxu0 %v9091_v25  ;;  %7537 = vmatprep.subr.mxu1 %v9091_v25 }
 0xac5   :  { %7567 = vmatpush3.msra.mxu0 %v9861_v58  ;;  %7538 = vmatpush3.msra.mxu1 %v9879_v6 }
 0xac6   :  { %7568 = vmatprep.subr.mxu0 %v9091_v25 }
 0xac7   :  { %7569 = vmatpush3.msra.mxu0 %v9867_v4 }
 0xac8   :  { %7570 = vmatprep.subr.mxu0 %v9091_v25 }
 0xac9   :  { %7571 = vmatpush3.msra.mxu0 %v9873_v5 }
 0xaca   :  { %7572 = vmatprep.subr.mxu0 %v9091_v25 }
 0xacb   :  { %7573 = vmatpush3.msra.mxu0 %v9879_v6 }
 0xacc   :  { %7583 = vmatprep.subr.bf16.mxu0 %v9091_v25 }
 0xb65   :  { %v6732_v7 = vpop.f32.mrf.mxu1 }
 0xb67   :  { %v6733_v9 = vpop.f32.mrf.mxu1 }
 0xb68   :  { %v6734_v11 = vadd.f32 %v6733_v9, %v6732_v7  ;;  %v8108_v7 = vld [vmem:[#allocation41 + $0x98] sm:$0xff]   ;;  %v8111_v9 = vld [vmem:[#allocation41 + $0x90] sm:$0xff]  }
 0xb69   :  { %v6735_v26 = vpop.f32.mrf.mxu1 }
 0xb6a   :  { %v2583_v27 = vadd.f32 %v6734_v11, %v6255_v10 }
 0xb6b   :  { %v6736_v28 = vpop.f32.mrf.mxu1 }
 0xb6c   :  { %v6737_v29 = vadd.f32 %v6736_v28, %v6735_v26  ;;  %v2623_v60 = vpop.f32.mrf.mxu0 }
 0xb6d   :  { %v9888_v56 = vadd.f32 %v2623_v60, %v2583_v27 }
 0xb6e   :  { %v7505_v63 = vpop.f32.mrf.mxu0  ;;  %v2586_v8 = vadd.f32 %v6737_v29, %v6255_v10 }
 0xb6f   :  { %v6280_v30 = vmul.f32 -1.442695, %v9888_v56 }
 0xb70   :  { %v2626_v31 = vpop.f32.mrf.mxu0 }
 0xb71   :  { %8344 = vpow2.f32 %v6280_v30  ;;  %v9891_v21 = vadd.f32 %v2626_v31, %v2586_v8  ;;  %v2644_v8 = vld [vmem:[#allocation38] sm:$0x1] }
 0xb72   :  { %v7506_v19 = vpop.f32.mrf.mxu0 }
 0xb73   :  { %v6281_v23 = vmul.f32 -1.442695, %v9891_v21  ;;  %v2645_v19 = vld [vmem:[#allocation35] sm:$0x1] }
 0xb75   :  { %8346 = vpow2.f32 %v6281_v23 }
 0xb7e   :  { %v8345_v42 = vpop.eup %8344 }
 0xb7f   :  { %v2636_v14 = vadd.f32 1.0, %v8345_v42 }
 0xb81   :  { %8348 = vrcp.f32 %v2636_v14 }
 0xb82   :  { %v8347_v3 = vpop.eup %8346 }
 0xb83   :  { %v2637_v32 = vadd.f32 1.0, %v8347_v3 }
 0xb85   :  { %8350 = vrcp.f32 %v2637_v32 }
 0xb8e   :  { %v8349_v33 = vpop.eup %8348 }
 0xb8f   :  { %v2642_v20 = vmul.f32 %v8349_v33, %v9888_v56 }
 0xb91   :  { %v2653_v36 = vmul.f32 %v2642_v20, %v2642_v20 }
 0xb92   :  { %v8351_v34 = vpop.eup %8350 }
 0xb93   :  { %v2643_v35 = vmul.f32 %v8351_v34, %v9891_v21 }
 0xb95   :  { %v2646_v37 = vadd.f32 %v2643_v35, %v2642_v20  ;;  %v2654_v38 = vmul.f32 %v2643_v35, %v2643_v35 }
 0xb97   :  { %v2647_v39 = vrot.slane %v2646_v37, 4  ;;  %v2655_v40 = vadd.f32 %v2654_v38, %v2653_v36  ;;  %v8097_v38 = vld [vmem:[#allocation41 + $0x78] sm:$0xff]  }
 0xb99   :  { %v2648_v12 = vadd.f32 %v2647_v39, %v2646_v37  ;;  %v2656_v61 = vrot.slane %v2655_v40, 4  ;;  %v9912_v39 = vld [vmem:[%s10466_s4 + $0x8] sm:$0xff]  }
 0xb9b   :  { %v2649_v1 = vrot.slane %v2648_v12, 2  ;;  %v2657_v41 = vadd.f32 %v2656_v61, %v2655_v40  ;;  %v8098_v40 = vld [vmem:[#allocation41 + $0x38] sm:$0xff]   ;;  %v8104_v61 = vld [vmem:[#allocation41 + $0x28] sm:$0xff]  }
 0xb9d   :  { %v2650_v13 = vadd.f32 %v2649_v1, %v2648_v12  ;;  %v2658_v0 = vrot.slane %v2657_v41, 2  ;;  %v8100_v12 = vld [vmem:[#allocation41 + $0x70] sm:$0xff]   ;;  %v8106_v1 = vld [vmem:[#allocation41 + $0x60] sm:$0xff]  }
 0xb9f   :  { %v2651_v62 = vrot.slane %v2650_v13, 1  ;;  %v2659_v2 = vadd.f32 %v2658_v0, %v2657_v41  ;;  %v8107_v41 = vld [vmem:[#allocation41 + $0x20] sm:$0xff]   ;;  %v8110_v0 = vld [vmem:[#allocation41 + $0x18] sm:$0xff]  }
 0xba1   :  { %v2652_v57 = vadd.f32 %v2651_v62, %v2650_v13  ;;  %v2660_v59 = vrot.slane %v2659_v2, 1  ;;  %v8109_v13 = vld [vmem:[#allocation41 + $0x58] sm:$0xff]   ;;  %v8112_v62 = vld [vmem:[#allocation41 + $0x50] sm:$0xff]  }
 0xba3   :  { %7540 = vmatmul.mubr.f32.vlgmr.msra.gmra.mxu1 %v2652_v57  ;;  %v2661_v15 = vadd.f32 %v2660_v59, %v2659_v2  ;;  %v8113_v2 = vld [vmem:[#allocation41 + $0x10] sm:$0xff]   ;;  %v8114_v57 = vld [vmem:[#allocation41 + $0x88] sm:$0xff]  }
 0xba4   :  { %7579 = vmatprep.mubr.msk.bf16.mxu1 %vm668_vm1, %v9899_v24  ;;  %v8115_v59 = vld [vmem:[#allocation41 + $0x48] sm:$0xff]  }
 0xba5   :  { %7575 = vmatmul.mubr.f32.vlgmr.msra.gmra.mxu0 %v2661_v15  ;;  %v8116_v15 = vld [vmem:[#allocation41 + $0x8] sm:$0xff]  }
 0xba6   :  { %7599 = vmatprep.mubr.msk.bf16.mxu0 %vm9092_vm2, %v9091_v25  ;;  %7584 = vmatpush3.bf16.msra.mxu0 %v8096_v16  ;;  %v8117_v16 = vld [vmem:[#allocation41 + $0x80] sm:$0xff]  }
 0xba7   :  { %7585 = vmatprep.subr.bf16.mxu0 %v9091_v25 }
 0xbaa   :  { %7586 = vmatpush3.bf16.msra.mxu0 %v8099_v17  ;;  %v8118_v17 = vld [vmem:[#allocation41 + $0x40] sm:$0xff]  }
 0xbab   :  { %7587 = vmatprep.subr.bf16.mxu0 %v9091_v25 }
 0xbae   :  { %7588 = vmatpush3.bf16.msra.mxu0 %v8102_v18  ;;  %v8119_v18 = vld [vmem:[#allocation41] sm:$0xff]  }
 0xbaf   :  { %7589 = vmatprep.subr.bf16.mxu0 %v9091_v25 }
 0xbb2   :  { %7590 = vmatpush3.bf16.msra.mxu0 %v8105_v22 }
 0xbb3   :  { %7591 = vmatprep.subr.bf16.mxu0 %v9091_v25 }
 0xbb6   :  { %7592 = vmatpush3.bf16.msra.mxu0 %v8108_v7 }
 0xbb7   :  { %7593 = vmatprep.subr.bf16.mxu0 %v9091_v25 }
 0xbba   :  { %7594 = vmatpush3.bf16.msra.mxu0 %v8111_v9 }
 0xbbb   :  { %7595 = vmatprep.subr.bf16.mxu0 %v9091_v25 }
 0xbbe   :  { %7596 = vmatpush3.bf16.msra.mxu0 %v8114_v57  ;;  %v8132_v57 = vld [vmem:[#allocation43 + $0x98] sm:$0xff]  }
 0xbbf   :  { %7597 = vmatprep.subr.bf16.mxu0 %v9091_v25 }
 0xbc2   :  { %7598 = vmatpush3.bf16.msra.mxu0 %v8117_v16 }
 0xbc3   :  { %7638 = vmatprep.subr.mxu0 %v9091_v25 }
 0xc63   :  { %v2728_v10 = vpop.f32.mrf.mxu1 }
 0xc64   :  { %v2802_v11 = vmul.f32 %v2728_v10, %v2728_v10 }
 0xc65   :  { %v7541_v26 = vpop.f32.mrf.mxu1  ;;  %v2798_v27 = vpop.f32.mrf.mxu0 }
 0xc66   :  { %v2803_v28 = vsub.f32 %v2798_v27, %v2802_v11 }
 0xc67   :  { %v7576_v29 = vpop.f32.mrf.mxu0 }
 0xc68   :  { %v2804_v60 = vmax.f32 %v2803_v28, 0.0 }
 0xc6a   :  { %v2805_v63 = vadd.f32 1e-05, %v2804_v60 }
 0xc6c   :  { %8352 = vrsqrt.f32 %v2805_v63 }
 0xc79   :  { %v8353_v30 = vpop.eup %8352 }
 0xc7a   :  { %v2807_v31 = vmul.f32 %v8353_v30, %v2644_v8 }
 0xc7c   :  { %v2812_v23 = vrot.slane %v2807_v31, %v9572_v53  ;;  %v2816_v42 = vmul.f32 %v2807_v31, %v2728_v10 }
 0xc7e   :  { %v2817_v14 = vsub.f32 %v2645_v19, %v2816_v42  ;;  %v2814_v3 = vmul.f32 %v2812_v23, %v2642_v20  ;;  %v2815_v32 = vmul.f32 %v2812_v23, %v2643_v35  ;;  %v8101_v20 = vld [vmem:[#allocation41 + $0x30] sm:$0xff]   ;;  %v8103_v35 = vld [vmem:[#allocation41 + $0x68] sm:$0xff]  }
 0xc80   :  { %v2822_v33 = vrot.slane %v2817_v14, %v9572_v53 }
 0xc82   :  { %v2824_v34 = vadd.f32 %v2822_v33, %v2814_v3  ;;  %v2825_v36 = vadd.f32 %v2822_v33, %v2815_v32 }
 0xc84   :  { %v2876_v37 = vpack.c.bf16 %v2825_v36, %v2824_v34 }
 0xc86   :  { %7577 = vmatprep.subr.bf16.mxu1 %v2876_v37 }
 0xc87   :  { %7578 = vmatpush3.bf16.msra.mxu1 %v2876_v37 }
 0xc88   :  { %6784 = vmatprep.subr.bf16.mxu1 %v8097_v38 }
 0xc8a   :  { %7580 = vmatmul.mubr.msk.bf16.vlgmr.msra.gmra.mxu1 %vm668_vm1, %v9912_v39 }
 0xc8b   :  { %3120 = vmatprep.mubr.bf16.mxu1 %v2876_v37  ;;  %6785 = vmatpush3.bf16.msra.mxu1 %v8098_v40 }
 0xc8c   :  { %6786 = vmatprep.subr.bf16.mxu1 %v8100_v12 }
 0xc8f   :  { %6787 = vmatpush3.bf16.msra.mxu1 %v8101_v20 }
 0xc90   :  { %6788 = vmatprep.subr.bf16.mxu1 %v8103_v35 }
 0xc93   :  { %6789 = vmatpush3.bf16.msra.mxu1 %v8104_v61 }
 0xc94   :  { %6790 = vmatprep.subr.bf16.mxu1 %v8106_v1 }
 0xc97   :  { %6791 = vmatpush3.bf16.msra.mxu1 %v8107_v41 }
 0xc98   :  { %6792 = vmatprep.subr.bf16.mxu1 %v8109_v13  ;;  %v8120_v13 = vld [vmem:[#allocation43 + $0xb8] sm:$0xff]  }
 0xc9b   :  { %6793 = vmatpush3.bf16.msra.mxu1 %v8110_v0  ;;  %v8123_v0 = vld [vmem:[#allocation43 + $0xb0] sm:$0xff]  }
 0xc9c   :  { %6794 = vmatprep.subr.bf16.mxu1 %v8112_v62  ;;  %v8126_v62 = vld [vmem:[#allocation43 + $0xa8] sm:$0xff]  }
 0xc9f   :  { %6795 = vmatpush3.bf16.msra.mxu1 %v8113_v2  ;;  %v8129_v2 = vld [vmem:[#allocation43 + $0xa0] sm:$0xff]  }
 0xca0   :  { %6796 = vmatprep.subr.bf16.mxu1 %v8115_v59 }
 0xca3   :  { %6797 = vmatpush3.bf16.msra.mxu1 %v8116_v15 }
 0xca4   :  { %6798 = vmatprep.subr.bf16.mxu1 %v8118_v17 }
 0xca7   :  { %6799 = vmatpush3.bf16.msra.mxu1 %v8119_v18 }
 0xca8   :  { %7603 = vmatprep.subr.mxu1 %v9091_v25 }
 0xd4a   :  { %v7581_v22 = vpop.f32.mrf.mxu1 }
 0xd4c   :  { %v2927_v7 = vpop.f32.mrf.mxu1 }
 0xd4e   :  { %v7582_v9 = vpop.f32.mrf.mxu1 }
 0xd4f   :  { %v2943_v10 = vpack.c.bf16 %v7582_v9, %v7581_v22 }
 0xd50   :  { %v2930_v11 = vpop.f32.mrf.mxu1 }
 0xd51   :  { %v2942_v26 = vpack.c.bf16 %v2930_v11, %v2927_v7  ;;  %7600 = vmatmul.mubr.bf16.vlgmr.msra.gmra.mxu0 %v2943_v10  ;;  %v3184_v10 = vld [vmem:[#allocation40] sm:$0x1] }
 0xd52   :  { %7639 = vmatpush3.msra.mxu0 %v9793_v43  ;;  %7670 = vmatprep.mubr.msk.f32.mxu0 %vm9092_vm2, %v9091_v25 }
 0xd53   :  { %3121 = vmatmul.mubr.bf16.vlgmr.msra.gmra.mxu1 %v2942_v26  ;;  %7640 = vmatprep.subr.mxu0 %v9091_v25 }
 0xd54   :  { %7604 = vmatpush3.msra.mxu1 %v9793_v43  ;;  %7641 = vmatpush3.msra.mxu0 %v9798_v44 }
 0xd55   :  { %7605 = vmatprep.subr.mxu1 %v9091_v25  ;;  %7642 = vmatprep.subr.mxu0 %v9091_v25 }
 0xd56   :  { %7606 = vmatpush3.msra.mxu1 %v9798_v44  ;;  %7643 = vmatpush3.msra.mxu0 %v9804_v45 }
 0xd57   :  { %7607 = vmatprep.subr.mxu1 %v9091_v25  ;;  %7644 = vmatprep.subr.mxu0 %v9091_v25 }
 0xd58   :  { %7608 = vmatpush3.msra.mxu1 %v9804_v45  ;;  %7645 = vmatpush3.msra.mxu0 %v9810_v46 }
 0xd59   :  { %7609 = vmatprep.subr.mxu1 %v9091_v25  ;;  %7646 = vmatprep.subr.mxu0 %v9091_v25 }
 0xd5a   :  { %7610 = vmatpush3.msra.mxu1 %v9810_v46  ;;  %7647 = vmatpush3.msra.mxu0 %v9816_v47  ;;  %v2874_v46 = vld [vmem:[%s10467_s3] sm:$0xff] }
 0xd5b   :  { %7611 = vmatprep.subr.mxu1 %v9091_v25  ;;  %7648 = vmatprep.subr.mxu0 %v9091_v25 }
 0xd5c   :  { %7612 = vmatpush3.msra.mxu1 %v9816_v47  ;;  %7649 = vmatpush3.msra.mxu0 %v9822_v48 }
 0xd5d   :  { %7613 = vmatprep.subr.mxu1 %v9091_v25  ;;  %7650 = vmatprep.subr.mxu0 %v9091_v25 }
 0xd5e   :  { %7614 = vmatpush3.msra.mxu1 %v9822_v48  ;;  %7651 = vmatpush3.msra.mxu0 %v9828_v49 }
 0xd5f   :  { %7615 = vmatprep.subr.mxu1 %v9091_v25  ;;  %7652 = vmatprep.subr.mxu0 %v9091_v25 }
 0xd60   :  { %7616 = vmatpush3.msra.mxu1 %v9828_v49  ;;  %7653 = vmatpush3.msra.mxu0 %v9834_v50 }
 0xd61   :  { %7617 = vmatprep.subr.mxu1 %v9091_v25  ;;  %7654 = vmatprep.subr.mxu0 %v9091_v25 }
 0xd62   :  { %7618 = vmatpush3.msra.mxu1 %v9834_v50  ;;  %7655 = vmatpush3.msra.mxu0 %v9840_v51 }
 0xd63   :  { %7619 = vmatprep.subr.mxu1 %v9091_v25  ;;  %7656 = vmatprep.subr.mxu0 %v9091_v25 }
 0xd64   :  { %7620 = vmatpush3.msra.mxu1 %v9840_v51  ;;  %7657 = vmatpush3.msra.mxu0 %v9843_v52 }
 0xd65   :  { %7621 = vmatprep.subr.mxu1 %v9091_v25  ;;  %7658 = vmatprep.subr.mxu0 %v9091_v25 }
 0xd66   :  { %7622 = vmatpush3.msra.mxu1 %v9843_v52  ;;  %7659 = vmatpush3.msra.mxu0 %v9849_v54 }
 0xd67   :  { %7623 = vmatprep.subr.mxu1 %v9091_v25  ;;  %7660 = vmatprep.subr.mxu0 %v9091_v25 }
 0xd68   :  { %7624 = vmatpush3.msra.mxu1 %v9849_v54  ;;  %7661 = vmatpush3.msra.mxu0 %v9855_v55  ;;  %v2875_v54 = vld [vmem:[%s10467_s3 + $0x8] sm:$0xff] }
 0xd69   :  { %7625 = vmatprep.subr.mxu1 %v9091_v25  ;;  %7662 = vmatprep.subr.mxu0 %v9091_v25 }
 0xd6a   :  { %7626 = vmatpush3.msra.mxu1 %v9855_v55  ;;  %7663 = vmatpush3.msra.mxu0 %v9861_v58 }
 0xd6b   :  { %7627 = vmatprep.subr.mxu1 %v9091_v25  ;;  %7664 = vmatprep.subr.mxu0 %v9091_v25 }
 0xd6c   :  { %7628 = vmatpush3.msra.mxu1 %v9861_v58  ;;  %7665 = vmatpush3.msra.mxu0 %v9867_v4 }
 0xd6d   :  { %7629 = vmatprep.subr.mxu1 %v9091_v25  ;;  %7666 = vmatprep.subr.mxu0 %v9091_v25 }
 0xd6e   :  { %7630 = vmatpush3.msra.mxu1 %v9867_v4  ;;  %7635 = vmatprep.mubr.msk.f32.mxu1 %vm9092_vm2, %v9091_v25 }
 0xd6f   :  { %7631 = vmatprep.subr.mxu1 %v9091_v25  ;;  %7667 = vmatpush3.msra.mxu0 %v9873_v5 }
 0xd70   :  { %7632 = vmatpush3.msra.mxu1 %v9873_v5  ;;  %7668 = vmatprep.subr.mxu0 %v9091_v25 }
 0xd71   :  { %7633 = vmatprep.subr.mxu1 %v9091_v25  ;;  %7669 = vmatpush3.msra.mxu0 %v9879_v6 }
 0xd72   :  { %7634 = vmatpush3.msra.mxu1 %v9879_v6  ;;  %7679 = vmatprep.subr.bf16.mxu0 %v9091_v25 }
 0xe11   :  { %v3163_v43 = vpop.f32.mrf.mxu0 }
 0xe13   :  { %v6800_v44 = vpop.f32.mrf.mxu1  ;;  %v7601_v45 = vpop.f32.mrf.mxu0 }
 0xe15   :  { %v6801_v47 = vpop.f32.mrf.mxu1  ;;  %v3166_v48 = vpop.f32.mrf.mxu0 }
 0xe16   :  { %v6802_v49 = vadd.f32 %v6801_v47, %v6800_v44 }
 0xe17   :  { %v6803_v50 = vpop.f32.mrf.mxu1  ;;  %v7602_v51 = vpop.f32.mrf.mxu0 }
 0xe18   :  { %v3123_v52 = vadd.f32 %v6802_v49, %v2874_v46 }
 0xe19   :  { %v6804_v55 = vpop.f32.mrf.mxu1 }
 0xe1a   :  { %v3164_v58 = vadd.f32 %v3163_v43, %v3123_v52  ;;  %v6805_v4 = vadd.f32 %v6804_v55, %v6803_v50  ;;  %v3185_v43 = vld [vmem:[#allocation37] sm:$0x1] }
 0xe1b   :  { %v8122_v55 = vld [vmem:[#allocation43 + $0x38] sm:$0xff]  }
 0xe1c   :  { %v6310_v5 = vmul.f32 -1.442695, %v3164_v58  ;;  %v3126_v27 = vadd.f32 %v6805_v4, %v2875_v54  ;;  %v8121_v54 = vld [vmem:[#allocation43 + $0x78] sm:$0xff]   ;;  %v8125_v4 = vld [vmem:[#allocation43 + $0x30] sm:$0xff]  }
 0xe1e   :  { %8354 = vpow2.f32 %v6310_v5  ;;  %v3167_v6 = vadd.f32 %v3166_v48, %v3126_v27  ;;  %v8127_v5 = vld [vmem:[#allocation43 + $0x68] sm:$0xff]  }
 0xe1f   :  { %v8128_v27 = vld [vmem:[#allocation43 + $0x28] sm:$0xff]  }
 0xe20   :  { %v6311_v28 = vmul.f32 -1.442695, %v3167_v6 }
 0xe22   :  { %8356 = vpow2.f32 %v6311_v28  ;;  %v8131_v28 = vld [vmem:[#allocation43 + $0x20] sm:$0xff]  }
 0xe2b   :  { %v8355_v29 = vpop.eup %8354 }
 0xe2c   :  { %v3176_v60 = vadd.f32 1.0, %v8355_v29  ;;  %v8133_v29 = vld [vmem:[#allocation43 + $0x58] sm:$0xff]  }
 0xe2e   :  { %8358 = vrcp.f32 %v3176_v60  ;;  %v8134_v60 = vld [vmem:[#allocation43 + $0x18] sm:$0xff]  }
 0xe2f   :  { %v8357_v63 = vpop.eup %8356 }
 0xe30   :  { %v3177_v8 = vadd.f32 1.0, %v8357_v63  ;;  %v8136_v63 = vld [vmem:[#allocation43 + $0x50] sm:$0xff]  }
 0xe32   :  { %8360 = vrcp.f32 %v3177_v8  ;;  %v8137_v8 = vld [vmem:[#allocation43 + $0x10] sm:$0xff]  }
 0xe3b   :  { %v8359_v30 = vpop.eup %8358 }
 0xe3c   :  { %v3182_v31 = vmul.f32 %v8359_v30, %v3164_v58  ;;  %v8124_v58 = vld [vmem:[#allocation43 + $0x70] sm:$0xff]   ;;  %v8139_v30 = vld [vmem:[#allocation43 + $0x48] sm:$0xff]  }
 0xe3e   :  { %v3193_v42 = vmul.f32 %v3182_v31, %v3182_v31 }
 0xe3f   :  { %v8361_v19 = vpop.eup %8360 }
 0xe40   :  { %v3183_v23 = vmul.f32 %v8361_v19, %v3167_v6  ;;  %v8130_v6 = vld [vmem:[#allocation43 + $0x60] sm:$0xff]  }
 0xe41   :  { %v8141_v19 = vld [vmem:[#allocation43 + $0x80] sm:$0xff]  }
 0xe42   :  { %v3186_v14 = vadd.f32 %v3183_v23, %v3182_v31  ;;  %v3194_v3 = vmul.f32 %v3183_v23, %v3183_v23 }
 0xe44   :  { %v3187_v32 = vrot.slane %v3186_v14, 4  ;;  %v3195_v33 = vadd.f32 %v3194_v3, %v3193_v42  ;;  %v8143_v42 = vld [vmem:[#allocation43] sm:$0xff]  }
 0xe46   :  { %v3188_v34 = vadd.f32 %v3187_v32, %v3186_v14  ;;  %v3196_v36 = vrot.slane %v3195_v33, 4  ;;  %v8146_v14 = vld [vmem:[#allocation11 + $0x74] ss:$8 sps:$4 sm:$0xff]  }
 0xe48   :  { %v3189_v37 = vrot.slane %v3188_v34, 2  ;;  %v3197_v38 = vadd.f32 %v3196_v36, %v3195_v33 }
 0xe4a   :  { %v3190_v40 = vadd.f32 %v3189_v37, %v3188_v34  ;;  %v3198_v12 = vrot.slane %v3197_v38, 2  ;;  %v8144_v37 = vld [vmem:[#allocation11 + $0x70] ss:$8 sps:$4 sm:$0xff]  }
 0xe4c   :  { %v3191_v20 = vrot.slane %v3190_v40, 1  ;;  %v3199_v35 = vadd.f32 %v3198_v12, %v3197_v38  ;;  %v8147_v12 = vld [vmem:[#allocation11 + $0x60] ss:$8 sps:$4 sm:$0xff]  }
 0xe4e   :  { %v3192_v61 = vadd.f32 %v3191_v20, %v3190_v40  ;;  %v3200_v1 = vrot.slane %v3199_v35, 1  ;;  %v8149_v40 = vld [vmem:[#allocation11 + $0x64] ss:$8 sps:$4 sm:$0xff]   ;;  %v8152_v20 = vld [vmem:[#allocation11 + $0x54] ss:$8 sps:$4 sm:$0xff]  }
 0xe50   :  { %7636 = vmatmul.mubr.f32.vlgmr.msra.gmra.mxu1 %v3192_v61  ;;  %v3201_v41 = vadd.f32 %v3200_v1, %v3199_v35  ;;  %v8150_v35 = vld [vmem:[#allocation11 + $0x50] ss:$8 sps:$4 sm:$0xff]   ;;  %v8153_v61 = vld [vmem:[#allocation11 + $0x40] ss:$8 sps:$4 sm:$0xff]   ;;  %v8155_v1 = vld [vmem:[#allocation11 + $0x44] ss:$8 sps:$4 sm:$0xff]  }
 0xe51   :  { %7675 = vmatprep.mubr.msk.bf16.mxu1 %vm668_vm1, %v9899_v24  ;;  %v8135_v24 = vld [vmem:[#allocation43 + $0x90] sm:$0xff]  }
 0xe52   :  { %7671 = vmatmul.mubr.f32.vlgmr.msra.gmra.mxu0 %v3201_v41  ;;  %v8158_v41 = vld [vmem:[#allocation11 + $0x34] ss:$8 sps:$4 sm:$0xff]  }
 0xe53   :  { %7695 = vmatprep.mubr.msk.bf16.mxu0 %vm9092_vm2, %v9091_v25  ;;  %7680 = vmatpush3.bf16.msra.mxu0 %v8120_v13  ;;  %v8156_v13 = vld [vmem:[#allocation11 + $0x30] ss:$8 sps:$4 sm:$0xff]  }
 0xe54   :  { %7681 = vmatprep.subr.bf16.mxu0 %v9091_v25 }
 0xe57   :  { %7682 = vmatpush3.bf16.msra.mxu0 %v8123_v0  ;;  %v8161_v0 = vld [vmem:[#allocation11 + $0x24] ss:$8 sps:$4 sm:$0xff]  }
 0xe58   :  { %7683 = vmatprep.subr.bf16.mxu0 %v9091_v25 }
 0xe5b   :  { %7684 = vmatpush3.bf16.msra.mxu0 %v8126_v62  ;;  %v8159_v62 = vld [vmem:[#allocation11 + $0x20] ss:$8 sps:$4 sm:$0xff]  }
 0xe5c   :  { %7685 = vmatprep.subr.bf16.mxu0 %v9091_v25 }
 0xe5f   :  { %7686 = vmatpush3.bf16.msra.mxu0 %v8129_v2  ;;  %v8164_v2 = vld [vmem:[#allocation11 + $0x14] ss:$8 sps:$4 sm:$0xff]  }
 0xe60   :  { %7687 = vmatprep.subr.bf16.mxu0 %v9091_v25 }
 0xe63   :  { %7688 = vmatpush3.bf16.msra.mxu0 %v8132_v57  ;;  %v8162_v57 = vld [vmem:[#allocation11 + $0x10] ss:$8 sps:$4 sm:$0xff]  }
 0xe64   :  { %7689 = vmatprep.subr.bf16.mxu0 %v9091_v25 }
 0xe67   :  { %7690 = vmatpush3.bf16.msra.mxu0 %v8135_v24  ;;  %v8165_v24 = vld [vmem:[#allocation11] ss:$8 sps:$4 sm:$0xff]  }
 0xe68   :  { %7691 = vmatprep.subr.bf16.mxu0 %v9091_v25 }
 0xf10   :  { %v3268_v59 = vpop.f32.mrf.mxu1 }
 0xf11   :  { %v3342_v15 = vmul.f32 %v3268_v59, %v3268_v59 }
 0xf12   :  { %v7637_v16 = vpop.f32.mrf.mxu1  ;;  %v3338_v17 = vpop.f32.mrf.mxu0 }
 0xf13   :  { %v3343_v18 = vsub.f32 %v3338_v17, %v3342_v15  ;;  %v9093_v15 = vmov 0  }
 0xf14   :  { %v7672_v22 = vpop.f32.mrf.mxu0 }
 0xf15   :  { %v3344_v7 = vmax.f32 %v3343_v18, 0.0  ;;  %v6314_v22 = vld [vmem:[#allocation34] ss:$0 sm:$0xff] }
 0xf17   :  { %v3345_v9 = vadd.f32 1e-05, %v3344_v7 }
 0xf19   :  { %8362 = vrsqrt.f32 %v3345_v9 }
 0xf26   :  { %v8363_v11 = vpop.eup %8362 }
 0xf27   :  { %v3347_v26 = vmul.f32 %v8363_v11, %v3184_v10 }
 0xf29   :  { %v3352_v44 = vrot.slane %v3347_v26, %v9572_v53  ;;  %v3356_v45 = vmul.f32 %v3347_v26, %v3268_v59  ;;  %v8167_v59 = vld [vmem:[#allocation11 + $0x4] ss:$8 sps:$4 sm:$0xff]  }
 0xf2b   :  { %v3357_v46 = vsub.f32 %v3185_v43, %v3356_v45  ;;  %v3354_v47 = vmul.f32 %v3352_v44, %v3182_v31  ;;  %v3355_v48 = vmul.f32 %v3352_v44, %v3183_v23  ;;  %v8140_v31 = vld [vmem:[#allocation43 + $0x8] sm:$0xff]   ;;  %v8142_v23 = vld [vmem:[#allocation43 + $0x40] sm:$0xff]  }
 0xf2d   :  { %v3362_v49 = vrot.slane %v3357_v46, %v9572_v53 }
 0xf2f   :  { %v3364_v50 = vadd.f32 %v3362_v49, %v3354_v47  ;;  %v3365_v51 = vadd.f32 %v3362_v49, %v3355_v48 }
 0xf31   :  { %v3415_v52 = vpack.c.bf16 %v3365_v51, %v3364_v50 }
 0xf33   :  { %7673 = vmatprep.subr.bf16.mxu1 %v3415_v52 }
 0xf34   :  { %7674 = vmatpush3.bf16.msra.mxu1 %v3415_v52 }
 0xf35   :  { %6852 = vmatprep.subr.bf16.mxu1 %v8121_v54 }
 0xf37   :  { %7676 = vmatmul.mubr.msk.bf16.vlgmr.msra.gmra.mxu1 %vm668_vm1, %v9912_v39  ;;  %v8138_v39 = vld [vmem:[#allocation43 + $0x88] sm:$0xff]  }
 0xf38   :  { %3649 = vmatprep.mubr.bf16.mxu1 %v3415_v52  ;;  %6853 = vmatpush3.bf16.msra.mxu1 %v8122_v55  ;;  %v8170_v55 = vld [vmem:[%s10468_s7 + $0xf8] sm:$0xff]  }
 0xf39   :  { %6854 = vmatprep.subr.bf16.mxu1 %v8124_v58  ;;  %7692 = vmatpush3.bf16.msra.mxu0 %v8138_v39  ;;  %v8171_v58 = vld [vmem:[%s10468_s7 + $0xb8] sm:$0xff]  }
 0xf3a   :  { %7693 = vmatprep.subr.bf16.mxu0 %v9091_v25 }
 0xf3c   :  { %6855 = vmatpush3.bf16.msra.mxu1 %v8125_v4  ;;  %v8172_v4 = vld [vmem:[%s10468_s7 + $0xf0] sm:$0xff]  }
 0xf3d   :  { %6856 = vmatprep.subr.bf16.mxu1 %v8127_v5  ;;  %7694 = vmatpush3.bf16.msra.mxu0 %v8141_v19  ;;  %v8173_v5 = vld [vmem:[%s10468_s7 + $0xb0] sm:$0xff]  }
 0xf40   :  { %6857 = vmatpush3.bf16.msra.mxu1 %v8128_v27  ;;  %v8174_v27 = vld [vmem:[%s10468_s7 + $0xe8] sm:$0xff]  }
 0xf41   :  { %6858 = vmatprep.subr.bf16.mxu1 %v8130_v6  ;;  %v8175_v6 = vld [vmem:[%s10468_s7 + $0xa8] sm:$0xff]  }
 0xf44   :  { %6859 = vmatpush3.bf16.msra.mxu1 %v8131_v28  ;;  %v8178_v28 = vld [vmem:[%s10468_s7 + $0xd8] sm:$0xff]  }
 0xf45   :  { %6860 = vmatprep.subr.bf16.mxu1 %v8133_v29  ;;  %v8179_v29 = vld [vmem:[%s10468_s7 + $0x98] sm:$0xff]  }
 0xf48   :  { %6861 = vmatpush3.bf16.msra.mxu1 %v8134_v60  ;;  %v8180_v60 = vld [vmem:[%s10468_s7 + $0xd0] sm:$0xff]  }
 0xf49   :  { %6862 = vmatprep.subr.bf16.mxu1 %v8136_v63  ;;  %v8181_v63 = vld [vmem:[%s10468_s7 + $0x90] sm:$0xff]  }
 0xf4c   :  { %6863 = vmatpush3.bf16.msra.mxu1 %v8137_v8 }
 0xf4d   :  { %6864 = vmatprep.subr.bf16.mxu1 %v8139_v30 }
 0xf50   :  { %6865 = vmatpush3.bf16.msra.mxu1 %v8140_v31 }
 0xf51   :  { %6866 = vmatprep.subr.bf16.mxu1 %v8142_v23 }
 0xf54   :  { %6867 = vmatpush3.bf16.msra.mxu1 %v8143_v42  ;;  %v8168_v42 = vld [vmem:[%s10469_s10] sm:$0xff]  }
 0xf55   :  { %3800 = vmatprep.subr.bf16.mxu1 %v8146_v14  ;;  %v8169_v14 = vld [vmem:[%s10469_s10 + $0x8] sm:$0xff]  }
 0xff7   :  { %v7677_v3 = vpop.f32.mrf.mxu1 }
 0xff9   :  { %v3450_v32 = vpop.f32.mrf.mxu1 }
 0xffb   :  { %v7678_v33 = vpop.f32.mrf.mxu1 }
 0xffc   :  { %v3466_v34 = vpack.c.bf16 %v7678_v33, %v7677_v3  ;;  %v8182_v3 = vld [vmem:[%s10468_s7 + $0xc8] sm:$0xff]   ;;  %v8184_v33 = vld [vmem:[%s10468_s7 + $0xc0] sm:$0xff]  }
 0xffd   :  { %v3453_v36 = vpop.f32.mrf.mxu1 }
 0xffe   :  { %v3465_v38 = vpack.c.bf16 %v3453_v36, %v3450_v32  ;;  %7696 = vmatmul.mubr.bf16.vlgmr.msra.gmra.mxu0 %v3466_v34  ;;  %v8183_v32 = vld [vmem:[%s10468_s7 + $0x88] sm:$0xff]   ;;  %v8185_v34 = vld [vmem:[%s10468_s7 + $0x80] sm:$0xff]  }
 0xfff   :  { %3897 = vmatprep.mubr.bf16.mxu0 %v9093_v15 }
0x1000   :  { %3650 = vmatmul.mubr.bf16.vlgmr.msra.gmra.mxu1 %v3465_v38 }
0x1001   :  { %3801 = vmatpush1.bf16.msra.mxu1 %v8144_v37  ;;  %3832 = vmatprep.mubr.bf16.mxu1 %v9093_v15 }
0x1002   :  { %3802 = vmatprep.subr.bf16.mxu1 %v8149_v40 }
0x1005   :  { %3803 = vmatpush1.bf16.msra.mxu1 %v8147_v12 }
0x1006   :  { %3804 = vmatprep.subr.bf16.mxu1 %v8152_v20 }
0x1009   :  { %3805 = vmatpush1.bf16.msra.mxu1 %v8150_v35 }
0x100a   :  { %3806 = vmatprep.subr.bf16.mxu1 %v8155_v1  ;;  %v10032_v1 = vld [vmem:[#allocation2 + $0x78] sm:$0xff] }
0x100d   :  { %3807 = vmatpush1.bf16.msra.mxu1 %v8153_v61 }
0x100e   :  { %3808 = vmatprep.subr.bf16.mxu1 %v8158_v41 }
0x1011   :  { %3809 = vmatpush1.bf16.msra.mxu1 %v8156_v13  ;;  %v10036_v13 = vld [vmem:[#allocation2 + $0x70] sm:$0xff] }
0x1012   :  { %3810 = vmatprep.subr.bf16.mxu1 %v8161_v0 }
0x1015   :  { %3811 = vmatpush1.bf16.msra.mxu1 %v8159_v62 }
0x1016   :  { %3812 = vmatprep.subr.bf16.mxu1 %v8164_v2  ;;  %v10040_v2 = vld [vmem:[#allocation2 + $0x68] sm:$0xff] }
0x1019   :  { %3813 = vmatpush1.bf16.msra.mxu1 %v8162_v57 }
0x101a   :  { %3814 = vmatprep.subr.bf16.mxu1 %v8167_v59  ;;  %v10045_v59 = vld [vmem:[#allocation2 + $0x60] sm:$0xff] }
0x101d   :  { %3815 = vmatpush1.bf16.msra.mxu1 %v8165_v24  ;;  %v8186_v24 = vld [vmem:[%s10468_s7 + $0x78] sm:$0xff]  }
0x101e   :  { %6911 = vmatprep.subr.bf16.mxu1 %v8170_v55  ;;  %v8191_v55 = vld [vmem:[%s10468_s7 + $0x28] sm:$0xff]  }
0x10be   :  { %v3692_v16 = vpop.f32.mrf.mxu0 }
0x10c0   :  { %v6868_v17 = vpop.f32.mrf.mxu1  ;;  %v7697_v18 = vpop.f32.mrf.mxu0 }
0x10c1   :  { %v8188_v18 = vld [vmem:[%s10468_s7 + $0x70] sm:$0xff]  }
0x10c2   :  { %v6869_v7 = vpop.f32.mrf.mxu1  ;;  %v3695_v9 = vpop.f32.mrf.mxu0 }
0x10c3   :  { %v6870_v10 = vadd.f32 %v6869_v7, %v6868_v17  ;;  %v8187_v17 = vld [vmem:[%s10468_s7 + $0x38] sm:$0xff]   ;;  %v10062_v7 = vld [vmem:[%s10462_s25] sm:$0xff]  }
0x10c4   :  { %v6871_v11 = vpop.f32.mrf.mxu1  ;;  %v7698_v26 = vpop.f32.mrf.mxu0 }
0x10c5   :  { %v3652_v43 = vadd.f32 %v6870_v10, %v6314_v22  ;;  %v8189_v10 = vld [vmem:[%s10468_s7 + $0x30] sm:$0xff]   ;;  %v10073_v26 = vld [vmem:[#allocation2 + $0x40] sm:$0xff] }
0x10c6   :  { %v6872_v44 = vpop.f32.mrf.mxu1 }
0x10c7   :  { %v3693_v45 = vadd.f32 %v3692_v16, %v3652_v43  ;;  %v6873_v46 = vadd.f32 %v6872_v44, %v6871_v11  ;;  %v10051_v16 = vld [vmem:[#allocation2 + $0x58] sm:$0xff]  ;;  %v8190_v11 = vld [vmem:[%s10468_s7 + $0x68] sm:$0xff]   ;;  %v10081_v44 = vld [vmem:[#allocation2 + $0x30] sm:$0xff] }
0x10c8   :  { %v10077_v43 = vld [vmem:[#allocation2 + $0x38] sm:$0xff] }
0x10c9   :  { %v3655_v47 = vadd.f32 %v6873_v46, %v6314_v22  ;;  %v3699_v48 = vadd.f32 %v3693_v45, %v9888_v56  ;;  %v10057_v22 = vld [vmem:[#allocation2 + $0x50] sm:$0xff]  ;;  %v10085_v45 = vld [vmem:[%s10462_s25 + $0x8] sm:$0xff]  }
0x10ca   :  { %v10091_v46 = vld [vmem:[#allocation2 + $0x28] sm:$0xff] }
0x10cb   :  { %v3696_v49 = vadd.f32 %v3695_v9, %v3655_v47  ;;  %v3701_v51 = vadd.f32 %v3699_v48, %v9888_v56  ;;  %v8176_v56 = vld [vmem:[%s10468_s7 + $0xe0] sm:$0xff]   ;;  %v10066_v9 = vld [vmem:[#allocation2 + $0x48] sm:$0xff]  ;;  %v10099_v48 = vld [vmem:[#allocation2 + $0x18] sm:$0xff] }
0x10cc   :  { %v10095_v47 = vld [vmem:[#allocation2 + $0x20] sm:$0xff] }
0x10cd   :  { %v3700_v50 = vadd.f32 %v3696_v49, %v9891_v21  ;;  %v10103_v49 = vld [vmem:[#allocation2 + $0x10] sm:$0xff] }
0x10cf   :  { %v3702_v52 = vadd.f32 %v3700_v50, %v9891_v21  ;;  %v8177_v21 = vld [vmem:[%s10468_s7 + $0xa0] sm:$0xff]   ;;  %v10107_v50 = vld [vmem:[%s10462_s25 + $0x10] sm:$0xff]  }
0x10d1   :  { %v3703_v54 = vpack.c.bf16 %v3702_v52, %v3701_v51  ;;  %v10113_v51 = vld [vmem:[#allocation2 + $0x8] sm:$0xff]  ;;  %v10117_v52 = vld [vmem:[#allocation2] sm:$0xff] }
0x10d3   :  { %3833 = vmatmul.mubr.bf16.vlgmr.msra.gmra.mxu1 %v3703_v54  ;;  %v10121_v54 = vld [vmem:[%s10462_s25 + $0x18] sm:$0xff]  }
0x10d4   :  { %6912 = vmatpush3.bf16.msra.mxu1 %v8171_v58  ;;  %v8193_v58 = vld [vmem:[%s10468_s7 + $0x20] sm:$0xff]  }
0x10d5   :  { %6913 = vmatprep.subr.bf16.mxu1 %v8172_v4  ;;  %v8194_v4 = vld [vmem:[%s10468_s7 + $0x58] sm:$0xff]  }
0x10d8   :  { %6914 = vmatpush3.bf16.msra.mxu1 %v8173_v5  ;;  %v8195_v5 = vld [vmem:[%s10468_s7 + $0x18] sm:$0xff]  }
0x10d9   :  { %6915 = vmatprep.subr.bf16.mxu1 %v8174_v27  ;;  %v8196_v27 = vld [vmem:[%s10468_s7 + $0x50] sm:$0xff]  }
0x10dc   :  { %6916 = vmatpush3.bf16.msra.mxu1 %v8175_v6  ;;  %v8197_v6 = vld [vmem:[%s10468_s7 + $0x10] sm:$0xff]  }
0x10dd   :  { %6917 = vmatprep.subr.bf16.mxu1 %v8176_v56  ;;  %v8198_v56 = vld [vmem:[%s10468_s7 + $0x48] sm:$0xff]  }
0x10e0   :  { %6918 = vmatpush3.bf16.msra.mxu1 %v8177_v21  ;;  %v8199_v21 = vld [vmem:[%s10468_s7 + $0x8] sm:$0xff]  }
0x10e1   :  { %6919 = vmatprep.subr.bf16.mxu1 %v8178_v28  ;;  %v8200_v28 = vld [vmem:[%s10468_s7 + $0x40] sm:$0xff]  }
0x10e4   :  { %6920 = vmatpush3.bf16.msra.mxu1 %v8179_v29  ;;  %v8201_v29 = vld [vmem:[%s10468_s7] sm:$0xff]  }
0x10e5   :  { %6921 = vmatprep.subr.bf16.mxu1 %v8180_v60  ;;  %v8202_v60 = vld [vmem:[%s10468_s7 + $0x178] sm:$0xff]  }
0x10e8   :  { %6922 = vmatpush3.bf16.msra.mxu1 %v8181_v63 }
0x10e9   :  { %6923 = vmatprep.subr.bf16.mxu1 %v8182_v3 }
0x10ec   :  { %6924 = vmatpush3.bf16.msra.mxu1 %v8183_v32  ;;  %v8205_v32 = vld [vmem:[%s10468_s7 + $0x130] sm:$0xff]  }
0x10ed   :  { %6925 = vmatprep.subr.bf16.mxu1 %v8184_v33 }
0x10f0   :  { %6926 = vmatpush3.bf16.msra.mxu1 %v8185_v34  ;;  %v8206_v34 = vld [vmem:[%s10468_s7 + $0x168] sm:$0xff]  }
0x10f1   :  { %7699 = vmatprep.subr.mxu1 %v9091_v25 }
0x1193   :  { %v3834_v8 = vpop.f32.mrf.mxu1 }
0x1195   :  { %v3836_v39 = vpop.f32.mrf.mxu1 }
0x1197   :  { %v3838_v30 = vpop.f32.mrf.mxu1 }
0x1198   :  { %v3843_v23 = vpack.c.bf16 %v3838_v30, %v3834_v8 }
0x1199   :  { %v3840_v31 = vpop.f32.mrf.mxu1 }
0x119a   :  { %v3844_v19 = vpack.c.bf16 %v3840_v31, %v3836_v39 }
0x119c   :  { %3879 = vmatprep.subr.bf16.mxu0 %v3844_v19  ;;  %v8203_v19 = vld [vmem:[%s10468_s7 + $0x138] sm:$0xff]  }
0x119d   :  { %3880 = vmatpush1.bf16.msra.mxu0 %v3843_v23 }
0x11a0   :  { %6357 = vmatmul.mubr.msk.bf16.vlgmr.msra.gmra.mxu0 %vm668_vm1, %v8168_v42 }
0x11a1   :  { %3907 = vmatprep.mubr.bf16.mxu0 %v9093_v15 }
0x11a8   :  { %6358 = vmatmul.mubr.msk.bf16.gmra.mxu0 %vm668_vm1, %v8169_v14  ;;  %v8204_v14 = vld [vmem:[%s10468_s7 + $0x170] sm:$0xff]  }
0x11a9   :  { %4051 = vmatprep.mubr.bf16.mxu0 %v9093_v15 }
0x1260   :  { %v3899_v36 = vpop.f32.mrf.mxu0 }
0x1262   :  { %v3901_v37 = vpop.f32.mrf.mxu0 }
0x1264   :  { %v3903_v38 = vpop.f32.mrf.mxu0 }
0x1265   :  { %v4015_v20 = vpack.c.bf16 %v3903_v38, %v3899_v36 }
0x1266   :  { %v3905_v40 = vpop.f32.mrf.mxu0 }
0x1267   :  { %v4016_v12 = vpack.c.bf16 %v3905_v40, %v3901_v37  ;;  %v8207_v40 = vld [vmem:[%s10468_s7 + $0x128] sm:$0xff]  }
0x1268   :  { %v3909_v35 = vpop.f32.mrf.mxu0 }
0x1269   :  { %4475 = vmatprep.mubr.bf16.mxu1 %v4016_v12 }
0x126a   :  { %v3911_v61 = vpop.f32.mrf.mxu0  ;;  %4476 = vmatmul.mubr.bf16.vlgmr.msra.gmra.mxu1 %v4015_v20 }
0x126b   :  { %7700 = vmatpush3.msra.mxu1 %v10032_v1 }
0x126c   :  { %v3913_v41 = vpop.f32.mrf.mxu0  ;;  %7701 = vmatprep.subr.mxu1 %v9091_v25 }
0x126d   :  { %7702 = vmatpush3.msra.mxu1 %v10036_v13  ;;  %v4017_v57 = vpack.c.bf16 %v3913_v41, %v3909_v35  ;;  %v8210_v41 = vld [vmem:[%s10468_s7 + $0x158] sm:$0xff]  }
0x126e   :  { %v3915_v0 = vpop.f32.mrf.mxu0  ;;  %7703 = vmatprep.subr.mxu1 %v9091_v25 }
0x126f   :  { %v4018_v62 = vpack.c.bf16 %v3915_v0, %v3911_v61  ;;  %7704 = vmatpush3.msra.mxu1 %v10040_v2  ;;  %v8209_v61 = vld [vmem:[%s10468_s7 + $0x120] sm:$0xff]  }
0x1270   :  { %7705 = vmatprep.subr.mxu1 %v9091_v25 }
0x1271   :  { %4031 = vmatprep.subr.bf16.mxu0 %v4018_v62  ;;  %4483 = vmatprep.mubr.bf16.mxu1 %v4018_v62 }
0x1272   :  { %4032 = vmatpush1.bf16.msra.mxu0 %v4017_v57  ;;  %4484 = vmatmul.mubr.bf16.gmra.mxu1 %v4017_v57  ;;  %v8211_v57 = vld [vmem:[%s10468_s7 + $0x118] sm:$0xff]  }
0x1273   :  { %4033 = vmatprep.subr.bf16.mxu0 %v4016_v12  ;;  %7706 = vmatpush3.msra.mxu1 %v10045_v59  ;;  %v8208_v12 = vld [vmem:[%s10468_s7 + $0x160] sm:$0xff]  }
0x1274   :  { %7707 = vmatprep.subr.mxu1 %v9091_v25  ;;  %7731 = vmatprep.mubr.msk.f32.mxu1 %vm9092_vm2, %v9091_v25 }
0x1275   :  { %7708 = vmatpush3.msra.mxu1 %v10051_v16 }
0x1276   :  { %4034 = vmatpush1.bf16.msra.mxu0 %v4015_v20  ;;  %7709 = vmatprep.subr.mxu1 %v9091_v25 }
0x1277   :  { %6883 = vmatprep.subr.bf16.mxu0 %v8186_v24  ;;  %7710 = vmatpush3.msra.mxu1 %v10057_v22 }
0x1278   :  { %7711 = vmatprep.subr.mxu1 %v9091_v25 }
0x1279   :  { %6359 = vmatmul.mubr.msk.bf16.vlgmr.msra.gmra.mxu0 %vm580_vm0, %v10062_v7  ;;  %7712 = vmatpush3.msra.mxu1 %v10066_v9 }
0x127a   :  { %4061 = vmatprep.mubr.bf16.mxu0 %v9093_v15  ;;  %6884 = vmatpush3.bf16.msra.mxu0 %v8187_v17  ;;  %v8212_v17 = vld [vmem:[%s10468_s7 + $0x150] sm:$0xff]  }
0x127b   :  { %6885 = vmatprep.subr.bf16.mxu0 %v8188_v18  ;;  %7713 = vmatprep.subr.mxu1 %v9091_v25 }
0x127c   :  { %7714 = vmatpush3.msra.mxu1 %v10073_v26 }
0x127d   :  { %7715 = vmatprep.subr.mxu1 %v9091_v25 }
0x127e   :  { %6886 = vmatpush3.bf16.msra.mxu0 %v8189_v10  ;;  %7716 = vmatpush3.msra.mxu1 %v10077_v43  ;;  %v8213_v10 = vld [vmem:[%s10468_s7 + $0x110] sm:$0xff]  }
0x127f   :  { %6887 = vmatprep.subr.bf16.mxu0 %v8190_v11  ;;  %7717 = vmatprep.subr.mxu1 %v9091_v25  ;;  %v8214_v11 = vld [vmem:[%s10468_s7 + $0x148] sm:$0xff]  }
0x1280   :  { %7718 = vmatpush3.msra.mxu1 %v10081_v44 }
0x1281   :  { %6360 = vmatmul.mubr.msk.bf16.gmra.mxu0 %vm580_vm0, %v10085_v45  ;;  %7719 = vmatprep.subr.mxu1 %v9091_v25 }
0x1282   :  { %4071 = vmatprep.mubr.bf16.mxu0 %v9093_v15  ;;  %7720 = vmatpush3.msra.mxu1 %v10091_v46 }
0x1283   :  { %7721 = vmatprep.subr.mxu1 %v9091_v25  ;;  %6888 = vmatpush3.bf16.msra.mxu0 %v8191_v55 }
0x1284   :  { %7722 = vmatpush3.msra.mxu1 %v10095_v47 }
0x1285   :  { %7723 = vmatprep.subr.mxu1 %v9091_v25 }
0x1286   :  { %7724 = vmatpush3.msra.mxu1 %v10099_v48 }
0x1287   :  { %7725 = vmatprep.subr.mxu1 %v9091_v25 }
0x1288   :  { %7726 = vmatpush3.msra.mxu1 %v10103_v49 }
0x1289   :  { %6361 = vmatmul.mubr.msk.bf16.gmra.mxu0 %vm580_vm0, %v10107_v50  ;;  %7727 = vmatprep.subr.mxu1 %v9091_v25 }
0x128a   :  { %4081 = vmatprep.mubr.bf16.mxu0 %v9093_v15  ;;  %7728 = vmatpush3.msra.mxu1 %v10113_v51  ;;  %v8192_v15 = vld [vmem:[%s10468_s7 + $0x60] sm:$0xff]  }
0x128b   :  { %7729 = vmatprep.subr.mxu1 %v9091_v25  ;;  %6889 = vmatprep.subr.bf16.mxu0 %v8192_v15  ;;  %v8215_v15 = vld [vmem:[%s10468_s7 + $0x108] sm:$0xff]  }
0x128c   :  { %7730 = vmatpush3.msra.mxu1 %v10117_v52  ;;  %6890 = vmatpush3.bf16.msra.mxu0 %v8193_v58 }
0x128d   :  { %6891 = vmatprep.subr.bf16.mxu0 %v8194_v4  ;;  %v8216_v4 = vld [vmem:[%s10468_s7 + $0x140] sm:$0xff]  }
0x1290   :  { %6892 = vmatpush3.bf16.msra.mxu0 %v8195_v5  ;;  %v8217_v5 = vld [vmem:[%s10468_s7 + $0x100] sm:$0xff]  }
0x1291   :  { %6362 = vmatmul.mubr.msk.bf16.gmra.mxu0 %vm580_vm0, %v10121_v54  ;;  %6893 = vmatprep.subr.bf16.mxu0 %v8196_v27 }
0x1294   :  { %6894 = vmatpush3.bf16.msra.mxu0 %v8197_v6 }
0x1295   :  { %6895 = vmatprep.subr.bf16.mxu0 %v8198_v56 }
0x1298   :  { %6896 = vmatpush3.bf16.msra.mxu0 %v8199_v21 }
0x1299   :  { %6897 = vmatprep.subr.bf16.mxu0 %v8200_v28 }
0x129c   :  { %6898 = vmatpush3.bf16.msra.mxu0 %v8201_v29 }
0x129d   :  { %6939 = vmatprep.subr.bf16.mxu0 %v8202_v60 }
0x1339   :  { %v4053_v63 = vpop.f32.mrf.mxu0 }
0x133b   :  { %v4055_v8 = vpop.f32.mrf.mxu0 }
0x133d   :  { %v4057_v39 = vpop.f32.mrf.mxu0 }
0x133e   :  { %v4092_v23 = vpack.c.bf16 %v4057_v39, %v4053_v63  ;;  %v6927_v63 = vpop.f32.mrf.mxu1 }
0x133f   :  { %v4059_v30 = vpop.f32.mrf.mxu0 }
0x1340   :  { %v4093_v31 = vpack.c.bf16 %v4059_v30, %v4055_v8  ;;  %v6928_v39 = vpop.f32.mrf.mxu1 }
0x1341   :  { %v4063_v42 = vpop.f32.mrf.mxu0 }
0x1342   :  { %4426 = vmatprep.mubr.bf16.mxu0 %v4093_v31  ;;  %v6930_v31 = vpop.f32.mrf.mxu1 }
0x1343   :  { %v4065_v3 = vpop.f32.mrf.mxu0  ;;  %4427 = vmatmul.mubr.bf16.vlgmr.msra.gmra.mxu0 %v4092_v23 }
0x1344   :  { %6940 = vmatpush3.bf16.msra.mxu0 %v8203_v19  ;;  %v6931_v23 = vpop.f32.mrf.mxu1 }
0x1345   :  { %v4067_v33 = vpop.f32.mrf.mxu0  ;;  %6941 = vmatprep.subr.bf16.mxu0 %v8204_v14 }
0x1346   :  { %v4094_v36 = vpack.c.bf16 %v4067_v33, %v4063_v42 }
0x1347   :  { %v4069_v37 = vpop.f32.mrf.mxu0 }
0x1348   :  { %v4095_v38 = vpack.c.bf16 %v4069_v37, %v4065_v3  ;;  %6942 = vmatpush3.bf16.msra.mxu0 %v8205_v32  ;;  %v6363_v3 = vld [vmem:[#allocation13] ss:$0 sm:$0xff]  ;;  %v6933_v32 = vpop.f32.mrf.mxu1 }
0x1349   :  { %6943 = vmatprep.subr.bf16.mxu0 %v8206_v34  ;;  %v4073_v20 = vpop.f32.mrf.mxu0 }
0x134a   :  { %4434 = vmatprep.mubr.bf16.mxu0 %v4095_v38  ;;  %v6929_v38 = vadd.f32 %v6928_v39, %v6927_v63 }
0x134b   :  { %4435 = vmatmul.mubr.bf16.gmra.mxu0 %v4094_v36  ;;  %v4075_v35 = vpop.f32.mrf.mxu0 }
0x134c   :  { %6944 = vmatpush3.bf16.msra.mxu0 %v8207_v40  ;;  %v6934_v40 = vpop.f32.mrf.mxu1 }
0x134d   :  { %6945 = vmatprep.subr.bf16.mxu0 %v8208_v12  ;;  %v4077_v0 = vpop.f32.mrf.mxu0 }
0x134e   :  { %v4096_v56 = vpack.c.bf16 %v4077_v0, %v4073_v20  ;;  %v6932_v0 = vadd.f32 %v6931_v23, %v6930_v31 }
0x134f   :  { %v4079_v62 = vpop.f32.mrf.mxu0 }
0x1350   :  { %6946 = vmatpush3.bf16.msra.mxu0 %v8209_v61  ;;  %v4097_v24 = vpack.c.bf16 %v4079_v62, %v4075_v35 }
0x1351   :  { %6947 = vmatprep.subr.bf16.mxu0 %v8210_v41  ;;  %v4083_v18 = vpop.f32.mrf.mxu0 }
0x1352   :  { %4524 = vmatprep.mubr.bf16.mxu0 %v4097_v24  ;;  %v6936_v24 = vpop.f32.mrf.mxu1 }
0x1353   :  { %v4085_v55 = vpop.f32.mrf.mxu0 }
0x1354   :  { %6948 = vmatpush3.bf16.msra.mxu0 %v8211_v57 }
0x1355   :  { %6949 = vmatprep.subr.bf16.mxu0 %v8212_v17  ;;  %v4087_v58 = vpop.f32.mrf.mxu0 }
0x1356   :  { %v4098_v21 = vpack.c.bf16 %v4087_v58, %v4083_v18 }
0x1357   :  { %v4089_v27 = vpop.f32.mrf.mxu0 }
0x1358   :  { %6950 = vmatpush3.bf16.msra.mxu0 %v8213_v10  ;;  %v4099_v6 = vpack.c.bf16 %v4089_v27, %v4085_v55  ;;  %v6937_v27 = vpop.f32.mrf.mxu1 }
0x1359   :  { %6951 = vmatprep.subr.bf16.mxu0 %v8214_v11  ;;  %v6938_v63 = vadd.f32 %v6937_v27, %v6936_v24 }
0x135c   :  { %6952 = vmatpush3.bf16.msra.mxu0 %v8215_v15 }
0x135d   :  { %6953 = vmatprep.subr.bf16.mxu0 %v8216_v4  ;;  %v6935_v4 = vadd.f32 %v6934_v40, %v6933_v32 }
0x1360   :  { %6954 = vmatpush3.bf16.msra.mxu0 %v8217_v5 }
0x1361   :  { %7734 = vmatprep.subr.mxu0 %v9091_v25 }
0x1363   :  { %4525 = vmatmul.mubr.bf16.vlgmr.msra.gmra.mxu0 %v4096_v56 }
0x1364   :  { %4532 = vmatprep.mubr.bf16.mxu0 %v4099_v6  ;;  %7735 = vmatpush3.msra.mxu0 %v10032_v1 }
0x1365   :  { %7736 = vmatprep.subr.mxu0 %v9091_v25 }
0x1366   :  { %7737 = vmatpush3.msra.mxu0 %v10036_v13 }
0x1367   :  { %7738 = vmatprep.subr.mxu0 %v9091_v25 }
0x1368   :  { %7739 = vmatpush3.msra.mxu0 %v10040_v2 }
0x1369   :  { %7740 = vmatprep.subr.mxu0 %v9091_v25 }
0x136a   :  { %7741 = vmatpush3.msra.mxu0 %v10045_v59 }
0x136b   :  { %4533 = vmatmul.mubr.bf16.gmra.mxu0 %v4098_v21  ;;  %7742 = vmatprep.subr.mxu0 %v9091_v25 }
0x136c   :  { %7743 = vmatpush3.msra.mxu0 %v10051_v16  ;;  %7766 = vmatprep.mubr.msk.f32.mxu0 %vm9092_vm2, %v9091_v25 }
0x136d   :  { %7744 = vmatprep.subr.mxu0 %v9091_v25 }
0x136e   :  { %7745 = vmatpush3.msra.mxu0 %v10057_v22 }
0x136f   :  { %7746 = vmatprep.subr.mxu0 %v9091_v25 }
0x1370   :  { %7747 = vmatpush3.msra.mxu0 %v10066_v9 }
0x1371   :  { %7748 = vmatprep.subr.mxu0 %v9091_v25 }
0x1372   :  { %7749 = vmatpush3.msra.mxu0 %v10073_v26 }
0x1373   :  { %7750 = vmatprep.subr.mxu0 %v9091_v25 }
0x1374   :  { %7751 = vmatpush3.msra.mxu0 %v10077_v43 }
0x1375   :  { %7752 = vmatprep.subr.mxu0 %v9091_v25 }
0x1376   :  { %7753 = vmatpush3.msra.mxu0 %v10081_v44 }
0x1377   :  { %7754 = vmatprep.subr.mxu0 %v9091_v25 }
0x1378   :  { %7755 = vmatpush3.msra.mxu0 %v10091_v46 }
0x1379   :  { %7756 = vmatprep.subr.mxu0 %v9091_v25 }
0x137a   :  { %7757 = vmatpush3.msra.mxu0 %v10095_v47 }
0x137b   :  { %7758 = vmatprep.subr.mxu0 %v9091_v25 }
0x137c   :  { %7759 = vmatpush3.msra.mxu0 %v10099_v48 }
0x137d   :  { %7760 = vmatprep.subr.mxu0 %v9091_v25 }
0x137e   :  { %7761 = vmatpush3.msra.mxu0 %v10103_v49 }
0x137f   :  { %7762 = vmatprep.subr.mxu0 %v9091_v25 }
0x1380   :  { %7763 = vmatpush3.msra.mxu0 %v10113_v51 }
0x1381   :  { %7764 = vmatprep.subr.mxu0 %v9091_v25 }
0x1382   :  { %7765 = vmatpush3.msra.mxu0 %v10117_v52 }
0x1403   :  { %v6899_v28 = vpop.f32.mrf.mxu0 }
0x1405   :  { %v6900_v29 = vpop.f32.mrf.mxu0 }
0x1406   :  { %v6901_v14 = vadd.f32 %v6900_v29, %v6899_v28 }
0x1407   :  { %v6902_v60 = vpop.f32.mrf.mxu0 }
0x1408   :  { %v4429_v36 = vadd.f32 %v6901_v14, %v6363_v3 }
0x1409   :  { %v6903_v8 = vpop.f32.mrf.mxu0 }
0x140a   :  { %v6904_v33 = vadd.f32 %v6903_v8, %v6902_v60  ;;  %v4478_v61 = vadd.f32 %v6929_v38, %v4429_v36 }
0x140b   :  { %v6905_v30 = vpop.f32.mrf.mxu0 }
0x140c   :  { %v4432_v12 = vadd.f32 %v6904_v33, %v6363_v3 }
0x140d   :  { %v6906_v19 = vpop.f32.mrf.mxu0 }
0x140e   :  { %v6907_v35 = vadd.f32 %v6906_v19, %v6905_v30  ;;  %v4481_v17 = vadd.f32 %v6932_v0, %v4432_v12 }
0x140f   :  { %v6908_v42 = vpop.f32.mrf.mxu0 }
0x1410   :  { %v4437_v10 = vadd.f32 %v6907_v35, %v6363_v3 }
0x1411   :  { %v6909_v34 = vpop.f32.mrf.mxu0 }
0x1412   :  { %v6910_v11 = vadd.f32 %v6909_v34, %v6908_v42  ;;  %v4486_v28 = vadd.f32 %v6935_v4, %v4437_v10 }
0x1414   :  { %v4440_v56 = vadd.f32 %v6910_v11, %v6363_v3 }
0x1416   :  { %v4489_v31 = vadd.f32 %v6938_v63, %v4440_v56 }
0x1423   :  { %v6955_v37 = vpop.f32.mrf.mxu0 }
0x1425   :  { %v6956_v20 = vpop.f32.mrf.mxu0 }
0x1426   :  { %v6957_v41 = vadd.f32 %v6956_v20, %v6955_v37 }
0x1427   :  { %v6958_v62 = vpop.f32.mrf.mxu0 }
0x1428   :  { %v10186_v57 = vadd.f32 %v6957_v41, %v4478_v61 }
0x1429   :  { %v6959_v18 = vpop.f32.mrf.mxu0 }
0x142a   :  { %v6412_v55 = vmul.f32 -1.442695, %v10186_v57  ;;  %v6960_v15 = vadd.f32 %v6959_v18, %v6958_v62 }
0x142b   :  { %v6961_v58 = vpop.f32.mrf.mxu0 }
0x142c   :  { %8364 = vpow2.f32 %v6412_v55  ;;  %v10189_v5 = vadd.f32 %v6960_v15, %v4481_v17 }
0x142d   :  { %v6962_v6 = vpop.f32.mrf.mxu0 }
0x142e   :  { %v6413_v21 = vmul.f32 -1.442695, %v10189_v5  ;;  %v6963_v29 = vadd.f32 %v6962_v6, %v6961_v58 }
0x142f   :  { %v6964_v60 = vpop.f32.mrf.mxu0 }
0x1430   :  { %8366 = vpow2.f32 %v6413_v21  ;;  %v10192_v8 = vadd.f32 %v6963_v29, %v4486_v28 }
0x1431   :  { %v6965_v39 = vpop.f32.mrf.mxu0 }
0x1432   :  { %v6414_v30 = vmul.f32 -1.442695, %v10192_v8  ;;  %v6966_v19 = vadd.f32 %v6965_v39, %v6964_v60 }
0x1434   :  { %8368 = vpow2.f32 %v6414_v30  ;;  %v10195_v23 = vadd.f32 %v6966_v19, %v4489_v31 }
0x1436   :  { %v6415_v42 = vmul.f32 -1.442695, %v10195_v23 }
0x1438   :  { %8370 = vpow2.f32 %v6415_v42 }
0x1439   :  { %v8365_v14 = vpop.eup %8364 }
0x143a   :  { %v4553_v3 = vadd.f32 1.0, %v8365_v14  ;;  %v8224_v14 = vld [vmem:[%s10470_s11 + $0xb8] sm:$0xff]  }
0x143b   :  { %7781 = vmatprep.subr.bf16.mxu0 %v8224_v14 }
0x143c   :  { %8372 = vrcp.f32 %v4553_v3  ;;  %v8227_v3 = vld [vmem:[%s10470_s11 + $0xb0] sm:$0xff]  }
0x143d   :  { %v8367_v32 = vpop.eup %8366 }
0x143e   :  { %v4554_v33 = vadd.f32 1.0, %v8367_v32  ;;  %v8230_v32 = vld [vmem:[%s10470_s11 + $0xa8] sm:$0xff]  }
0x1440   :  { %8374 = vrcp.f32 %v4554_v33  ;;  %v8233_v33 = vld [vmem:[%s10470_s11 + $0xa0] sm:$0xff]  }
0x1441   :  { %v8369_v34 = vpop.eup %8368 }
0x1442   :  { %v4555_v36 = vadd.f32 1.0, %v8369_v34 }
0x1444   :  { %8376 = vrcp.f32 %v4555_v36 }
0x1445   :  { %v8371_v37 = vpop.eup %8370 }
0x1446   :  { %v4556_v38 = vadd.f32 1.0, %v8371_v37 }
0x1448   :  { %8378 = vrcp.f32 %v4556_v38 }
0x1449   :  { %v8373_v40 = vpop.eup %8372 }
0x144a   :  { %v4565_v35 = vmul.f32 %v8373_v40, %v10186_v57 }
0x144c   :  { %v4580_v62 = vmul.f32 %v4565_v35, %v4565_v35 }
0x144d   :  { %v8375_v12 = vpop.eup %8374 }
0x144e   :  { %v10199_v20 = vmul.f32 %v8375_v12, %v10189_v5 }
0x1450   :  { %v4581_v41 = vmul.f32 %v10199_v20, %v10199_v20  ;;  %v4571_v24 = vadd.f32 %v10199_v20, %v4565_v35 }
0x1451   :  { %v8377_v61 = vpop.eup %8376 }
0x1452   :  { %v4567_v0 = vmul.f32 %v8377_v61, %v10192_v8  ;;  %v4584_v10 = vadd.f32 %v4581_v41, %v4580_v62  ;;  %v4569_v62 = vld [vmem:[#allocation8] sm:$0x1] }
0x1454   :  { %v4582_v17 = vmul.f32 %v4567_v0, %v4567_v0  ;;  %v4572_v11 = vadd.f32 %v4571_v24, %v4567_v0 }
0x1455   :  { %v8379_v18 = vpop.eup %8378 }
0x1456   :  { %v4568_v55 = vmul.f32 %v8379_v18, %v10195_v23  ;;  %v4585_v15 = vadd.f32 %v4584_v10, %v4582_v17  ;;  %v4570_v18 = vld [vmem:[%s10471_s15] sm:$0x1] }
0x1458   :  { %v4573_v58 = vadd.f32 %v4572_v11, %v4568_v55  ;;  %v4583_v4 = vmul.f32 %v4568_v55, %v4568_v55 }
0x145a   :  { %v4574_v27 = vrot.slane %v4573_v58, 4  ;;  %v4586_v6 = vadd.f32 %v4585_v15, %v4583_v4 }
0x145c   :  { %v4575_v56 = vadd.f32 %v4574_v27, %v4573_v58  ;;  %v4587_v21 = vrot.slane %v4586_v6, 4 }
0x145e   :  { %v4576_v28 = vrot.slane %v4575_v56, 2  ;;  %v4588_v29 = vadd.f32 %v4587_v21, %v4586_v6 }
0x1460   :  { %v4577_v60 = vadd.f32 %v4576_v28, %v4575_v56  ;;  %v4589_v63 = vrot.slane %v4588_v29, 2 }
0x1462   :  { %v4578_v39 = vrot.slane %v4577_v60, 1  ;;  %v4590_v30 = vadd.f32 %v4589_v63, %v4588_v29 }
0x1464   :  { %v4579_v31 = vadd.f32 %v4578_v39, %v4577_v60  ;;  %v4591_v19 = vrot.slane %v4590_v30, 1  ;;  %v8221_v39 = vld [vmem:[%s10470_s11 + $0x30] sm:$0xff]  }
0x1466   :  { %7732 = vmatmul.mubr.f32.vlgmr.msra.gmra.mxu1 %v4579_v31  ;;  %v4592_v42 = vadd.f32 %v4591_v19, %v4590_v30  ;;  %v8222_v30 = vld [vmem:[%s10470_s11 + $0x68] sm:$0xff]   ;;  %v8225_v19 = vld [vmem:[%s10470_s11 + $0x60] sm:$0xff]  }
0x1467   :  { %7773 = vmatprep.mubr.msk.bf16.mxu1 %vm580_vm0, %v10062_v7  ;;  %v8223_v31 = vld [vmem:[%s10470_s11 + $0x28] sm:$0xff]  }
0x1468   :  { %7767 = vmatmul.mubr.f32.vlgmr.msra.gmra.mxu0 %v4592_v42  ;;  %v8229_v42 = vld [vmem:[%s10470_s11 + $0x18] sm:$0xff]  }
0x1469   :  { %7782 = vmatpush3.bf16.msra.mxu0 %v8224_v14  ;;  %v8231_v14 = vld [vmem:[%s10470_s11 + $0x50] sm:$0xff]  }
0x146a   :  { %7783 = vmatprep.subr.bf16.mxu0 %v8227_v3 }
0x146d   :  { %7784 = vmatpush3.bf16.msra.mxu0 %v8227_v3  ;;  %v8232_v3 = vld [vmem:[%s10470_s11 + $0x10] sm:$0xff]  }
0x146e   :  { %7785 = vmatprep.subr.bf16.mxu0 %v8230_v32 }
0x1471   :  { %7786 = vmatpush3.bf16.msra.mxu0 %v8230_v32  ;;  %v8234_v32 = vld [vmem:[%s10470_s11 + $0x48] sm:$0xff]  }
0x1472   :  { %7787 = vmatprep.subr.bf16.mxu0 %v8233_v33 }
0x1475   :  { %7788 = vmatpush3.bf16.msra.mxu0 %v8233_v33  ;;  %v8236_v33 = vld [vmem:[%s10470_s11 + $0x98] sm:$0xff]  }
0x1476   :  { %7789 = vmatprep.subr.bf16.mxu0 %v8236_v33 }
0x1479   :  { %7790 = vmatpush3.bf16.msra.mxu0 %v8236_v33 }
0x1526   :  { %v4659_v34 = vpop.f32.mrf.mxu1 }
0x1527   :  { %v4733_v36 = vmul.f32 %v4659_v34, %v4659_v34 }
0x1528   :  { %v7733_v37 = vpop.f32.mrf.mxu1  ;;  %v4729_v38 = vpop.f32.mrf.mxu0 }
0x1529   :  { %v4734_v40 = vsub.f32 %v4729_v38, %v4733_v36  ;;  %v8238_v36 = vld [vmem:[%s10470_s11] sm:$0xff]   ;;  %v8239_v37 = vld [vmem:[%s10470_s11 + $0x90] sm:$0xff]   ;;  %v8240_v38 = vld [vmem:[%s10470_s11 + $0x88] sm:$0xff]  }
0x152a   :  { %v7768_v12 = vpop.f32.mrf.mxu0  ;;  %7791 = vmatprep.subr.bf16.mxu0 %v8239_v37 }
0x152b   :  { %v4735_v61 = vmax.f32 %v4734_v40, 0.0  ;;  %7792 = vmatpush3.bf16.msra.mxu0 %v8239_v37  ;;  %v8241_v40 = vld [vmem:[%s10470_s11 + $0x80] sm:$0xff]  }
0x152c   :  { %7793 = vmatprep.subr.bf16.mxu0 %v8240_v38 }
0x152d   :  { %v4736_v41 = vadd.f32 1e-05, %v4735_v61 }
0x152f   :  { %8380 = vrsqrt.f32 %v4736_v41  ;;  %7794 = vmatpush3.bf16.msra.mxu0 %v8240_v38 }
0x1530   :  { %7795 = vmatprep.subr.bf16.mxu0 %v8241_v40 }
0x1533   :  { %7796 = vmatpush3.bf16.msra.mxu0 %v8241_v40 }
0x1534   :  { %7836 = vmatprep.subr.mxu0 %v9091_v25 }
0x153c   :  { %v8381_v24 = vpop.eup %8380 }
0x153d   :  { %v4738_v17 = vmul.f32 %v8381_v24, %v4569_v62 }
0x153f   :  { %v4743_v10 = vrot.slane %v4738_v17, %v9572_v53  ;;  %v4749_v11 = vmul.f32 %v4738_v17, %v4659_v34  ;;  %v8237_v34 = vld [vmem:[%s10470_s11 + $0x40] sm:$0xff]  }
0x1541   :  { %v4750_v15 = vsub.f32 %v4570_v18, %v4749_v11  ;;  %v4747_v58 = vmul.f32 %v4743_v10, %v4567_v0  ;;  %v4748_v4 = vmul.f32 %v4743_v10, %v4568_v55  ;;  %v4745_v6 = vmul.f32 %v4743_v10, %v4565_v35  ;;  %v8218_v55 = vld [vmem:[%s10470_s11 + $0x78] sm:$0xff]  }
0x1542   :  { %v4746_v56 = vmul.f32 %v4743_v10, %v10199_v20  ;;  %v8219_v35 = vld [vmem:[%s10470_s11 + $0x38] sm:$0xff]   ;;  %v8220_v20 = vld [vmem:[%s10470_s11 + $0x70] sm:$0xff]  }
0x1543   :  { %v4755_v27 = vrot.slane %v4750_v15, %v9572_v53 }
0x1545   :  { %v4759_v21 = vadd.f32 %v4755_v27, %v4747_v58  ;;  %v4760_v28 = vadd.f32 %v4755_v27, %v4748_v4  ;;  %v4757_v29 = vadd.f32 %v4755_v27, %v4745_v6  ;;  %v4758_v60 = vadd.f32 %v4755_v27, %v4746_v56 }
0x1547   :  { %v10217_v63 = vpack.c.bf16 %v4760_v28, %v4759_v21  ;;  %v4813_v0 = vpack.c.bf16 %v4758_v60, %v4757_v29  ;;  %v4812_v21 = vld [vmem:[%s10472_s9 + $0x18] sm:$0xff] }
0x1549   :  { %7769 = vmatprep.subr.bf16.mxu1 %v10217_v63 }
0x154a   :  { %7770 = vmatpush3.bf16.msra.mxu1 %v10217_v63 }
0x154b   :  { %7771 = vmatprep.subr.bf16.mxu1 %v4813_v0 }
0x154e   :  { %7772 = vmatpush3.bf16.msra.mxu1 %v4813_v0 }
0x154f   :  { %7007 = vmatprep.subr.bf16.mxu1 %v8218_v55 }
0x1551   :  { %7774 = vmatmul.mubr.msk.bf16.vlgmr.msra.gmra.mxu1 %vm580_vm0, %v10085_v45  ;;  %v8226_v45 = vld [vmem:[%s10470_s11 + $0x20] sm:$0xff]  }
0x1552   :  { %7777 = vmatprep.mubr.msk.bf16.mxu1 %vm580_vm0, %v10107_v50  ;;  %7008 = vmatpush3.bf16.msra.mxu1 %v8219_v35  ;;  %v8228_v50 = vld [vmem:[%s10470_s11 + $0x58] sm:$0xff]  }
0x1553   :  { %7009 = vmatprep.subr.bf16.mxu1 %v8220_v20 }
0x1556   :  { %7010 = vmatpush3.bf16.msra.mxu1 %v8221_v39 }
0x1557   :  { %7011 = vmatprep.subr.bf16.mxu1 %v8222_v30 }
0x1559   :  { %7778 = vmatmul.mubr.msk.bf16.gmra.mxu1 %vm580_vm0, %v10121_v54  ;;  %v8235_v54 = vld [vmem:[%s10470_s11 + $0x8] sm:$0xff]  }
0x155a   :  { %5060 = vmatprep.mubr.bf16.mxu1 %v4813_v0  ;;  %7012 = vmatpush3.bf16.msra.mxu1 %v8223_v31 }
0x155b   :  { %7013 = vmatprep.subr.bf16.mxu1 %v8225_v19 }
0x155e   :  { %7014 = vmatpush3.bf16.msra.mxu1 %v8226_v45 }
0x155f   :  { %7015 = vmatprep.subr.bf16.mxu1 %v8228_v50 }
0x1562   :  { %7016 = vmatpush3.bf16.msra.mxu1 %v8229_v42 }
0x1563   :  { %7017 = vmatprep.subr.bf16.mxu1 %v8231_v14 }
0x1566   :  { %7018 = vmatpush3.bf16.msra.mxu1 %v8232_v3 }
0x1567   :  { %7019 = vmatprep.subr.bf16.mxu1 %v8234_v32 }
0x156a   :  { %7020 = vmatpush3.bf16.msra.mxu1 %v8235_v54 }
0x156b   :  { %7021 = vmatprep.subr.bf16.mxu1 %v8237_v34 }
0x156e   :  { %7022 = vmatpush3.bf16.msra.mxu1 %v8238_v36 }
0x156f   :  { %7801 = vmatprep.subr.mxu1 %v9091_v25 }
0x1611   :  { %v7775_v12 = vpop.f32.mrf.mxu1 }
0x1613   :  { %v4849_v61 = vpop.f32.mrf.mxu1 }
0x1615   :  { %v7776_v41 = vpop.f32.mrf.mxu1 }
0x1616   :  { %v4881_v15 = vpack.c.bf16 %v7776_v41, %v7775_v12 }
0x1617   :  { %v4852_v62 = vpop.f32.mrf.mxu1 }
0x1618   :  { %v4880_v24 = vpack.c.bf16 %v4852_v62, %v4849_v61 }
0x1619   :  { %v7779_v17 = vpop.f32.mrf.mxu1 }
0x161a   :  { %5061 = vmatmul.mubr.bf16.vlgmr.msra.gmra.mxu1 %v4880_v24 }
0x161b   :  { %v4865_v18 = vpop.f32.mrf.mxu1  ;;  %5068 = vmatprep.mubr.bf16.mxu1 %v10217_v63  ;;  %7802 = vmatpush3.msra.mxu1 %v10032_v1 }
0x161c   :  { %7803 = vmatprep.subr.mxu1 %v9091_v25 }
0x161d   :  { %v7780_v10 = vpop.f32.mrf.mxu1  ;;  %7804 = vmatpush3.msra.mxu1 %v10036_v13 }
0x161e   :  { %7805 = vmatprep.subr.mxu1 %v9091_v25  ;;  %v4883_v4 = vpack.c.bf16 %v7780_v10, %v7779_v17 }
0x161f   :  { %v4868_v11 = vpop.f32.mrf.mxu1  ;;  %7806 = vmatpush3.msra.mxu1 %v10040_v2 }
0x1620   :  { %v4882_v58 = vpack.c.bf16 %v4868_v11, %v4865_v18  ;;  %7807 = vmatprep.subr.mxu1 %v9091_v25 }
0x1621   :  { %7808 = vmatpush3.msra.mxu1 %v10045_v59 }
0x1622   :  { %5069 = vmatmul.mubr.bf16.gmra.mxu1 %v4881_v15  ;;  %7797 = vmatprep.mubr.bf16.mxu0 %v4882_v58 }
0x1623   :  { %7798 = vmatmul.mubr.bf16.vlgmr.msra.gmra.mxu0 %v4883_v4  ;;  %7809 = vmatprep.subr.mxu1 %v9091_v25 }
0x1624   :  { %7837 = vmatpush3.msra.mxu0 %v10032_v1  ;;  %7810 = vmatpush3.msra.mxu1 %v10051_v16 }
0x1625   :  { %7838 = vmatprep.subr.mxu0 %v9091_v25  ;;  %7811 = vmatprep.subr.mxu1 %v9091_v25 }
0x1626   :  { %7839 = vmatpush3.msra.mxu0 %v10036_v13  ;;  %7812 = vmatpush3.msra.mxu1 %v10057_v22 }
0x1627   :  { %7840 = vmatprep.subr.mxu0 %v9091_v25  ;;  %7813 = vmatprep.subr.mxu1 %v9091_v25 }
0x1628   :  { %7841 = vmatpush3.msra.mxu0 %v10040_v2  ;;  %7814 = vmatpush3.msra.mxu1 %v10066_v9 }
0x1629   :  { %7842 = vmatprep.subr.mxu0 %v9091_v25  ;;  %7815 = vmatprep.subr.mxu1 %v9091_v25 }
0x162a   :  { %7843 = vmatpush3.msra.mxu0 %v10045_v59  ;;  %7816 = vmatpush3.msra.mxu1 %v10073_v26 }
0x162b   :  { %7844 = vmatprep.subr.mxu0 %v9091_v25  ;;  %7817 = vmatprep.subr.mxu1 %v9091_v25 }
0x162c   :  { %7845 = vmatpush3.msra.mxu0 %v10051_v16  ;;  %7818 = vmatpush3.msra.mxu1 %v10077_v43 }
0x162d   :  { %7846 = vmatprep.subr.mxu0 %v9091_v25  ;;  %7819 = vmatprep.subr.mxu1 %v9091_v25 }
0x162e   :  { %7847 = vmatpush3.msra.mxu0 %v10057_v22  ;;  %7820 = vmatpush3.msra.mxu1 %v10081_v44  ;;  %v4809_v22 = vld [vmem:[%s10472_s9] sm:$0xff] }
0x162f   :  { %7848 = vmatprep.subr.mxu0 %v9091_v25  ;;  %7821 = vmatprep.subr.mxu1 %v9091_v25 }
0x1630   :  { %7849 = vmatpush3.msra.mxu0 %v10066_v9  ;;  %7822 = vmatpush3.msra.mxu1 %v10091_v46 }
0x1631   :  { %7850 = vmatprep.subr.mxu0 %v9091_v25  ;;  %7823 = vmatprep.subr.mxu1 %v9091_v25 }
0x1632   :  { %7851 = vmatpush3.msra.mxu0 %v10073_v26  ;;  %7824 = vmatpush3.msra.mxu1 %v10095_v47 }
0x1633   :  { %7852 = vmatprep.subr.mxu0 %v9091_v25  ;;  %7825 = vmatprep.subr.mxu1 %v9091_v25 }
0x1634   :  { %7853 = vmatpush3.msra.mxu0 %v10077_v43  ;;  %7826 = vmatpush3.msra.mxu1 %v10099_v48 }
0x1635   :  { %7854 = vmatprep.subr.mxu0 %v9091_v25  ;;  %7827 = vmatprep.subr.mxu1 %v9091_v25 }
0x1636   :  { %7855 = vmatpush3.msra.mxu0 %v10081_v44  ;;  %7828 = vmatpush3.msra.mxu1 %v10103_v49  ;;  %v4811_v44 = vld [vmem:[%s10472_s9 + $0x10] sm:$0xff] }
0x1637   :  { %7856 = vmatprep.subr.mxu0 %v9091_v25  ;;  %7829 = vmatprep.subr.mxu1 %v9091_v25 }
0x1638   :  { %7857 = vmatpush3.msra.mxu0 %v10091_v46  ;;  %7830 = vmatpush3.msra.mxu1 %v10113_v51 }
0x1639   :  { %7858 = vmatprep.subr.mxu0 %v9091_v25  ;;  %7831 = vmatprep.subr.mxu1 %v9091_v25 }
0x163a   :  { %7859 = vmatpush3.msra.mxu0 %v10095_v47  ;;  %7832 = vmatpush3.msra.mxu1 %v10117_v52 }
0x163b   :  { %7860 = vmatprep.subr.mxu0 %v9091_v25  ;;  %7833 = vmatprep.mubr.msk.f32.mxu1 %vm9092_vm2, %v9091_v25 }
0x163c   :  { %7861 = vmatpush3.msra.mxu0 %v10099_v48  ;;  %7868 = vmatprep.mubr.msk.f32.mxu0 %vm9092_vm2, %v9091_v25 }
0x163d   :  { %7862 = vmatprep.subr.mxu0 %v9091_v25 }
0x163e   :  { %7863 = vmatpush3.msra.mxu0 %v10103_v49 }
0x163f   :  { %7864 = vmatprep.subr.mxu0 %v9091_v25 }
0x1640   :  { %7865 = vmatpush3.msra.mxu0 %v10113_v51  ;;  %v4810_v51 = vld [vmem:[%s10472_s9 + $0x8] sm:$0xff] }
0x1641   :  { %7866 = vmatprep.subr.mxu0 %v9091_v25 }
0x1642   :  { %7867 = vmatpush3.msra.mxu0 %v10117_v52 }
0x16da   :  { %v7023_v1 = vpop.f32.mrf.mxu1 }
0x16dc   :  { %v7024_v13 = vpop.f32.mrf.mxu1 }
0x16dd   :  { %v7025_v59 = vadd.f32 %v7024_v13, %v7023_v1 }
0x16de   :  { %v7026_v2 = vpop.f32.mrf.mxu1 }
0x16df   :  { %v5063_v47 = vadd.f32 %v7025_v59, %v4809_v22 }
0x16e0   :  { %v7027_v16 = vpop.f32.mrf.mxu1 }
0x16e1   :  { %v7028_v43 = vadd.f32 %v7027_v16, %v7026_v2 }
0x16e2   :  { %v7029_v9 = vpop.f32.mrf.mxu1 }
0x16e3   :  { %v7799_v26 = vpop.f32.mrf.mxu0  ;;  %v5066_v29 = vadd.f32 %v7028_v43, %v4810_v51  ;;  %v8254_v51 = vld [vmem:[%s10473_s21 + $0xa8] sm:$0xff]  }
0x16e4   :  { %v7030_v46 = vpop.f32.mrf.mxu1 }
0x16e5   :  { %v7031_v48 = vadd.f32 %v7030_v46, %v7029_v9  ;;  %v5111_v49 = vpop.f32.mrf.mxu0 }
0x16e6   :  { %v5112_v25 = vadd.f32 %v5111_v49, %v5063_v47  ;;  %v7032_v27 = vpop.f32.mrf.mxu1  ;;  %v8251_v49 = vld [vmem:[%s10473_s21 + $0xb0] sm:$0xff]  }
0x16e7   :  { %v5071_v6 = vadd.f32 %v7031_v48, %v4811_v44  ;;  %v7800_v52 = vpop.f32.mrf.mxu0  ;;  %v8248_v48 = vld [vmem:[%s10473_s21 + $0xb8] sm:$0xff]  }
0x16e8   :  { %v6444_v56 = vmul.f32 -1.442695, %v5112_v25  ;;  %v7033_v28 = vpop.f32.mrf.mxu1  ;;  %7883 = vmatprep.subr.bf16.mxu0 %v8248_v48 }
0x16e9   :  { %v5120_v60 = vadd.f32 %v7799_v26, %v5071_v6  ;;  %v7034_v63 = vadd.f32 %v7033_v28, %v7032_v27  ;;  %v5114_v0 = vpop.f32.mrf.mxu0 }
0x16ea   :  { %8382 = vpow2.f32 %v6444_v56  ;;  %v5115_v55 = vadd.f32 %v5114_v0, %v5066_v29 }
0x16eb   :  { %v6446_v35 = vmul.f32 -1.442695, %v5120_v60  ;;  %v5074_v20 = vadd.f32 %v7034_v63, %v4812_v21 }
0x16ec   :  { %v6445_v39 = vmul.f32 -1.442695, %v5115_v55 }
0x16ed   :  { %8384 = vpow2.f32 %v6446_v35  ;;  %v5123_v30 = vadd.f32 %v7800_v52, %v5074_v20 }
0x16ee   :  { %8386 = vpow2.f32 %v6445_v39 }
0x16ef   :  { %v6447_v31 = vmul.f32 -1.442695, %v5123_v30 }
0x16f1   :  { %8388 = vpow2.f32 %v6447_v31 }
0x16f7   :  { %v8383_v19 = vpop.eup %8382 }
0x16f8   :  { %v5138_v45 = vadd.f32 1.0, %v8383_v19 }
0x16fa   :  { %v8385_v50 = vpop.eup %8384  ;;  %8390 = vrcp.f32 %v5138_v45 }
0x16fb   :  { %v8387_v42 = vpop.eup %8386  ;;  %v5140_v14 = vadd.f32 1.0, %v8385_v50 }
0x16fc   :  { %v5139_v3 = vadd.f32 1.0, %v8387_v42 }
0x16fd   :  { %8392 = vrcp.f32 %v5140_v14 }
0x16fe   :  { %v8389_v32 = vpop.eup %8388  ;;  %8394 = vrcp.f32 %v5139_v3 }
0x16ff   :  { %v5141_v54 = vadd.f32 1.0, %v8389_v32 }
0x1701   :  { %8396 = vrcp.f32 %v5141_v54 }
0x1707   :  { %v8391_v33 = vpop.eup %8390 }
0x1708   :  { %v5150_v36 = vmul.f32 %v8391_v33, %v5112_v25  ;;  %v8257_v25 = vld [vmem:[%s10473_s21 + $0xa0] sm:$0xff]  }
0x170a   :  { %v8393_v34 = vpop.eup %8392  ;;  %v5165_v61 = vmul.f32 %v5150_v36, %v5150_v36 }
0x170b   :  { %v8395_v37 = vpop.eup %8394  ;;  %v5152_v38 = vmul.f32 %v8393_v34, %v5120_v60  ;;  %v5154_v60 = vld [vmem:[#allocation10] sm:$0x1]  ;;  %v8243_v34 = vld [vmem:[%s10473_s21 + $0x38] sm:$0xff]  }
0x170c   :  { %v5151_v40 = vmul.f32 %v8395_v37, %v5115_v55  ;;  %v5155_v55 = vld [vmem:[#allocation7] sm:$0x1]  ;;  %v10336_v37 = vld [vmem:[%s10462_s25 + $0x8] sm:$0xff]  }
0x170d   :  { %v5167_v17 = vmul.f32 %v5152_v38, %v5152_v38 }
0x170e   :  { %v8397_v12 = vpop.eup %8396  ;;  %v5156_v41 = vadd.f32 %v5151_v40, %v5150_v36  ;;  %v5166_v62 = vmul.f32 %v5151_v40, %v5151_v40 }
0x170f   :  { %v5153_v24 = vmul.f32 %v8397_v12, %v5123_v30  ;;  %v8246_v12 = vld [vmem:[%s10473_s21 + $0x68] sm:$0xff]  }
0x1710   :  { %v5157_v18 = vadd.f32 %v5156_v41, %v5152_v38  ;;  %v5169_v10 = vadd.f32 %v5166_v62, %v5165_v61  ;;  %v8247_v61 = vld [vmem:[%s10473_s21 + $0x28] sm:$0xff]   ;;  %v8249_v41 = vld [vmem:[%s10473_s21 + $0x60] sm:$0xff]   ;;  %v10350_v62 = vld [vmem:[%s10462_s25 + $0x18] sm:$0xff]  }
0x1711   :  { %v5168_v11 = vmul.f32 %v5153_v24, %v5153_v24 }
0x1712   :  { %v5158_v15 = vadd.f32 %v5157_v18, %v5153_v24  ;;  %v5170_v58 = vadd.f32 %v5169_v10, %v5167_v17  ;;  %v8252_v17 = vld [vmem:[%s10473_s21 + $0x58] sm:$0xff]   ;;  %v8255_v10 = vld [vmem:[%s10473_s21 + $0x50] sm:$0xff]  }
0x1713   :  { %v8253_v18 = vld [vmem:[%s10473_s21 + $0x18] sm:$0xff]  }
0x1714   :  { %v5159_v4 = vrot.slane %v5158_v15, 4  ;;  %v5171_v1 = vadd.f32 %v5170_v58, %v5168_v11  ;;  %v8256_v11 = vld [vmem:[%s10473_s21 + $0x10] sm:$0xff]   ;;  %v8259_v58 = vld [vmem:[%s10473_s21 + $0x8] sm:$0xff]  }
0x1716   :  { %v5160_v13 = vadd.f32 %v5159_v4, %v5158_v15  ;;  %v5172_v2 = vrot.slane %v5171_v1, 4  ;;  %v8258_v15 = vld [vmem:[%s10473_s21 + $0x48] sm:$0xff]   ;;  %v8260_v4 = vld [vmem:[%s10473_s21 + $0x98] sm:$0xff]  }
0x1718   :  { %v5161_v59 = vrot.slane %v5160_v13, 2  ;;  %v5173_v16 = vadd.f32 %v5172_v2, %v5171_v1  ;;  %v8261_v1 = vld [vmem:[%s10473_s21 + $0x40] sm:$0xff]   ;;  %v8263_v2 = vld [vmem:[%s10473_s21 + $0x90] sm:$0xff]  }
0x171a   :  { %v5162_v22 = vadd.f32 %v5161_v59, %v5160_v13  ;;  %v5174_v9 = vrot.slane %v5173_v16, 2  ;;  %v8262_v13 = vld [vmem:[%s10473_s21] sm:$0xff]   ;;  %v8264_v59 = vld [vmem:[%s10473_s21 + $0x88] sm:$0xff]  }
0x171c   :  { %v5163_v26 = vrot.slane %v5162_v22, 1  ;;  %v5175_v43 = vadd.f32 %v5174_v9, %v5173_v16  ;;  %v8265_v16 = vld [vmem:[%s10473_s21 + $0x80] sm:$0xff]  }
0x171e   :  { %v5164_v44 = vadd.f32 %v5163_v26, %v5162_v22  ;;  %v5176_v46 = vrot.slane %v5175_v43, 1 }
0x1720   :  { %7834 = vmatmul.mubr.f32.vlgmr.msra.gmra.mxu1 %v5164_v44  ;;  %v5177_v47 = vadd.f32 %v5176_v46, %v5175_v43 }
0x1721   :  { %7875 = vmatprep.mubr.msk.bf16.mxu1 %vm580_vm0, %v10062_v7 }
0x1722   :  { %7869 = vmatmul.mubr.f32.vlgmr.msra.gmra.mxu0 %v5177_v47 }
0x1723   :  { %7884 = vmatpush3.bf16.msra.mxu0 %v8248_v48 }
0x1724   :  { %7885 = vmatprep.subr.bf16.mxu0 %v8251_v49 }
0x1727   :  { %7886 = vmatpush3.bf16.msra.mxu0 %v8251_v49 }
0x1728   :  { %7887 = vmatprep.subr.bf16.mxu0 %v8254_v51 }
0x172b   :  { %7888 = vmatpush3.bf16.msra.mxu0 %v8254_v51 }
0x172c   :  { %7889 = vmatprep.subr.bf16.mxu0 %v8257_v25 }
0x172f   :  { %7890 = vmatpush3.bf16.msra.mxu0 %v8257_v25 }
0x1730   :  { %7891 = vmatprep.subr.bf16.mxu0 %v8260_v4 }
0x1733   :  { %7892 = vmatpush3.bf16.msra.mxu0 %v8260_v4 }
0x1734   :  { %7893 = vmatprep.subr.bf16.mxu0 %v8263_v2 }
0x1737   :  { %7894 = vmatpush3.bf16.msra.mxu0 %v8263_v2 }
0x1738   :  { %7895 = vmatprep.subr.bf16.mxu0 %v8264_v59 }
0x173b   :  { %7896 = vmatpush3.bf16.msra.mxu0 %v8264_v59 }
0x173c   :  { %7897 = vmatprep.subr.bf16.mxu0 %v8265_v16 }
0x173f   :  { %7898 = vmatpush3.bf16.msra.mxu0 %v8265_v16  ;;  %v8272_v16 = vld [vmem:[%s10474_s13 + $0xb8] sm:$0xff]  }
0x17e0   :  { %v5244_v27 = vpop.f32.mrf.mxu1 }
0x17e1   :  { %v5318_v6 = vmul.f32 %v5244_v27, %v5244_v27 }
0x17e2   :  { %v7835_v52 = vpop.f32.mrf.mxu1  ;;  %v5314_v56 = vpop.f32.mrf.mxu0 }
0x17e3   :  { %v5319_v21 = vsub.f32 %v5314_v56, %v5318_v6  ;;  %v8427_v6 = vld [vmem:[%s10462_s25] sm:$0xff]   ;;  %v8266_v52 = vld [vmem:[%s10474_s13 + $0x78] sm:$0xff]  }
0x17e4   :  { %v7870_v28 = vpop.f32.mrf.mxu0  ;;  %v8267_v56 = vld [vmem:[%s10474_s13 + $0x38] sm:$0xff]   ;;  %7129 = vmatprep.subr.bf16.mxu0 %v8266_v52 }
0x17e5   :  { %v5320_v7 = vmax.f32 %v5319_v21, 0.0  ;;  %v8268_v21 = vld [vmem:[%s10474_s13 + $0x70] sm:$0xff]  }
0x17e6   :  { %v8269_v28 = vld [vmem:[%s10474_s13 + $0x30] sm:$0xff]  }
0x17e7   :  { %v5321_v29 = vadd.f32 1e-05, %v5320_v7  ;;  %v8270_v7 = vld [vmem:[%s10474_s13 + $0x68] sm:$0xff]  }
0x17e9   :  { %8398 = vrsqrt.f32 %v5321_v29  ;;  %v8271_v29 = vld [vmem:[%s10474_s13 + $0x28] sm:$0xff]  }
0x17f6   :  { %v8399_v63 = vpop.eup %8398 }
0x17f7   :  { %v5323_v0 = vmul.f32 %v8399_v63, %v5154_v60  ;;  %v8273_v60 = vld [vmem:[%s10474_s13 + $0x60] sm:$0xff]  }
0x17f8   :  { %v8274_v63 = vld [vmem:[%s10474_s13 + $0x20] sm:$0xff]  }
0x17f9   :  { %v5328_v35 = vrot.slane %v5323_v0, %v9572_v53  ;;  %v5334_v20 = vmul.f32 %v5323_v0, %v5244_v27  ;;  %v8276_v0 = vld [vmem:[%s10474_s13 + $0x58] sm:$0xff]  }
0x17fb   :  { %v5335_v39 = vsub.f32 %v5155_v55, %v5334_v20  ;;  %v5332_v30 = vmul.f32 %v5328_v35, %v5152_v38  ;;  %v5333_v31 = vmul.f32 %v5328_v35, %v5153_v24  ;;  %v5330_v45 = vmul.f32 %v5328_v35, %v5150_v36  ;;  %v8244_v36 = vld [vmem:[%s10473_s21 + $0x70] sm:$0xff]   ;;  %v8250_v24 = vld [vmem:[%s10473_s21 + $0x20] sm:$0xff]   ;;  %v8277_v55 = vld [vmem:[%s10474_s13 + $0x18] sm:$0xff]  }
0x17fc   :  { %v5331_v50 = vmul.f32 %v5328_v35, %v5151_v40  ;;  %v10341_v38 = vld [vmem:[%s10462_s25 + $0x10] sm:$0xff]  }
0x17fd   :  { %v5340_v19 = vrot.slane %v5335_v39, %v9572_v53  ;;  %v8242_v53 = vld [vmem:[%s10473_s21 + $0x78] sm:$0xff]   ;;  %v8245_v40 = vld [vmem:[%s10473_s21 + $0x30] sm:$0xff]  }
0x17fe   :  { %v8279_v35 = vld [vmem:[%s10474_s13 + $0x50] sm:$0xff]  }
0x17ff   :  { %v5344_v42 = vadd.f32 %v5340_v19, %v5332_v30  ;;  %v5345_v14 = vadd.f32 %v5340_v19, %v5333_v31  ;;  %v5342_v3 = vadd.f32 %v5340_v19, %v5330_v45  ;;  %v5343_v32 = vadd.f32 %v5340_v19, %v5331_v50  ;;  %v8280_v20 = vld [vmem:[%s10474_s13 + $0x10] sm:$0xff]  }
0x1801   :  { %v10328_v54 = vpack.c.bf16 %v5345_v14, %v5344_v42  ;;  %v5395_v33 = vpack.c.bf16 %v5343_v32, %v5342_v3  ;;  %v6452_v14 = vld [vmem:[%s10475_s30] ss:$0 sm:$0xff] }
0x1803   :  { %7871 = vmatprep.subr.bf16.mxu1 %v10328_v54 }
0x1804   :  { %7872 = vmatpush3.bf16.msra.mxu1 %v10328_v54 }
0x1805   :  { %7873 = vmatprep.subr.bf16.mxu1 %v5395_v33 }
0x1808   :  { %7874 = vmatpush3.bf16.msra.mxu1 %v5395_v33 }
0x1809   :  { %7085 = vmatprep.subr.bf16.mxu1 %v8242_v53 }
0x180b   :  { %7876 = vmatmul.mubr.msk.bf16.vlgmr.msra.gmra.mxu1 %vm580_vm0, %v10336_v37 }
0x180c   :  { %7879 = vmatprep.mubr.msk.bf16.mxu1 %vm580_vm0, %v10341_v38  ;;  %7086 = vmatpush3.bf16.msra.mxu1 %v8243_v34 }
0x180d   :  { %7087 = vmatprep.subr.bf16.mxu1 %v8244_v36 }
0x1810   :  { %7088 = vmatpush3.bf16.msra.mxu1 %v8245_v40 }
0x1811   :  { %7089 = vmatprep.subr.bf16.mxu1 %v8246_v12 }
0x1813   :  { %7880 = vmatmul.mubr.msk.bf16.gmra.mxu1 %vm580_vm0, %v10350_v62 }
0x1814   :  { %5648 = vmatprep.mubr.bf16.mxu1 %v5395_v33  ;;  %7090 = vmatpush3.bf16.msra.mxu1 %v8247_v61 }
0x1815   :  { %7091 = vmatprep.subr.bf16.mxu1 %v8249_v41 }
0x1818   :  { %7092 = vmatpush3.bf16.msra.mxu1 %v8250_v24 }
0x1819   :  { %7093 = vmatprep.subr.bf16.mxu1 %v8252_v17 }
0x181c   :  { %7094 = vmatpush3.bf16.msra.mxu1 %v8253_v18 }
0x181d   :  { %7095 = vmatprep.subr.bf16.mxu1 %v8255_v10 }
0x1820   :  { %7096 = vmatpush3.bf16.msra.mxu1 %v8256_v11 }
0x1821   :  { %7097 = vmatprep.subr.bf16.mxu1 %v8258_v15 }
0x1824   :  { %7098 = vmatpush3.bf16.msra.mxu1 %v8259_v58 }
0x1825   :  { %7099 = vmatprep.subr.bf16.mxu1 %v8261_v1 }
0x1828   :  { %7100 = vmatpush3.bf16.msra.mxu1 %v8262_v13 }
0x18cb   :  { %v7877_v22 = vpop.f32.mrf.mxu1 }
0x18cd   :  { %v5431_v9 = vpop.f32.mrf.mxu1 }
0x18cf   :  { %v7878_v26 = vpop.f32.mrf.mxu1 }
0x18d0   :  { %v5463_v51 = vpack.c.bf16 %v7878_v26, %v7877_v22  ;;  %v8285_v22 = vld [vmem:[%s10474_s13 + $0x40] sm:$0xff]   ;;  %v8287_v26 = vld [vmem:[%s10474_s13 + $0x90] sm:$0xff]  }
0x18d1   :  { %v5434_v43 = vpop.f32.mrf.mxu1 }
0x18d2   :  { %v5462_v44 = vpack.c.bf16 %v5434_v43, %v5431_v9  ;;  %v8286_v9 = vld [vmem:[%s10474_s13] sm:$0xff]  }
0x18d3   :  { %v7881_v46 = vpop.f32.mrf.mxu1  ;;  %v8289_v43 = vld [vmem:[%s10474_s13 + $0x80] sm:$0xff]  }
0x18d4   :  { %5649 = vmatmul.mubr.bf16.vlgmr.msra.gmra.mxu1 %v5462_v44 }
0x18d5   :  { %v5447_v47 = vpop.f32.mrf.mxu1  ;;  %5656 = vmatprep.mubr.bf16.mxu1 %v10328_v54 }
0x18d7   :  { %v7882_v48 = vpop.f32.mrf.mxu1 }
0x18d8   :  { %v5465_v27 = vpack.c.bf16 %v7882_v48, %v7881_v46 }
0x18d9   :  { %v5450_v49 = vpop.f32.mrf.mxu1 }
0x18da   :  { %v5464_v25 = vpack.c.bf16 %v5450_v49, %v5447_v47 }
0x18dc   :  { %5657 = vmatmul.mubr.bf16.gmra.mxu1 %v5463_v51  ;;  %7899 = vmatprep.mubr.bf16.mxu0 %v5464_v25 }
0x18dd   :  { %7900 = vmatmul.mubr.bf16.vlgmr.msra.gmra.mxu0 %v5465_v27  ;;  %7907 = vmatprep.mubr.msk.bf16.mxu1 %vm580_vm0, %v8427_v6 }
0x18de   :  { %7130 = vmatpush3.bf16.msra.mxu0 %v8267_v56 }
0x18df   :  { %7131 = vmatprep.subr.bf16.mxu0 %v8268_v21 }
0x18e2   :  { %7132 = vmatpush3.bf16.msra.mxu0 %v8269_v28 }
0x18e3   :  { %7133 = vmatprep.subr.bf16.mxu0 %v8270_v7 }
0x18e6   :  { %7134 = vmatpush3.bf16.msra.mxu0 %v8271_v29 }
0x18e7   :  { %7135 = vmatprep.subr.bf16.mxu0 %v8273_v60 }
0x18ea   :  { %7136 = vmatpush3.bf16.msra.mxu0 %v8274_v63 }
0x18eb   :  { %7137 = vmatprep.subr.bf16.mxu0 %v8276_v0  ;;  %v6481_v0 = vld [vmem:[#allocation26] ss:$0 sm:$0xff] }
0x18ee   :  { %7138 = vmatpush3.bf16.msra.mxu0 %v8277_v55 }
0x18ef   :  { %7139 = vmatprep.subr.bf16.mxu0 %v8279_v35 }
0x18f2   :  { %7140 = vmatpush3.bf16.msra.mxu0 %v8280_v20 }
0x1994   :  { %v7101_v39 = vpop.f32.mrf.mxu1 }
0x1996   :  { %v7102_v30 = vpop.f32.mrf.mxu1 }
0x1997   :  { %v7103_v45 = vadd.f32 %v7102_v30, %v7101_v39 }
0x1998   :  { %v7104_v31 = vpop.f32.mrf.mxu1 }
0x1999   :  { %v5651_v53 = vadd.f32 %v7103_v45, %v6452_v14 }
0x199a   :  { %v7105_v19 = vpop.f32.mrf.mxu1 }
0x199b   :  { %v7106_v3 = vadd.f32 %v7105_v19, %v7104_v31 }
0x199c   :  { %v7107_v50 = vpop.f32.mrf.mxu1 }
0x199d   :  { %v7901_v42 = vpop.f32.mrf.mxu0  ;;  %v5654_v41 = vadd.f32 %v7106_v3, %v6452_v14 }
0x199e   :  { %v7108_v32 = vpop.f32.mrf.mxu1 }
0x199f   :  { %v7109_v54 = vadd.f32 %v7108_v32, %v7107_v50  ;;  %v5699_v33 = vpop.f32.mrf.mxu0 }
0x19a0   :  { %v7110_v34 = vpop.f32.mrf.mxu1  ;;  %v5700_v12 = vadd.f32 %v5699_v33, %v5651_v53 }
0x19a1   :  { %v5659_v36 = vadd.f32 %v7109_v54, %v6452_v14  ;;  %v7902_v40 = vpop.f32.mrf.mxu0 }
0x19a2   :  { %v7111_v61 = vpop.f32.mrf.mxu1  ;;  %v5714_v15 = vadd.f32 %v5700_v12, %v10186_v57  ;;  %v8275_v57 = vld [vmem:[%s10474_s13 + $0xb0] sm:$0xff]  }
0x19a3   :  { %v7112_v24 = vadd.f32 %v7111_v61, %v7110_v34  ;;  %v5702_v17 = vpop.f32.mrf.mxu0  ;;  %v5708_v10 = vadd.f32 %v7901_v42, %v5659_v36 }
0x19a4   :  { %v5703_v18 = vadd.f32 %v5702_v17, %v5654_v41 }
0x19a5   :  { %v5662_v11 = vadd.f32 %v7112_v24, %v6452_v14  ;;  %v5716_v13 = vadd.f32 %v5708_v10, %v10192_v8  ;;  %v8281_v8 = vld [vmem:[%s10474_s13 + $0xa0] sm:$0xff]  }
0x19a6   :  { %v5715_v58 = vadd.f32 %v5703_v18, %v10189_v5  ;;  %v8278_v5 = vld [vmem:[%s10474_s13 + $0xa8] sm:$0xff]  }
0x19a7   :  { %v5711_v4 = vadd.f32 %v7902_v40, %v5662_v11 }
0x19a8   :  { %v5767_v1 = vpack.c.bf16 %v5715_v58, %v5714_v15 }
0x19a9   :  { %v5717_v2 = vadd.f32 %v5711_v4, %v10195_v23  ;;  %v8282_v23 = vld [vmem:[%s10474_s13 + $0x48] sm:$0xff]  }
0x19aa   :  { %6020 = vmatprep.mubr.bf16.mxu0 %v5767_v1  ;;  %7141 = vmatprep.subr.bf16.mxu0 %v8282_v23 }
0x19ab   :  { %v5768_v59 = vpack.c.bf16 %v5717_v2, %v5716_v13 }
0x19ad   :  { %7903 = vmatprep.subr.bf16.mxu1 %v5768_v59 }
0x19ae   :  { %7904 = vmatpush3.bf16.msra.mxu1 %v5768_v59 }
0x19af   :  { %7905 = vmatprep.subr.bf16.mxu1 %v5767_v1 }
0x19b2   :  { %7906 = vmatpush3.bf16.msra.mxu1 %v5767_v1 }
0x19b3   :  { %7915 = vmatprep.subr.bf16.mxu1 %v8272_v16 }
0x19b5   :  { %7908 = vmatmul.mubr.msk.bf16.vlgmr.msra.gmra.mxu1 %vm580_vm0, %v10336_v37  ;;  %v8283_v37 = vld [vmem:[%s10474_s13 + $0x8] sm:$0xff]  }
0x19b6   :  { %7911 = vmatprep.mubr.msk.bf16.mxu1 %vm580_vm0, %v10341_v38  ;;  %7916 = vmatpush3.bf16.msra.mxu1 %v8272_v16  ;;  %v8284_v38 = vld [vmem:[%s10474_s13 + $0x98] sm:$0xff]  }
0x19b7   :  { %7917 = vmatprep.subr.bf16.mxu1 %v8275_v57  ;;  %7142 = vmatpush3.bf16.msra.mxu0 %v8283_v37 }
0x19b8   :  { %7143 = vmatprep.subr.bf16.mxu0 %v8285_v22 }
0x19ba   :  { %7918 = vmatpush3.bf16.msra.mxu1 %v8275_v57 }
0x19bb   :  { %7919 = vmatprep.subr.bf16.mxu1 %v8278_v5  ;;  %7144 = vmatpush3.bf16.msra.mxu0 %v8286_v9 }
0x19bd   :  { %7912 = vmatmul.mubr.msk.bf16.gmra.mxu1 %vm580_vm0, %v10350_v62  ;;  %v8288_v62 = vld [vmem:[%s10474_s13 + $0x88] sm:$0xff]  }
0x19be   :  { %7920 = vmatpush3.bf16.msra.mxu1 %v8278_v5 }
0x19bf   :  { %7921 = vmatprep.subr.bf16.mxu1 %v8281_v8 }
0x19c2   :  { %7922 = vmatpush3.bf16.msra.mxu1 %v8281_v8 }
0x19c3   :  { %7923 = vmatprep.subr.bf16.mxu1 %v8284_v38 }
0x19c6   :  { %7924 = vmatpush3.bf16.msra.mxu1 %v8284_v38 }
0x19c7   :  { %7925 = vmatprep.subr.bf16.mxu1 %v8287_v26 }
0x19ca   :  { %7926 = vmatpush3.bf16.msra.mxu1 %v8287_v26 }
0x19cb   :  { %7927 = vmatprep.subr.bf16.mxu1 %v8288_v62 }
0x19ce   :  { %7928 = vmatpush3.bf16.msra.mxu1 %v8288_v62 }
0x19cf   :  { %7929 = vmatprep.subr.bf16.mxu1 %v8289_v43 }
0x19d2   :  { %7930 = vmatpush3.bf16.msra.mxu1 %v8289_v43 }
0x1a75   :  { %v7909_v44 = vpop.f32.mrf.mxu1 }
0x1a77   :  { %v5803_v46 = vpop.f32.mrf.mxu1 }
0x1a79   :  { %v7910_v47 = vpop.f32.mrf.mxu1 }
0x1a7a   :  { %v5835_v52 = vpack.c.bf16 %v7910_v47, %v7909_v44 }
0x1a7b   :  { %v5806_v48 = vpop.f32.mrf.mxu1 }
0x1a7c   :  { %v5834_v49 = vpack.c.bf16 %v5806_v48, %v5803_v46 }
0x1a7d   :  { %v7913_v51 = vpop.f32.mrf.mxu1 }
0x1a7e   :  { %6021 = vmatmul.mubr.bf16.vlgmr.msra.gmra.mxu0 %v5834_v49 }
0x1a7f   :  { %v5819_v25 = vpop.f32.mrf.mxu1  ;;  %6028 = vmatprep.mubr.bf16.mxu0 %v5768_v59 }
0x1a81   :  { %v7914_v27 = vpop.f32.mrf.mxu1 }
0x1a82   :  { %v5837_v21 = vpack.c.bf16 %v7914_v27, %v7913_v51 }
0x1a83   :  { %v5822_v6 = vpop.f32.mrf.mxu1 }
0x1a84   :  { %v5836_v56 = vpack.c.bf16 %v5822_v6, %v5819_v25 }
0x1a86   :  { %6029 = vmatmul.mubr.bf16.gmra.mxu0 %v5835_v52  ;;  %7931 = vmatprep.mubr.bf16.mxu1 %v5836_v56 }
0x1a87   :  { %7932 = vmatmul.mubr.bf16.vlgmr.msra.gmra.mxu1 %v5837_v21 }
0x1b3e   :  { %v7145_v28 = vpop.f32.mrf.mxu0 }
0x1b40   :  { %v7146_v7 = vpop.f32.mrf.mxu0 }
0x1b41   :  { %v7147_v60 = vadd.f32 %v7146_v7, %v7145_v28 }
0x1b42   :  { %v7148_v29 = vpop.f32.mrf.mxu0 }
0x1b43   :  { %v6023_v30 = vadd.f32 %v7147_v60, %v6481_v0 }
0x1b44   :  { %v7149_v63 = vpop.f32.mrf.mxu0 }
0x1b45   :  { %v7150_v20 = vadd.f32 %v7149_v63, %v7148_v29 }
0x1b46   :  { %v7151_v55 = vpop.f32.mrf.mxu0 }
0x1b47   :  { %v7933_v35 = vpop.f32.mrf.mxu1  ;;  %v6026_v32 = vadd.f32 %v7150_v20, %v6481_v0 }
0x1b48   :  { %v7152_v39 = vpop.f32.mrf.mxu0 }
0x1b49   :  { %v7153_v31 = vadd.f32 %v7152_v39, %v7151_v55  ;;  %v6071_v19 = vpop.f32.mrf.mxu1 }
0x1b4a   :  { %v6072_v45 = vadd.f32 %v6071_v19, %v6023_v30  ;;  %v7154_v50 = vpop.f32.mrf.mxu0 }
0x1b4b   :  { %v6031_v42 = vadd.f32 %v7153_v31, %v6481_v0  ;;  %v7934_v14 = vpop.f32.mrf.mxu1 }
0x1b4c   :  { %6086 = vst.msk [vmem:[#allocation44] sm:$0xff] %vm668_vm1, %v6072_v45  ;;  %v7155_v3 = vpop.f32.mrf.mxu0 }
0x1b4d   :  { %v6080_v54 = vadd.f32 %v7933_v35, %v6031_v42  ;;  %v7156_v33 = vadd.f32 %v7155_v3, %v7154_v50  ;;  %v6074_v53 = vpop.f32.mrf.mxu1 }
0x1b4e   :  { %v6075_v34 = vadd.f32 %v6074_v53, %v6026_v32 }
0x1b4f   :  { %6088 = vst.msk [vmem:[#allocation44 + $0x10] sm:$0xff] %vm668_vm1, %v6080_v54  ;;  %v6034_v36 = vadd.f32 %v7156_v33, %v6481_v0 }
0x1b50   :  { %6087 = vst.msk [vmem:[#allocation44 + $0x8] sm:$0xff] %vm668_vm1, %v6075_v34 }
0x1b51   :  { %v6083_v40 = vadd.f32 %v7934_v14, %v6034_v36 }
0x1b53   :  { %6089 = vst.msk [vmem:[#allocation44 + $0x18] sm:$0xff] %vm668_vm1, %v6083_v40 }
0x1b54   :  { %8979 = shalt.err (!%p8976_p13)
}
0x1b55   :  { %6101 = dma.vmem_to_hbm [thread:$0]  %s6096_s19, 512, %s9313_s29, [#allocation4], %s9062_s23, %s9062_s23, %s9063_s26  }
0x1b56   :  { %9016 = dma.done.wait [#allocation4], 512  }
0x1b57   :  { %9017 = vsyncadd [#allocation4], 4294966784 }
0x1b58   :  { %6105 = vsyncpa [#allocation3], 1 }
0x1b59   :  { %6106 = vsyncpa [#allocation6], 1 }
0x1b5a   :  { %6107 = vsyncpa [#allocation9], 1 }
0x1b5b   :  { %6108 = vsyncpa [#allocation12], 1 }
0x1b5c   :  { %6109 = vsyncpa [#allocation15], 1 }
0x1b5d   :  { %6110 = vsyncpa [#allocation18], 1 }
0x1b5e   :  { %6111 = vsyncpa [#allocation21], 1 }
0x1b5f   :  { %6112 = vsyncpa [#allocation24], 1 }
0x1b60   :  { %6113 = vsyncpa [#allocation27], 1 }
0x1b61   :  { %6114 = vsyncpa [#allocation30], 1 }
0x1b62   :  { %6115 = vsyncpa [#allocation33], 1 }
0x1b63   :  { %6116 = vsyncpa [#allocation36], 1 }
0x1b64   :  { %6117 = vsyncpa [#allocation39], 1 }
0x1b65   :  { %6118 = vsyncpa [#allocation42], 1 }
0x1b66   :  { %6119 = vsyncpa [#allocation4], 1 }

</bundles_post_ra>
